<compile_context>
chip_gen: v5e
topology: v5e:2x2
jax: 0.10.0
libtpu: 0.0.40
codegen_flags: <defaults>
</compile_context>

<pallas_src>
import math

import jax
import jax.numpy as jnp
from jax.experimental import pallas as pl
from jax.experimental.pallas import tpu as pltpu


# --------------------------------------------------------------------------- #
# In-kernel helpers (operate on VMEM values, NHWC per batch element: (H,W,C))  #
# --------------------------------------------------------------------------- #
def _lerp_table(out_size, in_size):
    """PyTorch bilinear (align_corners=False) source indices/weights (static)."""
    tab = []
    for o in range(out_size):
        src = (o + 0.5) * (in_size / out_size) - 0.5
        src = max(src, 0.0)
        i0 = min(int(math.floor(src)), in_size - 1)
        i1 = min(i0 + 1, in_size - 1)
        f = src - i0
        tab.append((i0, i1, 1.0 - f, f))
    return tab


def _flatten_hw(x):
    """(H, W, C) -> (H*W, C) via static slices + concat (lowering-safe)."""
    h = x.shape[0]
    return jnp.concatenate([x[i] for i in range(h)], axis=0)


def _unflatten_hw(x2, h, w):
    """(H*W, C) -> (H, W, C)."""
    return jnp.concatenate([x2[i * w:(i + 1) * w][None] for i in range(h)],
                           axis=0)


def _dw3x3(x, w9, stride):
    """Depthwise 3x3 conv, padding=1.  x: (H, W, C) f32 value, w9: (9, C) f32.

    Zero padding is built in-kernel with concat (no HBM padded copy).  For
    stride 2 the even rows/cols are selected in-kernel right after the tap
    accumulation (stays in VMEM; unit slices + concat are used instead of
    strided value slices for lowering safety — the extra tap math on the tiny
    8x8 map is negligible, the HBM write/read of the 4x-larger map is gone).
    """
    h, w, c = x.shape
    zr = jnp.zeros((1, w, c), jnp.float32)
    xp = jnp.concatenate([zr, x, zr], axis=0)                # (H+2, W, C)
    zc = jnp.zeros((h + 2, 1, c), jnp.float32)
    xp = jnp.concatenate([zc, xp, zc], axis=1)               # (H+2, W+2, C)

    acc = jnp.zeros((h, w, c), jnp.float32)
    for di in range(3):
        for dj in range(3):
            tap = xp[di:di + h, dj:dj + w, :]
            acc = acc + tap * w9[di * 3 + dj]                # (C,) broadcast
    if stride == 2:
        acc = jnp.concatenate([acc[i:i + 1] for i in range(0, h, 2)], axis=0)
        acc = jnp.concatenate([acc[:, j:j + 1, :] for j in range(0, w, 2)],
                              axis=1)
    return acc


def _pw_bn_relu(x, w_ref, bn_ref):
    """1x1 conv as bf16 MXU matmul (f32 acc) + folded BN + ReLU.

    x: (H, W, Cin) f32; w_ref: (Cin, Cout) bf16; bn_ref: (2, Cout) f32.
    """
    h, w, _ = x.shape
    x2 = _flatten_hw(x).astype(jnp.bfloat16)
    y2 = jnp.dot(x2, w_ref[...], preferred_element_type=jnp.float32)
    y2 = jnp.maximum(y2 * bn_ref[0] + bn_ref[1], 0.0)
    return _unflatten_hw(y2, h, w)


def _upsample2x_bilinear(a):
    """(H, W, C) -> (2H, 2W, C), PyTorch bilinear with align_corners=False."""
    h, w, _ = a.shape
    rows = [w0 * a[i0:i0 + 1] + w1 * a[i1:i1 + 1]
            for (i0, i1, w0, w1) in _lerp_table(2 * h, h)]
    ah = jnp.concatenate(rows, axis=0)                       # (2H, W, C)
    cols = [w0 * ah[:, i0:i0 + 1, :] + w1 * ah[:, i1:i1 + 1, :]
            for (i0, i1, w0, w1) in _lerp_table(2 * w, w)]
    return jnp.concatenate(cols, axis=1)                     # (2H, 2W, C)


def _sigmoid(x):
    # exp on EUP + approximate reciprocal on EUP (keeps the VPU divide free).
    return pl.reciprocal(1.0 + jnp.exp(-x), approx=True)


# --------------------------------------------------------------------------- #
# Fused forward kernel: one grid step == one batch element                     #
# --------------------------------------------------------------------------- #
def _fused_forward_kernel(x3_ref,
                          dw1_ref, pw1_ref, bn1_ref,
                          dw2_ref, pw2_ref, bn2_ref,
                          bnatt_ref,
                          dw3_ref, pw3_ref, bn3_ref,
                          dw4_ref, pw4_ref, bn4_ref,
                          fcw_ref, fcb_ref,
                          out_ref, feat_ref):
    x3 = x3_ref[0]                                           # (H, W, C1) f32

    # ---- attention branch: SepConv(C1 -> C1, stride 2) ----
    a = _dw3x3(x3, dw1_ref[...], stride=2)                   # (H/2, W/2, C1)
    a = _pw_bn_relu(a, pw1_ref, bn1_ref)
    a = _dw3x3(a, dw2_ref[...], stride=1)
    a = _pw_bn_relu(a, pw2_ref, bn2_ref)
    # trailing BatchNorm + ReLU + bilinear x2 upsample + sigmoid, gate with x3
    a = jnp.maximum(a * bnatt_ref[0] + bnatt_ref[1], 0.0)
    att = _sigmoid(_upsample2x_bilinear(a))                  # (H, W, C1)
    fea = att * x3

    # ---- scala branch: SepConv(C1 -> C2, stride 2) ----
    s = _dw3x3(fea, dw3_ref[...], stride=2)                  # (H/2, W/2, C1)
    s = _pw_bn_relu(s, pw3_ref, bn3_ref)
    s = _dw3x3(s, dw4_ref[...], stride=1)
    s2 = _flatten_hw(s).astype(jnp.bfloat16)                 # (H/2*W/2, C1)
    z = jnp.dot(s2, pw4_ref[...], preferred_element_type=jnp.float32)
    z = jnp.maximum(z * bn4_ref[0] + bn4_ref[1], 0.0)        # (H/2*W/2, C2)

    # ---- AvgPool2d(4,4) over the (H/2, W/2) map + Linear ----
    feat = jnp.sum(z, axis=0, keepdims=True) * (1.0 / z.shape[0])   # (1, C2)
    feat_ref[...] = feat.reshape(feat_ref.shape)

    logits = jnp.dot(feat, fcw_ref[...],
                     preferred_element_type=jnp.float32) + fcb_ref[...]
    out_ref[...] = logits.reshape(out_ref.shape)


# --------------------------------------------------------------------------- #
# Wrapper: single pallas_call over the whole forward                           #
# --------------------------------------------------------------------------- #
def _bn_fold(bn, eps=1e-5):
    gamma, beta, mean, var = bn
    scale = gamma / jnp.sqrt(var + eps)
    shift = beta - mean * scale
    return jnp.stack([scale, shift], axis=0)                 # (2, C)


def resnet_attention3_forward(x3_nchw, p):
    x3 = jnp.transpose(x3_nchw, (0, 2, 3, 1)).astype(jnp.float32)   # NCHW->NHWC
    b, h, w, c1 = x3.shape
    c2 = p['pw4'].shape[1]
    nc = p['fc_w'].shape[1]

    bn1, bn2 = _bn_fold(p['bn1']), _bn_fold(p['bn2'])
    bnatt = _bn_fold(p['bn_att'])
    bn3, bn4 = _bn_fold(p['bn3']), _bn_fold(p['bn4'])

    # Pointwise-conv weights as bf16 for the MXU (f32 accumulation in-kernel).
    pw1 = p['pw1'].astype(jnp.bfloat16)
    pw2 = p['pw2'].astype(jnp.bfloat16)
    pw3 = p['pw3'].astype(jnp.bfloat16)
    pw4 = p['pw4'].astype(jnp.bfloat16)

    def full(shape):
        return pl.BlockSpec(shape, lambda i: (0,) * len(shape))

    out3, feat3 = pl.pallas_call(
        _fused_forward_kernel,
        out_shape=(jax.ShapeDtypeStruct((b, 1, nc), jnp.float32),
                   jax.ShapeDtypeStruct((b, 1, c2), jnp.float32)),
        grid=(b,),
        in_specs=[
            pl.BlockSpec((1, h, w, c1), lambda i: (i, 0, 0, 0)),   # x3
            full((9, c1)), full((c1, c1)), full((2, c1)),          # dw1, pw1, bn1
            full((9, c1)), full((c1, c1)), full((2, c1)),          # dw2, pw2, bn2
            full((2, c1)),                                         # bn_att
            full((9, c1)), full((c1, c1)), full((2, c1)),          # dw3, pw3, bn3
            full((9, c1)), full((c1, c2)), full((2, c2)),          # dw4, pw4, bn4
            full((c2, nc)), full((1, nc)),                         # fc_w, fc_b
        ],
        out_specs=(pl.BlockSpec((1, 1, nc), lambda i: (i, 0, 0)),
                   pl.BlockSpec((1, 1, c2), lambda i: (i, 0, 0))),
        compiler_params=pltpu.CompilerParams(
            dimension_semantics=("parallel",)),
    )(x3, p['dw1'], pw1, bn1, p['dw2'], pw2, bn2, bnatt,
      p['dw3'], pw3, bn3, p['dw4'], pw4, bn4, p['fc_w'], p['fc_b'])

    out = out3[:, 0, :]
    feature_out = feat3[:, 0, :]
    return out, feature_out


# --------------------------------------------------------------------------- #
# Deterministic parameter init (inference-mode BN running stats included)      #
# --------------------------------------------------------------------------- #
def init_params(key, expansion=1, num_classes=100):
    c1 = 256 * expansion
    c2 = 512 * expansion
    ks = jax.random.split(key, 16)

    def conv(k, shape, scl=0.05):
        return jax.random.normal(k, shape, jnp.float32) * scl

    def bn(k, c):
        kg, kb, km, kv = jax.random.split(k, 4)
        gamma = 1.0 + 0.1 * jax.random.normal(kg, (c,), jnp.float32)
        beta = 0.1 * jax.random.normal(kb, (c,), jnp.float32)
        mean = 0.1 * jax.random.normal(km, (c,), jnp.float32)
        var = jnp.abs(jax.random.normal(kv, (c,), jnp.float32)) + 0.5
        return (gamma, beta, mean, var)

    return {
        # SepConv #1 (attention): depthwise as (9, C) taps; pointwise as (Cin, Cout)
        'dw1': conv(ks[0], (9, c1)),
        'pw1': conv(ks[1], (c1, c1)),
        'bn1': bn(ks[2], c1),
        'dw2': conv(ks[3], (9, c1)),
        'pw2': conv(ks[4], (c1, c1)),
        'bn2': bn(ks[5], c1),
        # attention's trailing BatchNorm2d(256)
        'bn_att': bn(ks[6], c1),
        # SepConv #2 (scala)
        'dw3': conv(ks[7], (9, c1)),
        'pw3': conv(ks[8], (c1, c1)),
        'bn3': bn(ks[9], c1),
        'dw4': conv(ks[10], (9, c1)),
        'pw4': conv(ks[11], (c1, c2)),
        'bn4': bn(ks[12], c2),
        # fc: Linear(512, num_classes); stored transposed (in, out)
        'fc_w': conv(ks[13], (c2, num_classes)),
        'fc_b': conv(ks[14], (1, num_classes)),
    }


if __name__ == "__main__":
    key = jax.random.PRNGKey(0)
    kx, kp = jax.random.split(key)
    # x3 spatial must be 8x8 so AvgPool2d(4,4) yields 1x1 and the fc in-dim is 512.
    B, C, H, W = 2, 256, 8, 8
    x3 = jax.random.normal(kx, (B, C, H, W), jnp.float32)
    params = init_params(kp)

    out, feature_out = jax.jit(resnet_attention3_forward)(x3, params)
    jax.block_until_ready((out, feature_out))
    assert out.shape == (B, 100), out.shape
    assert feature_out.shape == (B, 512), feature_out.shape
    print("KERNEL_OK")
</pallas_src>

<mosaic_0001>
module attributes {stable_mosaic.version = 11 : i64} {
  func.func @_fused_forward_kernel(%arg0: i32, %arg1: memref<1x8x8x256xf32, #tpu.memory_space<vmem>>, %arg2: memref<9x256xf32, #tpu.memory_space<vmem>>, %arg3: memref<256x256xbf16, #tpu.memory_space<vmem>>, %arg4: memref<2x256xf32, #tpu.memory_space<vmem>>, %arg5: memref<9x256xf32, #tpu.memory_space<vmem>>, %arg6: memref<256x256xbf16, #tpu.memory_space<vmem>>, %arg7: memref<2x256xf32, #tpu.memory_space<vmem>>, %arg8: memref<2x256xf32, #tpu.memory_space<vmem>>, %arg9: memref<9x256xf32, #tpu.memory_space<vmem>>, %arg10: memref<256x256xbf16, #tpu.memory_space<vmem>>, %arg11: memref<2x256xf32, #tpu.memory_space<vmem>>, %arg12: memref<9x256xf32, #tpu.memory_space<vmem>>, %arg13: memref<256x512xbf16, #tpu.memory_space<vmem>>, %arg14: memref<2x512xf32, #tpu.memory_space<vmem>>, %arg15: memref<512x100xf32, #tpu.memory_space<vmem>>, %arg16: memref<1x100xf32, #tpu.memory_space<vmem>>, %arg17: memref<1x1x100xf32, #tpu.memory_space<vmem>>, %arg18: memref<1x1x512xf32, #tpu.memory_space<vmem>>) attributes {dimension_semantics = [#tpu.dimension_semantics<parallel>], iteration_bounds = array<i64: 2>, scalar_prefetch = 0 : i64, scratch_operands = 0 : i64, tpu.core_type = #tpu.core_type<tc>, window_params = [{transform_indices = @transform_0, window_bounds = array<i64: 1, 8, 8, 256>}, {pipeline_mode = #tpu.pipeline_mode<synchronous>, transform_indices = @transform_1, window_bounds = array<i64: 9, 256>}, {pipeline_mode = #tpu.pipeline_mode<synchronous>, transform_indices = @transform_2, window_bounds = array<i64: 256, 256>}, {pipeline_mode = #tpu.pipeline_mode<synchronous>, transform_indices = @transform_3, window_bounds = array<i64: 2, 256>}, {pipeline_mode = #tpu.pipeline_mode<synchronous>, transform_indices = @transform_4, window_bounds = array<i64: 9, 256>}, {pipeline_mode = #tpu.pipeline_mode<synchronous>, transform_indices = @transform_5, window_bounds = array<i64: 256, 256>}, {pipeline_mode = #tpu.pipeline_mode<synchronous>, transform_indices = @transform_6, window_bounds = array<i64: 2, 256>}, {pipeline_mode = #tpu.pipeline_mode<synchronous>, transform_indices = @transform_7, window_bounds = array<i64: 2, 256>}, {pipeline_mode = #tpu.pipeline_mode<synchronous>, transform_indices = @transform_8, window_bounds = array<i64: 9, 256>}, {pipeline_mode = #tpu.pipeline_mode<synchronous>, transform_indices = @transform_9, window_bounds = array<i64: 256, 256>}, {pipeline_mode = #tpu.pipeline_mode<synchronous>, transform_indices = @transform_10, window_bounds = array<i64: 2, 256>}, {pipeline_mode = #tpu.pipeline_mode<synchronous>, transform_indices = @transform_11, window_bounds = array<i64: 9, 256>}, {pipeline_mode = #tpu.pipeline_mode<synchronous>, transform_indices = @transform_12, window_bounds = array<i64: 256, 512>}, {pipeline_mode = #tpu.pipeline_mode<synchronous>, transform_indices = @transform_13, window_bounds = array<i64: 2, 512>}, {pipeline_mode = #tpu.pipeline_mode<synchronous>, transform_indices = @transform_14, window_bounds = array<i64: 512, 100>}, {pipeline_mode = #tpu.pipeline_mode<synchronous>, transform_indices = @transform_15, window_bounds = array<i64: 1, 100>}, {transform_indices = @transform_16, window_bounds = array<i64: 1, 1, 100>}, {transform_indices = @transform_17, window_bounds = array<i64: 1, 1, 512>}]} {
    %c0 = arith.constant 0 : index
    %c0_0 = arith.constant 0 : index
    %c0_1 = arith.constant 0 : index
    %c0_2 = arith.constant 0 : index
    %0 = vector.load %arg1[%c0, %c0_0, %c0_1, %c0_2] : memref<1x8x8x256xf32, #tpu.memory_space<vmem>>, vector<1x8x8x256xf32>
    %1 = vector.shape_cast %0 : vector<1x8x8x256xf32> to vector<8x8x256xf32>
    %c0_3 = arith.constant 0 : index
    %c0_4 = arith.constant 0 : index
    %2 = vector.load %arg2[%c0_3, %c0_4] : memref<9x256xf32, #tpu.memory_space<vmem>>, vector<9x256xf32>
    %cst = arith.constant 0.000000e+00 : f32
    %3 = vector.broadcast %cst : f32 to vector<1x8x256xf32>
    %4 = tpu.concatenate %3, %1, %3 in 0 : vector<1x8x256xf32>, vector<8x8x256xf32>, vector<1x8x256xf32> -> vector<10x8x256xf32>
    %cst_5 = arith.constant 0.000000e+00 : f32
    %5 = vector.broadcast %cst_5 : f32 to vector<10x1x256xf32>
    %6 = tpu.concatenate %5, %4, %5 in 1 : vector<10x1x256xf32>, vector<10x8x256xf32>, vector<10x1x256xf32> -> vector<10x10x256xf32>
    %cst_6 = arith.constant 0.000000e+00 : f32
    %7 = vector.broadcast %cst_6 : f32 to vector<8x8x256xf32>
    %8 = vector.extract_strided_slice %6 {offsets = [0, 0, 0], sizes = [8, 8, 256], strides = [1, 1, 1]} : vector<10x10x256xf32> to vector<8x8x256xf32>
    %9 = vector.extract_strided_slice %2 {offsets = [0, 0], sizes = [1, 256], strides = [1, 1]} : vector<9x256xf32> to vector<1x256xf32>
    %10 = vector.shape_cast %9 : vector<1x256xf32> to vector<256xf32>
    %11 = vector.shape_cast %10 : vector<256xf32> to vector<1x1x256xf32>
    %12 = vector.broadcast %11 : vector<1x1x256xf32> to vector<8x8x256xf32>
    %13 = arith.mulf %8, %12 : vector<8x8x256xf32>
    %14 = arith.addf %7, %13 : vector<8x8x256xf32>
    %15 = vector.extract_strided_slice %6 {offsets = [0, 1, 0], sizes = [8, 8, 256], strides = [1, 1, 1]} : vector<10x10x256xf32> to vector<8x8x256xf32>
    %16 = vector.extract_strided_slice %2 {offsets = [1, 0], sizes = [1, 256], strides = [1, 1]} : vector<9x256xf32> to vector<1x256xf32>
    %17 = vector.shape_cast %16 : vector<1x256xf32> to vector<256xf32>
    %18 = vector.shape_cast %17 : vector<256xf32> to vector<1x1x256xf32>
    %19 = vector.broadcast %18 : vector<1x1x256xf32> to vector<8x8x256xf32>
    %20 = arith.mulf %15, %19 : vector<8x8x256xf32>
    %21 = arith.addf %14, %20 : vector<8x8x256xf32>
    %22 = vector.extract_strided_slice %6 {offsets = [0, 2, 0], sizes = [8, 8, 256], strides = [1, 1, 1]} : vector<10x10x256xf32> to vector<8x8x256xf32>
    %23 = vector.extract_strided_slice %2 {offsets = [2, 0], sizes = [1, 256], strides = [1, 1]} : vector<9x256xf32> to vector<1x256xf32>
    %24 = vector.shape_cast %23 : vector<1x256xf32> to vector<256xf32>
    %25 = vector.shape_cast %24 : vector<256xf32> to vector<1x1x256xf32>
    %26 = vector.broadcast %25 : vector<1x1x256xf32> to vector<8x8x256xf32>
    %27 = arith.mulf %22, %26 : vector<8x8x256xf32>
    %28 = arith.addf %21, %27 : vector<8x8x256xf32>
    %29 = vector.extract_strided_slice %6 {offsets = [1, 0, 0], sizes = [8, 8, 256], strides = [1, 1, 1]} : vector<10x10x256xf32> to vector<8x8x256xf32>
    %30 = vector.extract_strided_slice %2 {offsets = [3, 0], sizes = [1, 256], strides = [1, 1]} : vector<9x256xf32> to vector<1x256xf32>
    %31 = vector.shape_cast %30 : vector<1x256xf32> to vector<256xf32>
    %32 = vector.shape_cast %31 : vector<256xf32> to vector<1x1x256xf32>
    %33 = vector.broadcast %32 : vector<1x1x256xf32> to vector<8x8x256xf32>
    %34 = arith.mulf %29, %33 : vector<8x8x256xf32>
    %35 = arith.addf %28, %34 : vector<8x8x256xf32>
    %36 = vector.extract_strided_slice %6 {offsets = [1, 1, 0], sizes = [8, 8, 256], strides = [1, 1, 1]} : vector<10x10x256xf32> to vector<8x8x256xf32>
    %37 = vector.extract_strided_slice %2 {offsets = [4, 0], sizes = [1, 256], strides = [1, 1]} : vector<9x256xf32> to vector<1x256xf32>
    %38 = vector.shape_cast %37 : vector<1x256xf32> to vector<256xf32>
    %39 = vector.shape_cast %38 : vector<256xf32> to vector<1x1x256xf32>
    %40 = vector.broadcast %39 : vector<1x1x256xf32> to vector<8x8x256xf32>
    %41 = arith.mulf %36, %40 : vector<8x8x256xf32>
    %42 = arith.addf %35, %41 : vector<8x8x256xf32>
    %43 = vector.extract_strided_slice %6 {offsets = [1, 2, 0], sizes = [8, 8, 256], strides = [1, 1, 1]} : vector<10x10x256xf32> to vector<8x8x256xf32>
    %44 = vector.extract_strided_slice %2 {offsets = [5, 0], sizes = [1, 256], strides = [1, 1]} : vector<9x256xf32> to vector<1x256xf32>
    %45 = vector.shape_cast %44 : vector<1x256xf32> to vector<256xf32>
    %46 = vector.shape_cast %45 : vector<256xf32> to vector<1x1x256xf32>
    %47 = vector.broadcast %46 : vector<1x1x256xf32> to vector<8x8x256xf32>
    %48 = arith.mulf %43, %47 : vector<8x8x256xf32>
    %49 = arith.addf %42, %48 : vector<8x8x256xf32>
    %50 = vector.extract_strided_slice %6 {offsets = [2, 0, 0], sizes = [8, 8, 256], strides = [1, 1, 1]} : vector<10x10x256xf32> to vector<8x8x256xf32>
    %51 = vector.extract_strided_slice %2 {offsets = [6, 0], sizes = [1, 256], strides = [1, 1]} : vector<9x256xf32> to vector<1x256xf32>
    %52 = vector.shape_cast %51 : vector<1x256xf32> to vector<256xf32>
    %53 = vector.shape_cast %52 : vector<256xf32> to vector<1x1x256xf32>
    %54 = vector.broadcast %53 : vector<1x1x256xf32> to vector<8x8x256xf32>
    %55 = arith.mulf %50, %54 : vector<8x8x256xf32>
    %56 = arith.addf %49, %55 : vector<8x8x256xf32>
    %57 = vector.extract_strided_slice %6 {offsets = [2, 1, 0], sizes = [8, 8, 256], strides = [1, 1, 1]} : vector<10x10x256xf32> to vector<8x8x256xf32>
    %58 = vector.extract_strided_slice %2 {offsets = [7, 0], sizes = [1, 256], strides = [1, 1]} : vector<9x256xf32> to vector<1x256xf32>
    %59 = vector.shape_cast %58 : vector<1x256xf32> to vector<256xf32>
    %60 = vector.shape_cast %59 : vector<256xf32> to vector<1x1x256xf32>
    %61 = vector.broadcast %60 : vector<1x1x256xf32> to vector<8x8x256xf32>
    %62 = arith.mulf %57, %61 : vector<8x8x256xf32>
    %63 = arith.addf %56, %62 : vector<8x8x256xf32>
    %64 = vector.extract_strided_slice %6 {offsets = [2, 2, 0], sizes = [8, 8, 256], strides = [1, 1, 1]} : vector<10x10x256xf32> to vector<8x8x256xf32>
    %65 = vector.extract_strided_slice %2 {offsets = [8, 0], sizes = [1, 256], strides = [1, 1]} : vector<9x256xf32> to vector<1x256xf32>
    %66 = vector.shape_cast %65 : vector<1x256xf32> to vector<256xf32>
    %67 = vector.shape_cast %66 : vector<256xf32> to vector<1x1x256xf32>
    %68 = vector.broadcast %67 : vector<1x1x256xf32> to vector<8x8x256xf32>
    %69 = arith.mulf %64, %68 : vector<8x8x256xf32>
    %70 = arith.addf %63, %69 : vector<8x8x256xf32>
    %71 = vector.extract_strided_slice %70 {offsets = [0, 0, 0], sizes = [1, 8, 256], strides = [1, 1, 1]} : vector<8x8x256xf32> to vector<1x8x256xf32>
    %72 = vector.extract_strided_slice %70 {offsets = [2, 0, 0], sizes = [1, 8, 256], strides = [1, 1, 1]} : vector<8x8x256xf32> to vector<1x8x256xf32>
    %73 = vector.extract_strided_slice %70 {offsets = [4, 0, 0], sizes = [1, 8, 256], strides = [1, 1, 1]} : vector<8x8x256xf32> to vector<1x8x256xf32>
    %74 = vector.extract_strided_slice %70 {offsets = [6, 0, 0], sizes = [1, 8, 256], strides = [1, 1, 1]} : vector<8x8x256xf32> to vector<1x8x256xf32>
    %75 = tpu.concatenate %71, %72, %73, %74 in 0 : vector<1x8x256xf32>, vector<1x8x256xf32>, vector<1x8x256xf32>, vector<1x8x256xf32> -> vector<4x8x256xf32>
    %76 = vector.extract_strided_slice %75 {offsets = [0, 0, 0], sizes = [4, 1, 256], strides = [1, 1, 1]} : vector<4x8x256xf32> to vector<4x1x256xf32>
    %77 = vector.extract_strided_slice %75 {offsets = [0, 2, 0], sizes = [4, 1, 256], strides = [1, 1, 1]} : vector<4x8x256xf32> to vector<4x1x256xf32>
    %78 = vector.extract_strided_slice %75 {offsets = [0, 4, 0], sizes = [4, 1, 256], strides = [1, 1, 1]} : vector<4x8x256xf32> to vector<4x1x256xf32>
    %79 = vector.extract_strided_slice %75 {offsets = [0, 6, 0], sizes = [4, 1, 256], strides = [1, 1, 1]} : vector<4x8x256xf32> to vector<4x1x256xf32>
    %80 = tpu.concatenate %76, %77, %78, %79 in 1 : vector<4x1x256xf32>, vector<4x1x256xf32>, vector<4x1x256xf32>, vector<4x1x256xf32> -> vector<4x4x256xf32>
    %81 = vector.extract_strided_slice %80 {offsets = [0, 0, 0], sizes = [1, 4, 256], strides = [1, 1, 1]} : vector<4x4x256xf32> to vector<1x4x256xf32>
    %82 = vector.shape_cast %81 : vector<1x4x256xf32> to vector<4x256xf32>
    %83 = vector.extract_strided_slice %80 {offsets = [1, 0, 0], sizes = [1, 4, 256], strides = [1, 1, 1]} : vector<4x4x256xf32> to vector<1x4x256xf32>
    %84 = vector.shape_cast %83 : vector<1x4x256xf32> to vector<4x256xf32>
    %85 = vector.extract_strided_slice %80 {offsets = [2, 0, 0], sizes = [1, 4, 256], strides = [1, 1, 1]} : vector<4x4x256xf32> to vector<1x4x256xf32>
    %86 = vector.shape_cast %85 : vector<1x4x256xf32> to vector<4x256xf32>
    %87 = vector.extract_strided_slice %80 {offsets = [3, 0, 0], sizes = [1, 4, 256], strides = [1, 1, 1]} : vector<4x4x256xf32> to vector<1x4x256xf32>
    %88 = vector.shape_cast %87 : vector<1x4x256xf32> to vector<4x256xf32>
    %89 = tpu.concatenate %82, %84, %86, %88 in 0 : vector<4x256xf32>, vector<4x256xf32>, vector<4x256xf32>, vector<4x256xf32> -> vector<16x256xf32>
    %90 = arith.truncf %89 : vector<16x256xf32> to vector<16x256xbf16>
    %c0_7 = arith.constant 0 : index
    %c0_8 = arith.constant 0 : index
    %91 = vector.load %arg3[%c0_7, %c0_8] : memref<256x256xbf16, #tpu.memory_space<vmem>>, vector<256x256xbf16>
    %cst_9 = arith.constant dense<0.000000e+00> : vector<16x256xf32>
    %92 = tpu.matmul %90, %91, %cst_9 {dimension_numbers = #tpu.dot_dimension_numbers<[1], [0], [0], [1], [0, 0, 1, 1], [], []>} : vector<16x256xbf16>, vector<256x256xbf16>, vector<16x256xf32> -> vector<16x256xf32>
    %c0_10 = arith.constant 0 : index
    %c0_11 = arith.constant 0 : index
    %93 = vector.load %arg4[%c0_10, %c0_11] : memref<2x256xf32, #tpu.memory_space<vmem>>, vector<1x256xf32>
    %94 = vector.shape_cast %93 : vector<1x256xf32> to vector<256xf32>
    %95 = vector.shape_cast %94 : vector<256xf32> to vector<1x256xf32>
    %96 = vector.broadcast %95 : vector<1x256xf32> to vector<16x256xf32>
    %97 = arith.mulf %92, %96 : vector<16x256xf32>
    %c1 = arith.constant 1 : index
    %c0_12 = arith.constant 0 : index
    %98 = vector.load %arg4[%c1, %c0_12] : memref<2x256xf32, #tpu.memory_space<vmem>>, vector<1x256xf32>
    %99 = vector.shape_cast %98 : vector<1x256xf32> to vector<256xf32>
    %100 = vector.shape_cast %99 : vector<256xf32> to vector<1x256xf32>
    %101 = vector.broadcast %100 : vector<1x256xf32> to vector<16x256xf32>
    %102 = arith.addf %97, %101 : vector<16x256xf32>
    %cst_13 = arith.constant 0.000000e+00 : f32
    %103 = vector.broadcast %cst_13 : f32 to vector<16x256xf32>
    %104 = arith.maximumf %102, %103 : vector<16x256xf32>
    %105 = vector.extract_strided_slice %104 {offsets = [0, 0], sizes = [4, 256], strides = [1, 1]} : vector<16x256xf32> to vector<4x256xf32>
    %106 = vector.shape_cast %105 : vector<4x256xf32> to vector<1x4x256xf32>
    %107 = vector.extract_strided_slice %104 {offsets = [4, 0], sizes = [4, 256], strides = [1, 1]} : vector<16x256xf32> to vector<4x256xf32>
    %108 = vector.shape_cast %107 : vector<4x256xf32> to vector<1x4x256xf32>
    %109 = vector.extract_strided_slice %104 {offsets = [8, 0], sizes = [4, 256], strides = [1, 1]} : vector<16x256xf32> to vector<4x256xf32>
    %110 = vector.shape_cast %109 : vector<4x256xf32> to vector<1x4x256xf32>
    %111 = vector.extract_strided_slice %104 {offsets = [12, 0], sizes = [4, 256], strides = [1, 1]} : vector<16x256xf32> to vector<4x256xf32>
    %112 = vector.shape_cast %111 : vector<4x256xf32> to vector<1x4x256xf32>
    %113 = tpu.concatenate %106, %108, %110, %112 in 0 : vector<1x4x256xf32>, vector<1x4x256xf32>, vector<1x4x256xf32>, vector<1x4x256xf32> -> vector<4x4x256xf32>
    %c0_14 = arith.constant 0 : index
    %c0_15 = arith.constant 0 : index
    %114 = vector.load %arg5[%c0_14, %c0_15] : memref<9x256xf32, #tpu.memory_space<vmem>>, vector<9x256xf32>
    %cst_16 = arith.constant 0.000000e+00 : f32
    %115 = vector.broadcast %cst_16 : f32 to vector<1x4x256xf32>
    %116 = tpu.concatenate %115, %113, %115 in 0 : vector<1x4x256xf32>, vector<4x4x256xf32>, vector<1x4x256xf32> -> vector<6x4x256xf32>
    %cst_17 = arith.constant 0.000000e+00 : f32
    %117 = vector.broadcast %cst_17 : f32 to vector<6x1x256xf32>
    %118 = tpu.concatenate %117, %116, %117 in 1 : vector<6x1x256xf32>, vector<6x4x256xf32>, vector<6x1x256xf32> -> vector<6x6x256xf32>
    %cst_18 = arith.constant 0.000000e+00 : f32
    %119 = vector.broadcast %cst_18 : f32 to vector<4x4x256xf32>
    %120 = vector.extract_strided_slice %118 {offsets = [0, 0, 0], sizes = [4, 4, 256], strides = [1, 1, 1]} : vector<6x6x256xf32> to vector<4x4x256xf32>
    %121 = vector.extract_strided_slice %114 {offsets = [0, 0], sizes = [1, 256], strides = [1, 1]} : vector<9x256xf32> to vector<1x256xf32>
    %122 = vector.shape_cast %121 : vector<1x256xf32> to vector<256xf32>
    %123 = vector.shape_cast %122 : vector<256xf32> to vector<1x1x256xf32>
    %124 = vector.broadcast %123 : vector<1x1x256xf32> to vector<4x4x256xf32>
    %125 = arith.mulf %120, %124 : vector<4x4x256xf32>
    %126 = arith.addf %119, %125 : vector<4x4x256xf32>
    %127 = vector.extract_strided_slice %118 {offsets = [0, 1, 0], sizes = [4, 4, 256], strides = [1, 1, 1]} : vector<6x6x256xf32> to vector<4x4x256xf32>
    %128 = vector.extract_strided_slice %114 {offsets = [1, 0], sizes = [1, 256], strides = [1, 1]} : vector<9x256xf32> to vector<1x256xf32>
    %129 = vector.shape_cast %128 : vector<1x256xf32> to vector<256xf32>
    %130 = vector.shape_cast %129 : vector<256xf32> to vector<1x1x256xf32>
    %131 = vector.broadcast %130 : vector<1x1x256xf32> to vector<4x4x256xf32>
    %132 = arith.mulf %127, %131 : vector<4x4x256xf32>
    %133 = arith.addf %126, %132 : vector<4x4x256xf32>
    %134 = vector.extract_strided_slice %118 {offsets = [0, 2, 0], sizes = [4, 4, 256], strides = [1, 1, 1]} : vector<6x6x256xf32> to vector<4x4x256xf32>
    %135 = vector.extract_strided_slice %114 {offsets = [2, 0], sizes = [1, 256], strides = [1, 1]} : vector<9x256xf32> to vector<1x256xf32>
    %136 = vector.shape_cast %135 : vector<1x256xf32> to vector<256xf32>
    %137 = vector.shape_cast %136 : vector<256xf32> to vector<1x1x256xf32>
    %138 = vector.broadcast %137 : vector<1x1x256xf32> to vector<4x4x256xf32>
    %139 = arith.mulf %134, %138 : vector<4x4x256xf32>
    %140 = arith.addf %133, %139 : vector<4x4x256xf32>
    %141 = vector.extract_strided_slice %118 {offsets = [1, 0, 0], sizes = [4, 4, 256], strides = [1, 1, 1]} : vector<6x6x256xf32> to vector<4x4x256xf32>
    %142 = vector.extract_strided_slice %114 {offsets = [3, 0], sizes = [1, 256], strides = [1, 1]} : vector<9x256xf32> to vector<1x256xf32>
    %143 = vector.shape_cast %142 : vector<1x256xf32> to vector<256xf32>
    %144 = vector.shape_cast %143 : vector<256xf32> to vector<1x1x256xf32>
    %145 = vector.broadcast %144 : vector<1x1x256xf32> to vector<4x4x256xf32>
    %146 = arith.mulf %141, %145 : vector<4x4x256xf32>
    %147 = arith.addf %140, %146 : vector<4x4x256xf32>
    %148 = vector.extract_strided_slice %118 {offsets = [1, 1, 0], sizes = [4, 4, 256], strides = [1, 1, 1]} : vector<6x6x256xf32> to vector<4x4x256xf32>
    %149 = vector.extract_strided_slice %114 {offsets = [4, 0], sizes = [1, 256], strides = [1, 1]} : vector<9x256xf32> to vector<1x256xf32>
    %150 = vector.shape_cast %149 : vector<1x256xf32> to vector<256xf32>
    %151 = vector.shape_cast %150 : vector<256xf32> to vector<1x1x256xf32>
    %152 = vector.broadcast %151 : vector<1x1x256xf32> to vector<4x4x256xf32>
    %153 = arith.mulf %148, %152 : vector<4x4x256xf32>
    %154 = arith.addf %147, %153 : vector<4x4x256xf32>
    %155 = vector.extract_strided_slice %118 {offsets = [1, 2, 0], sizes = [4, 4, 256], strides = [1, 1, 1]} : vector<6x6x256xf32> to vector<4x4x256xf32>
    %156 = vector.extract_strided_slice %114 {offsets = [5, 0], sizes = [1, 256], strides = [1, 1]} : vector<9x256xf32> to vector<1x256xf32>
    %157 = vector.shape_cast %156 : vector<1x256xf32> to vector<256xf32>
    %158 = vector.shape_cast %157 : vector<256xf32> to vector<1x1x256xf32>
    %159 = vector.broadcast %158 : vector<1x1x256xf32> to vector<4x4x256xf32>
    %160 = arith.mulf %155, %159 : vector<4x4x256xf32>
    %161 = arith.addf %154, %160 : vector<4x4x256xf32>
    %162 = vector.extract_strided_slice %118 {offsets = [2, 0, 0], sizes = [4, 4, 256], strides = [1, 1, 1]} : vector<6x6x256xf32> to vector<4x4x256xf32>
    %163 = vector.extract_strided_slice %114 {offsets = [6, 0], sizes = [1, 256], strides = [1, 1]} : vector<9x256xf32> to vector<1x256xf32>
    %164 = vector.shape_cast %163 : vector<1x256xf32> to vector<256xf32>
    %165 = vector.shape_cast %164 : vector<256xf32> to vector<1x1x256xf32>
    %166 = vector.broadcast %165 : vector<1x1x256xf32> to vector<4x4x256xf32>
    %167 = arith.mulf %162, %166 : vector<4x4x256xf32>
    %168 = arith.addf %161, %167 : vector<4x4x256xf32>
    %169 = vector.extract_strided_slice %118 {offsets = [2, 1, 0], sizes = [4, 4, 256], strides = [1, 1, 1]} : vector<6x6x256xf32> to vector<4x4x256xf32>
    %170 = vector.extract_strided_slice %114 {offsets = [7, 0], sizes = [1, 256], strides = [1, 1]} : vector<9x256xf32> to vector<1x256xf32>
    %171 = vector.shape_cast %170 : vector<1x256xf32> to vector<256xf32>
    %172 = vector.shape_cast %171 : vector<256xf32> to vector<1x1x256xf32>
    %173 = vector.broadcast %172 : vector<1x1x256xf32> to vector<4x4x256xf32>
    %174 = arith.mulf %169, %173 : vector<4x4x256xf32>
    %175 = arith.addf %168, %174 : vector<4x4x256xf32>
    %176 = vector.extract_strided_slice %118 {offsets = [2, 2, 0], sizes = [4, 4, 256], strides = [1, 1, 1]} : vector<6x6x256xf32> to vector<4x4x256xf32>
    %177 = vector.extract_strided_slice %114 {offsets = [8, 0], sizes = [1, 256], strides = [1, 1]} : vector<9x256xf32> to vector<1x256xf32>
    %178 = vector.shape_cast %177 : vector<1x256xf32> to vector<256xf32>
    %179 = vector.shape_cast %178 : vector<256xf32> to vector<1x1x256xf32>
    %180 = vector.broadcast %179 : vector<1x1x256xf32> to vector<4x4x256xf32>
    %181 = arith.mulf %176, %180 : vector<4x4x256xf32>
    %182 = arith.addf %175, %181 : vector<4x4x256xf32>
    %183 = vector.extract_strided_slice %182 {offsets = [0, 0, 0], sizes = [1, 4, 256], strides = [1, 1, 1]} : vector<4x4x256xf32> to vector<1x4x256xf32>
    %184 = vector.shape_cast %183 : vector<1x4x256xf32> to vector<4x256xf32>
    %185 = vector.extract_strided_slice %182 {offsets = [1, 0, 0], sizes = [1, 4, 256], strides = [1, 1, 1]} : vector<4x4x256xf32> to vector<1x4x256xf32>
    %186 = vector.shape_cast %185 : vector<1x4x256xf32> to vector<4x256xf32>
    %187 = vector.extract_strided_slice %182 {offsets = [2, 0, 0], sizes = [1, 4, 256], strides = [1, 1, 1]} : vector<4x4x256xf32> to vector<1x4x256xf32>
    %188 = vector.shape_cast %187 : vector<1x4x256xf32> to vector<4x256xf32>
    %189 = vector.extract_strided_slice %182 {offsets = [3, 0, 0], sizes = [1, 4, 256], strides = [1, 1, 1]} : vector<4x4x256xf32> to vector<1x4x256xf32>
    %190 = vector.shape_cast %189 : vector<1x4x256xf32> to vector<4x256xf32>
    %191 = tpu.concatenate %184, %186, %188, %190 in 0 : vector<4x256xf32>, vector<4x256xf32>, vector<4x256xf32>, vector<4x256xf32> -> vector<16x256xf32>
    %192 = arith.truncf %191 : vector<16x256xf32> to vector<16x256xbf16>
    %c0_19 = arith.constant 0 : index
    %c0_20 = arith.constant 0 : index
    %193 = vector.load %arg6[%c0_19, %c0_20] : memref<256x256xbf16, #tpu.memory_space<vmem>>, vector<256x256xbf16>
    %cst_21 = arith.constant dense<0.000000e+00> : vector<16x256xf32>
    %194 = tpu.matmul %192, %193, %cst_21 {dimension_numbers = #tpu.dot_dimension_numbers<[1], [0], [0], [1], [0, 0, 1, 1], [], []>} : vector<16x256xbf16>, vector<256x256xbf16>, vector<16x256xf32> -> vector<16x256xf32>
    %c0_22 = arith.constant 0 : index
    %c0_23 = arith.constant 0 : index
    %195 = vector.load %arg7[%c0_22, %c0_23] : memref<2x256xf32, #tpu.memory_space<vmem>>, vector<1x256xf32>
    %196 = vector.shape_cast %195 : vector<1x256xf32> to vector<256xf32>
    %197 = vector.shape_cast %196 : vector<256xf32> to vector<1x256xf32>
    %198 = vector.broadcast %197 : vector<1x256xf32> to vector<16x256xf32>
    %199 = arith.mulf %194, %198 : vector<16x256xf32>
    %c1_24 = arith.constant 1 : index
    %c0_25 = arith.constant 0 : index
    %200 = vector.load %arg7[%c1_24, %c0_25] : memref<2x256xf32, #tpu.memory_space<vmem>>, vector<1x256xf32>
    %201 = vector.shape_cast %200 : vector<1x256xf32> to vector<256xf32>
    %202 = vector.shape_cast %201 : vector<256xf32> to vector<1x256xf32>
    %203 = vector.broadcast %202 : vector<1x256xf32> to vector<16x256xf32>
    %204 = arith.addf %199, %203 : vector<16x256xf32>
    %cst_26 = arith.constant 0.000000e+00 : f32
    %205 = vector.broadcast %cst_26 : f32 to vector<16x256xf32>
    %206 = arith.maximumf %204, %205 : vector<16x256xf32>
    %207 = vector.extract_strided_slice %206 {offsets = [0, 0], sizes = [4, 256], strides = [1, 1]} : vector<16x256xf32> to vector<4x256xf32>
    %208 = vector.shape_cast %207 : vector<4x256xf32> to vector<1x4x256xf32>
    %209 = vector.extract_strided_slice %206 {offsets = [4, 0], sizes = [4, 256], strides = [1, 1]} : vector<16x256xf32> to vector<4x256xf32>
    %210 = vector.shape_cast %209 : vector<4x256xf32> to vector<1x4x256xf32>
    %211 = vector.extract_strided_slice %206 {offsets = [8, 0], sizes = [4, 256], strides = [1, 1]} : vector<16x256xf32> to vector<4x256xf32>
    %212 = vector.shape_cast %211 : vector<4x256xf32> to vector<1x4x256xf32>
    %213 = vector.extract_strided_slice %206 {offsets = [12, 0], sizes = [4, 256], strides = [1, 1]} : vector<16x256xf32> to vector<4x256xf32>
    %214 = vector.shape_cast %213 : vector<4x256xf32> to vector<1x4x256xf32>
    %215 = tpu.concatenate %208, %210, %212, %214 in 0 : vector<1x4x256xf32>, vector<1x4x256xf32>, vector<1x4x256xf32>, vector<1x4x256xf32> -> vector<4x4x256xf32>
    %c0_27 = arith.constant 0 : index
    %c0_28 = arith.constant 0 : index
    %216 = vector.load %arg8[%c0_27, %c0_28] : memref<2x256xf32, #tpu.memory_space<vmem>>, vector<1x256xf32>
    %217 = vector.shape_cast %216 : vector<1x256xf32> to vector<256xf32>
    %218 = vector.shape_cast %217 : vector<256xf32> to vector<1x1x256xf32>
    %219 = vector.broadcast %218 : vector<1x1x256xf32> to vector<4x4x256xf32>
    %220 = arith.mulf %215, %219 : vector<4x4x256xf32>
    %c1_29 = arith.constant 1 : index
    %c0_30 = arith.constant 0 : index
    %221 = vector.load %arg8[%c1_29, %c0_30] : memref<2x256xf32, #tpu.memory_space<vmem>>, vector<1x256xf32>
    %222 = vector.shape_cast %221 : vector<1x256xf32> to vector<256xf32>
    %223 = vector.shape_cast %222 : vector<256xf32> to vector<1x1x256xf32>
    %224 = vector.broadcast %223 : vector<1x1x256xf32> to vector<4x4x256xf32>
    %225 = arith.addf %220, %224 : vector<4x4x256xf32>
    %cst_31 = arith.constant 0.000000e+00 : f32
    %226 = vector.broadcast %cst_31 : f32 to vector<4x4x256xf32>
    %227 = arith.maximumf %225, %226 : vector<4x4x256xf32>
    %228 = vector.extract_strided_slice %227 {offsets = [0, 0, 0], sizes = [1, 4, 256], strides = [1, 1, 1]} : vector<4x4x256xf32> to vector<1x4x256xf32>
    %cst_32 = arith.constant 1.000000e+00 : f32
    %229 = vector.broadcast %cst_32 : f32 to vector<1x4x256xf32>
    %230 = arith.mulf %229, %228 : vector<1x4x256xf32>
    %231 = vector.extract_strided_slice %227 {offsets = [1, 0, 0], sizes = [1, 4, 256], strides = [1, 1, 1]} : vector<4x4x256xf32> to vector<1x4x256xf32>
    %cst_33 = arith.constant 0.000000e+00 : f32
    %232 = vector.broadcast %cst_33 : f32 to vector<1x4x256xf32>
    %233 = arith.mulf %232, %231 : vector<1x4x256xf32>
    %234 = arith.addf %230, %233 : vector<1x4x256xf32>
    %235 = vector.extract_strided_slice %227 {offsets = [0, 0, 0], sizes = [1, 4, 256], strides = [1, 1, 1]} : vector<4x4x256xf32> to vector<1x4x256xf32>
    %cst_34 = arith.constant 7.500000e-01 : f32
    %236 = vector.broadcast %cst_34 : f32 to vector<1x4x256xf32>
    %237 = arith.mulf %236, %235 : vector<1x4x256xf32>
    %238 = vector.extract_strided_slice %227 {offsets = [1, 0, 0], sizes = [1, 4, 256], strides = [1, 1, 1]} : vector<4x4x256xf32> to vector<1x4x256xf32>
    %cst_35 = arith.constant 2.500000e-01 : f32
    %239 = vector.broadcast %cst_35 : f32 to vector<1x4x256xf32>
    %240 = arith.mulf %239, %238 : vector<1x4x256xf32>
    %241 = arith.addf %237, %240 : vector<1x4x256xf32>
    %242 = vector.extract_strided_slice %227 {offsets = [0, 0, 0], sizes = [1, 4, 256], strides = [1, 1, 1]} : vector<4x4x256xf32> to vector<1x4x256xf32>
    %cst_36 = arith.constant 2.500000e-01 : f32
    %243 = vector.broadcast %cst_36 : f32 to vector<1x4x256xf32>
    %244 = arith.mulf %243, %242 : vector<1x4x256xf32>
    %245 = vector.extract_strided_slice %227 {offsets = [1, 0, 0], sizes = [1, 4, 256], strides = [1, 1, 1]} : vector<4x4x256xf32> to vector<1x4x256xf32>
    %cst_37 = arith.constant 7.500000e-01 : f32
    %246 = vector.broadcast %cst_37 : f32 to vector<1x4x256xf32>
    %247 = arith.mulf %246, %245 : vector<1x4x256xf32>
    %248 = arith.addf %244, %247 : vector<1x4x256xf32>
    %249 = vector.extract_strided_slice %227 {offsets = [1, 0, 0], sizes = [1, 4, 256], strides = [1, 1, 1]} : vector<4x4x256xf32> to vector<1x4x256xf32>
    %cst_38 = arith.constant 7.500000e-01 : f32
    %250 = vector.broadcast %cst_38 : f32 to vector<1x4x256xf32>
    %251 = arith.mulf %250, %249 : vector<1x4x256xf32>
    %252 = vector.extract_strided_slice %227 {offsets = [2, 0, 0], sizes = [1, 4, 256], strides = [1, 1, 1]} : vector<4x4x256xf32> to vector<1x4x256xf32>
    %cst_39 = arith.constant 2.500000e-01 : f32
    %253 = vector.broadcast %cst_39 : f32 to vector<1x4x256xf32>
    %254 = arith.mulf %253, %252 : vector<1x4x256xf32>
    %255 = arith.addf %251, %254 : vector<1x4x256xf32>
    %256 = vector.extract_strided_slice %227 {offsets = [1, 0, 0], sizes = [1, 4, 256], strides = [1, 1, 1]} : vector<4x4x256xf32> to vector<1x4x256xf32>
    %cst_40 = arith.constant 2.500000e-01 : f32
    %257 = vector.broadcast %cst_40 : f32 to vector<1x4x256xf32>
    %258 = arith.mulf %257, %256 : vector<1x4x256xf32>
    %259 = vector.extract_strided_slice %227 {offsets = [2, 0, 0], sizes = [1, 4, 256], strides = [1, 1, 1]} : vector<4x4x256xf32> to vector<1x4x256xf32>
    %cst_41 = arith.constant 7.500000e-01 : f32
    %260 = vector.broadcast %cst_41 : f32 to vector<1x4x256xf32>
    %261 = arith.mulf %260, %259 : vector<1x4x256xf32>
    %262 = arith.addf %258, %261 : vector<1x4x256xf32>
    %263 = vector.extract_strided_slice %227 {offsets = [2, 0, 0], sizes = [1, 4, 256], strides = [1, 1, 1]} : vector<4x4x256xf32> to vector<1x4x256xf32>
    %cst_42 = arith.constant 7.500000e-01 : f32
    %264 = vector.broadcast %cst_42 : f32 to vector<1x4x256xf32>
    %265 = arith.mulf %264, %263 : vector<1x4x256xf32>
    %266 = vector.extract_strided_slice %227 {offsets = [3, 0, 0], sizes = [1, 4, 256], strides = [1, 1, 1]} : vector<4x4x256xf32> to vector<1x4x256xf32>
    %cst_43 = arith.constant 2.500000e-01 : f32
    %267 = vector.broadcast %cst_43 : f32 to vector<1x4x256xf32>
    %268 = arith.mulf %267, %266 : vector<1x4x256xf32>
    %269 = arith.addf %265, %268 : vector<1x4x256xf32>
    %270 = vector.extract_strided_slice %227 {offsets = [2, 0, 0], sizes = [1, 4, 256], strides = [1, 1, 1]} : vector<4x4x256xf32> to vector<1x4x256xf32>
    %cst_44 = arith.constant 2.500000e-01 : f32
    %271 = vector.broadcast %cst_44 : f32 to vector<1x4x256xf32>
    %272 = arith.mulf %271, %270 : vector<1x4x256xf32>
    %273 = vector.extract_strided_slice %227 {offsets = [3, 0, 0], sizes = [1, 4, 256], strides = [1, 1, 1]} : vector<4x4x256xf32> to vector<1x4x256xf32>
    %cst_45 = arith.constant 7.500000e-01 : f32
    %274 = vector.broadcast %cst_45 : f32 to vector<1x4x256xf32>
    %275 = arith.mulf %274, %273 : vector<1x4x256xf32>
    %276 = arith.addf %272, %275 : vector<1x4x256xf32>
    %277 = vector.extract_strided_slice %227 {offsets = [3, 0, 0], sizes = [1, 4, 256], strides = [1, 1, 1]} : vector<4x4x256xf32> to vector<1x4x256xf32>
    %cst_46 = arith.constant 7.500000e-01 : f32
    %278 = vector.broadcast %cst_46 : f32 to vector<1x4x256xf32>
    %279 = arith.mulf %278, %277 : vector<1x4x256xf32>
    %280 = vector.extract_strided_slice %227 {offsets = [3, 0, 0], sizes = [1, 4, 256], strides = [1, 1, 1]} : vector<4x4x256xf32> to vector<1x4x256xf32>
    %cst_47 = arith.constant 2.500000e-01 : f32
    %281 = vector.broadcast %cst_47 : f32 to vector<1x4x256xf32>
    %282 = arith.mulf %281, %280 : vector<1x4x256xf32>
    %283 = arith.addf %279, %282 : vector<1x4x256xf32>
    %284 = tpu.concatenate %234, %241, %248, %255, %262, %269, %276, %283 in 0 : vector<1x4x256xf32>, vector<1x4x256xf32>, vector<1x4x256xf32>, vector<1x4x256xf32>, vector<1x4x256xf32>, vector<1x4x256xf32>, vector<1x4x256xf32>, vector<1x4x256xf32> -> vector<8x4x256xf32>
    %285 = vector.extract_strided_slice %284 {offsets = [0, 0, 0], sizes = [8, 1, 256], strides = [1, 1, 1]} : vector<8x4x256xf32> to vector<8x1x256xf32>
    %cst_48 = arith.constant 1.000000e+00 : f32
    %286 = vector.broadcast %cst_48 : f32 to vector<8x1x256xf32>
    %287 = arith.mulf %286, %285 : vector<8x1x256xf32>
    %288 = vector.extract_strided_slice %284 {offsets = [0, 1, 0], sizes = [8, 1, 256], strides = [1, 1, 1]} : vector<8x4x256xf32> to vector<8x1x256xf32>
    %cst_49 = arith.constant 0.000000e+00 : f32
    %289 = vector.broadcast %cst_49 : f32 to vector<8x1x256xf32>
    %290 = arith.mulf %289, %288 : vector<8x1x256xf32>
    %291 = arith.addf %287, %290 : vector<8x1x256xf32>
    %292 = vector.extract_strided_slice %284 {offsets = [0, 0, 0], sizes = [8, 1, 256], strides = [1, 1, 1]} : vector<8x4x256xf32> to vector<8x1x256xf32>
    %cst_50 = arith.constant 7.500000e-01 : f32
    %293 = vector.broadcast %cst_50 : f32 to vector<8x1x256xf32>
    %294 = arith.mulf %293, %292 : vector<8x1x256xf32>
    %295 = vector.extract_strided_slice %284 {offsets = [0, 1, 0], sizes = [8, 1, 256], strides = [1, 1, 1]} : vector<8x4x256xf32> to vector<8x1x256xf32>
    %cst_51 = arith.constant 2.500000e-01 : f32
    %296 = vector.broadcast %cst_51 : f32 to vector<8x1x256xf32>
    %297 = arith.mulf %296, %295 : vector<8x1x256xf32>
    %298 = arith.addf %294, %297 : vector<8x1x256xf32>
    %299 = vector.extract_strided_slice %284 {offsets = [0, 0, 0], sizes = [8, 1, 256], strides = [1, 1, 1]} : vector<8x4x256xf32> to vector<8x1x256xf32>
    %cst_52 = arith.constant 2.500000e-01 : f32
    %300 = vector.broadcast %cst_52 : f32 to vector<8x1x256xf32>
    %301 = arith.mulf %300, %299 : vector<8x1x256xf32>
    %302 = vector.extract_strided_slice %284 {offsets = [0, 1, 0], sizes = [8, 1, 256], strides = [1, 1, 1]} : vector<8x4x256xf32> to vector<8x1x256xf32>
    %cst_53 = arith.constant 7.500000e-01 : f32
    %303 = vector.broadcast %cst_53 : f32 to vector<8x1x256xf32>
    %304 = arith.mulf %303, %302 : vector<8x1x256xf32>
    %305 = arith.addf %301, %304 : vector<8x1x256xf32>
    %306 = vector.extract_strided_slice %284 {offsets = [0, 1, 0], sizes = [8, 1, 256], strides = [1, 1, 1]} : vector<8x4x256xf32> to vector<8x1x256xf32>
    %cst_54 = arith.constant 7.500000e-01 : f32
    %307 = vector.broadcast %cst_54 : f32 to vector<8x1x256xf32>
    %308 = arith.mulf %307, %306 : vector<8x1x256xf32>
    %309 = vector.extract_strided_slice %284 {offsets = [0, 2, 0], sizes = [8, 1, 256], strides = [1, 1, 1]} : vector<8x4x256xf32> to vector<8x1x256xf32>
    %cst_55 = arith.constant 2.500000e-01 : f32
    %310 = vector.broadcast %cst_55 : f32 to vector<8x1x256xf32>
    %311 = arith.mulf %310, %309 : vector<8x1x256xf32>
    %312 = arith.addf %308, %311 : vector<8x1x256xf32>
    %313 = vector.extract_strided_slice %284 {offsets = [0, 1, 0], sizes = [8, 1, 256], strides = [1, 1, 1]} : vector<8x4x256xf32> to vector<8x1x256xf32>
    %cst_56 = arith.constant 2.500000e-01 : f32
    %314 = vector.broadcast %cst_56 : f32 to vector<8x1x256xf32>
    %315 = arith.mulf %314, %313 : vector<8x1x256xf32>
    %316 = vector.extract_strided_slice %284 {offsets = [0, 2, 0], sizes = [8, 1, 256], strides = [1, 1, 1]} : vector<8x4x256xf32> to vector<8x1x256xf32>
    %cst_57 = arith.constant 7.500000e-01 : f32
    %317 = vector.broadcast %cst_57 : f32 to vector<8x1x256xf32>
    %318 = arith.mulf %317, %316 : vector<8x1x256xf32>
    %319 = arith.addf %315, %318 : vector<8x1x256xf32>
    %320 = vector.extract_strided_slice %284 {offsets = [0, 2, 0], sizes = [8, 1, 256], strides = [1, 1, 1]} : vector<8x4x256xf32> to vector<8x1x256xf32>
    %cst_58 = arith.constant 7.500000e-01 : f32
    %321 = vector.broadcast %cst_58 : f32 to vector<8x1x256xf32>
    %322 = arith.mulf %321, %320 : vector<8x1x256xf32>
    %323 = vector.extract_strided_slice %284 {offsets = [0, 3, 0], sizes = [8, 1, 256], strides = [1, 1, 1]} : vector<8x4x256xf32> to vector<8x1x256xf32>
    %cst_59 = arith.constant 2.500000e-01 : f32
    %324 = vector.broadcast %cst_59 : f32 to vector<8x1x256xf32>
    %325 = arith.mulf %324, %323 : vector<8x1x256xf32>
    %326 = arith.addf %322, %325 : vector<8x1x256xf32>
    %327 = vector.extract_strided_slice %284 {offsets = [0, 2, 0], sizes = [8, 1, 256], strides = [1, 1, 1]} : vector<8x4x256xf32> to vector<8x1x256xf32>
    %cst_60 = arith.constant 2.500000e-01 : f32
    %328 = vector.broadcast %cst_60 : f32 to vector<8x1x256xf32>
    %329 = arith.mulf %328, %327 : vector<8x1x256xf32>
    %330 = vector.extract_strided_slice %284 {offsets = [0, 3, 0], sizes = [8, 1, 256], strides = [1, 1, 1]} : vector<8x4x256xf32> to vector<8x1x256xf32>
    %cst_61 = arith.constant 7.500000e-01 : f32
    %331 = vector.broadcast %cst_61 : f32 to vector<8x1x256xf32>
    %332 = arith.mulf %331, %330 : vector<8x1x256xf32>
    %333 = arith.addf %329, %332 : vector<8x1x256xf32>
    %334 = vector.extract_strided_slice %284 {offsets = [0, 3, 0], sizes = [8, 1, 256], strides = [1, 1, 1]} : vector<8x4x256xf32> to vector<8x1x256xf32>
    %cst_62 = arith.constant 7.500000e-01 : f32
    %335 = vector.broadcast %cst_62 : f32 to vector<8x1x256xf32>
    %336 = arith.mulf %335, %334 : vector<8x1x256xf32>
    %337 = vector.extract_strided_slice %284 {offsets = [0, 3, 0], sizes = [8, 1, 256], strides = [1, 1, 1]} : vector<8x4x256xf32> to vector<8x1x256xf32>
    %cst_63 = arith.constant 2.500000e-01 : f32
    %338 = vector.broadcast %cst_63 : f32 to vector<8x1x256xf32>
    %339 = arith.mulf %338, %337 : vector<8x1x256xf32>
    %340 = arith.addf %336, %339 : vector<8x1x256xf32>
    %341 = tpu.concatenate %291, %298, %305, %312, %319, %326, %333, %340 in 1 : vector<8x1x256xf32>, vector<8x1x256xf32>, vector<8x1x256xf32>, vector<8x1x256xf32>, vector<8x1x256xf32>, vector<8x1x256xf32>, vector<8x1x256xf32>, vector<8x1x256xf32> -> vector<8x8x256xf32>
    %cst_64 = arith.constant 0.000000e+00 : f32
    %342 = vector.broadcast %cst_64 : f32 to vector<8x8x256xf32>
    %343 = arith.subf %342, %341 : vector<8x8x256xf32>
    %344 = math.exp %343 : vector<8x8x256xf32>
    %cst_65 = arith.constant 1.000000e+00 : f32
    %345 = vector.broadcast %cst_65 : f32 to vector<8x8x256xf32>
    %346 = arith.addf %345, %344 : vector<8x8x256xf32>
    %347 = tpu.reciprocal %346 {approx = true} : vector<8x8x256xf32> -> vector<8x8x256xf32>
    %348 = arith.mulf %347, %1 : vector<8x8x256xf32>
    %c0_66 = arith.constant 0 : index
    %c0_67 = arith.constant 0 : index
    %349 = vector.load %arg9[%c0_66, %c0_67] : memref<9x256xf32, #tpu.memory_space<vmem>>, vector<9x256xf32>
    %cst_68 = arith.constant 0.000000e+00 : f32
    %350 = vector.broadcast %cst_68 : f32 to vector<1x8x256xf32>
    %351 = tpu.concatenate %350, %348, %350 in 0 : vector<1x8x256xf32>, vector<8x8x256xf32>, vector<1x8x256xf32> -> vector<10x8x256xf32>
    %cst_69 = arith.constant 0.000000e+00 : f32
    %352 = vector.broadcast %cst_69 : f32 to vector<10x1x256xf32>
    %353 = tpu.concatenate %352, %351, %352 in 1 : vector<10x1x256xf32>, vector<10x8x256xf32>, vector<10x1x256xf32> -> vector<10x10x256xf32>
    %cst_70 = arith.constant 0.000000e+00 : f32
    %354 = vector.broadcast %cst_70 : f32 to vector<8x8x256xf32>
    %355 = vector.extract_strided_slice %353 {offsets = [0, 0, 0], sizes = [8, 8, 256], strides = [1, 1, 1]} : vector<10x10x256xf32> to vector<8x8x256xf32>
    %356 = vector.extract_strided_slice %349 {offsets = [0, 0], sizes = [1, 256], strides = [1, 1]} : vector<9x256xf32> to vector<1x256xf32>
    %357 = vector.shape_cast %356 : vector<1x256xf32> to vector<256xf32>
    %358 = vector.shape_cast %357 : vector<256xf32> to vector<1x1x256xf32>
    %359 = vector.broadcast %358 : vector<1x1x256xf32> to vector<8x8x256xf32>
    %360 = arith.mulf %355, %359 : vector<8x8x256xf32>
    %361 = arith.addf %354, %360 : vector<8x8x256xf32>
    %362 = vector.extract_strided_slice %353 {offsets = [0, 1, 0], sizes = [8, 8, 256], strides = [1, 1, 1]} : vector<10x10x256xf32> to vector<8x8x256xf32>
    %363 = vector.extract_strided_slice %349 {offsets = [1, 0], sizes = [1, 256], strides = [1, 1]} : vector<9x256xf32> to vector<1x256xf32>
    %364 = vector.shape_cast %363 : vector<1x256xf32> to vector<256xf32>
    %365 = vector.shape_cast %364 : vector<256xf32> to vector<1x1x256xf32>
    %366 = vector.broadcast %365 : vector<1x1x256xf32> to vector<8x8x256xf32>
    %367 = arith.mulf %362, %366 : vector<8x8x256xf32>
    %368 = arith.addf %361, %367 : vector<8x8x256xf32>
    %369 = vector.extract_strided_slice %353 {offsets = [0, 2, 0], sizes = [8, 8, 256], strides = [1, 1, 1]} : vector<10x10x256xf32> to vector<8x8x256xf32>
    %370 = vector.extract_strided_slice %349 {offsets = [2, 0], sizes = [1, 256], strides = [1, 1]} : vector<9x256xf32> to vector<1x256xf32>
    %371 = vector.shape_cast %370 : vector<1x256xf32> to vector<256xf32>
    %372 = vector.shape_cast %371 : vector<256xf32> to vector<1x1x256xf32>
    %373 = vector.broadcast %372 : vector<1x1x256xf32> to vector<8x8x256xf32>
    %374 = arith.mulf %369, %373 : vector<8x8x256xf32>
    %375 = arith.addf %368, %374 : vector<8x8x256xf32>
    %376 = vector.extract_strided_slice %353 {offsets = [1, 0, 0], sizes = [8, 8, 256], strides = [1, 1, 1]} : vector<10x10x256xf32> to vector<8x8x256xf32>
    %377 = vector.extract_strided_slice %349 {offsets = [3, 0], sizes = [1, 256], strides = [1, 1]} : vector<9x256xf32> to vector<1x256xf32>
    %378 = vector.shape_cast %377 : vector<1x256xf32> to vector<256xf32>
    %379 = vector.shape_cast %378 : vector<256xf32> to vector<1x1x256xf32>
    %380 = vector.broadcast %379 : vector<1x1x256xf32> to vector<8x8x256xf32>
    %381 = arith.mulf %376, %380 : vector<8x8x256xf32>
    %382 = arith.addf %375, %381 : vector<8x8x256xf32>
    %383 = vector.extract_strided_slice %353 {offsets = [1, 1, 0], sizes = [8, 8, 256], strides = [1, 1, 1]} : vector<10x10x256xf32> to vector<8x8x256xf32>
    %384 = vector.extract_strided_slice %349 {offsets = [4, 0], sizes = [1, 256], strides = [1, 1]} : vector<9x256xf32> to vector<1x256xf32>
    %385 = vector.shape_cast %384 : vector<1x256xf32> to vector<256xf32>
    %386 = vector.shape_cast %385 : vector<256xf32> to vector<1x1x256xf32>
    %387 = vector.broadcast %386 : vector<1x1x256xf32> to vector<8x8x256xf32>
    %388 = arith.mulf %383, %387 : vector<8x8x256xf32>
    %389 = arith.addf %382, %388 : vector<8x8x256xf32>
    %390 = vector.extract_strided_slice %353 {offsets = [1, 2, 0], sizes = [8, 8, 256], strides = [1, 1, 1]} : vector<10x10x256xf32> to vector<8x8x256xf32>
    %391 = vector.extract_strided_slice %349 {offsets = [5, 0], sizes = [1, 256], strides = [1, 1]} : vector<9x256xf32> to vector<1x256xf32>
    %392 = vector.shape_cast %391 : vector<1x256xf32> to vector<256xf32>
    %393 = vector.shape_cast %392 : vector<256xf32> to vector<1x1x256xf32>
    %394 = vector.broadcast %393 : vector<1x1x256xf32> to vector<8x8x256xf32>
    %395 = arith.mulf %390, %394 : vector<8x8x256xf32>
    %396 = arith.addf %389, %395 : vector<8x8x256xf32>
    %397 = vector.extract_strided_slice %353 {offsets = [2, 0, 0], sizes = [8, 8, 256], strides = [1, 1, 1]} : vector<10x10x256xf32> to vector<8x8x256xf32>
    %398 = vector.extract_strided_slice %349 {offsets = [6, 0], sizes = [1, 256], strides = [1, 1]} : vector<9x256xf32> to vector<1x256xf32>
    %399 = vector.shape_cast %398 : vector<1x256xf32> to vector<256xf32>
    %400 = vector.shape_cast %399 : vector<256xf32> to vector<1x1x256xf32>
    %401 = vector.broadcast %400 : vector<1x1x256xf32> to vector<8x8x256xf32>
    %402 = arith.mulf %397, %401 : vector<8x8x256xf32>
    %403 = arith.addf %396, %402 : vector<8x8x256xf32>
    %404 = vector.extract_strided_slice %353 {offsets = [2, 1, 0], sizes = [8, 8, 256], strides = [1, 1, 1]} : vector<10x10x256xf32> to vector<8x8x256xf32>
    %405 = vector.extract_strided_slice %349 {offsets = [7, 0], sizes = [1, 256], strides = [1, 1]} : vector<9x256xf32> to vector<1x256xf32>
    %406 = vector.shape_cast %405 : vector<1x256xf32> to vector<256xf32>
    %407 = vector.shape_cast %406 : vector<256xf32> to vector<1x1x256xf32>
    %408 = vector.broadcast %407 : vector<1x1x256xf32> to vector<8x8x256xf32>
    %409 = arith.mulf %404, %408 : vector<8x8x256xf32>
    %410 = arith.addf %403, %409 : vector<8x8x256xf32>
    %411 = vector.extract_strided_slice %353 {offsets = [2, 2, 0], sizes = [8, 8, 256], strides = [1, 1, 1]} : vector<10x10x256xf32> to vector<8x8x256xf32>
    %412 = vector.extract_strided_slice %349 {offsets = [8, 0], sizes = [1, 256], strides = [1, 1]} : vector<9x256xf32> to vector<1x256xf32>
    %413 = vector.shape_cast %412 : vector<1x256xf32> to vector<256xf32>
    %414 = vector.shape_cast %413 : vector<256xf32> to vector<1x1x256xf32>
    %415 = vector.broadcast %414 : vector<1x1x256xf32> to vector<8x8x256xf32>
    %416 = arith.mulf %411, %415 : vector<8x8x256xf32>
    %417 = arith.addf %410, %416 : vector<8x8x256xf32>
    %418 = vector.extract_strided_slice %417 {offsets = [0, 0, 0], sizes = [1, 8, 256], strides = [1, 1, 1]} : vector<8x8x256xf32> to vector<1x8x256xf32>
    %419 = vector.extract_strided_slice %417 {offsets = [2, 0, 0], sizes = [1, 8, 256], strides = [1, 1, 1]} : vector<8x8x256xf32> to vector<1x8x256xf32>
    %420 = vector.extract_strided_slice %417 {offsets = [4, 0, 0], sizes = [1, 8, 256], strides = [1, 1, 1]} : vector<8x8x256xf32> to vector<1x8x256xf32>
    %421 = vector.extract_strided_slice %417 {offsets = [6, 0, 0], sizes = [1, 8, 256], strides = [1, 1, 1]} : vector<8x8x256xf32> to vector<1x8x256xf32>
    %422 = tpu.concatenate %418, %419, %420, %421 in 0 : vector<1x8x256xf32>, vector<1x8x256xf32>, vector<1x8x256xf32>, vector<1x8x256xf32> -> vector<4x8x256xf32>
    %423 = vector.extract_strided_slice %422 {offsets = [0, 0, 0], sizes = [4, 1, 256], strides = [1, 1, 1]} : vector<4x8x256xf32> to vector<4x1x256xf32>
    %424 = vector.extract_strided_slice %422 {offsets = [0, 2, 0], sizes = [4, 1, 256], strides = [1, 1, 1]} : vector<4x8x256xf32> to vector<4x1x256xf32>
    %425 = vector.extract_strided_slice %422 {offsets = [0, 4, 0], sizes = [4, 1, 256], strides = [1, 1, 1]} : vector<4x8x256xf32> to vector<4x1x256xf32>
    %426 = vector.extract_strided_slice %422 {offsets = [0, 6, 0], sizes = [4, 1, 256], strides = [1, 1, 1]} : vector<4x8x256xf32> to vector<4x1x256xf32>
    %427 = tpu.concatenate %423, %424, %425, %426 in 1 : vector<4x1x256xf32>, vector<4x1x256xf32>, vector<4x1x256xf32>, vector<4x1x256xf32> -> vector<4x4x256xf32>
    %428 = vector.extract_strided_slice %427 {offsets = [0, 0, 0], sizes = [1, 4, 256], strides = [1, 1, 1]} : vector<4x4x256xf32> to vector<1x4x256xf32>
    %429 = vector.shape_cast %428 : vector<1x4x256xf32> to vector<4x256xf32>
    %430 = vector.extract_strided_slice %427 {offsets = [1, 0, 0], sizes = [1, 4, 256], strides = [1, 1, 1]} : vector<4x4x256xf32> to vector<1x4x256xf32>
    %431 = vector.shape_cast %430 : vector<1x4x256xf32> to vector<4x256xf32>
    %432 = vector.extract_strided_slice %427 {offsets = [2, 0, 0], sizes = [1, 4, 256], strides = [1, 1, 1]} : vector<4x4x256xf32> to vector<1x4x256xf32>
    %433 = vector.shape_cast %432 : vector<1x4x256xf32> to vector<4x256xf32>
    %434 = vector.extract_strided_slice %427 {offsets = [3, 0, 0], sizes = [1, 4, 256], strides = [1, 1, 1]} : vector<4x4x256xf32> to vector<1x4x256xf32>
    %435 = vector.shape_cast %434 : vector<1x4x256xf32> to vector<4x256xf32>
    %436 = tpu.concatenate %429, %431, %433, %435 in 0 : vector<4x256xf32>, vector<4x256xf32>, vector<4x256xf32>, vector<4x256xf32> -> vector<16x256xf32>
    %437 = arith.truncf %436 : vector<16x256xf32> to vector<16x256xbf16>
    %c0_71 = arith.constant 0 : index
    %c0_72 = arith.constant 0 : index
    %438 = vector.load %arg10[%c0_71, %c0_72] : memref<256x256xbf16, #tpu.memory_space<vmem>>, vector<256x256xbf16>
    %cst_73 = arith.constant dense<0.000000e+00> : vector<16x256xf32>
    %439 = tpu.matmul %437, %438, %cst_73 {dimension_numbers = #tpu.dot_dimension_numbers<[1], [0], [0], [1], [0, 0, 1, 1], [], []>} : vector<16x256xbf16>, vector<256x256xbf16>, vector<16x256xf32> -> vector<16x256xf32>
    %c0_74 = arith.constant 0 : index
    %c0_75 = arith.constant 0 : index
    %440 = vector.load %arg11[%c0_74, %c0_75] : memref<2x256xf32, #tpu.memory_space<vmem>>, vector<1x256xf32>
    %441 = vector.shape_cast %440 : vector<1x256xf32> to vector<256xf32>
    %442 = vector.shape_cast %441 : vector<256xf32> to vector<1x256xf32>
    %443 = vector.broadcast %442 : vector<1x256xf32> to vector<16x256xf32>
    %444 = arith.mulf %439, %443 : vector<16x256xf32>
    %c1_76 = arith.constant 1 : index
    %c0_77 = arith.constant 0 : index
    %445 = vector.load %arg11[%c1_76, %c0_77] : memref<2x256xf32, #tpu.memory_space<vmem>>, vector<1x256xf32>
    %446 = vector.shape_cast %445 : vector<1x256xf32> to vector<256xf32>
    %447 = vector.shape_cast %446 : vector<256xf32> to vector<1x256xf32>
    %448 = vector.broadcast %447 : vector<1x256xf32> to vector<16x256xf32>
    %449 = arith.addf %444, %448 : vector<16x256xf32>
    %cst_78 = arith.constant 0.000000e+00 : f32
    %450 = vector.broadcast %cst_78 : f32 to vector<16x256xf32>
    %451 = arith.maximumf %449, %450 : vector<16x256xf32>
    %452 = vector.extract_strided_slice %451 {offsets = [0, 0], sizes = [4, 256], strides = [1, 1]} : vector<16x256xf32> to vector<4x256xf32>
    %453 = vector.shape_cast %452 : vector<4x256xf32> to vector<1x4x256xf32>
    %454 = vector.extract_strided_slice %451 {offsets = [4, 0], sizes = [4, 256], strides = [1, 1]} : vector<16x256xf32> to vector<4x256xf32>
    %455 = vector.shape_cast %454 : vector<4x256xf32> to vector<1x4x256xf32>
    %456 = vector.extract_strided_slice %451 {offsets = [8, 0], sizes = [4, 256], strides = [1, 1]} : vector<16x256xf32> to vector<4x256xf32>
    %457 = vector.shape_cast %456 : vector<4x256xf32> to vector<1x4x256xf32>
    %458 = vector.extract_strided_slice %451 {offsets = [12, 0], sizes = [4, 256], strides = [1, 1]} : vector<16x256xf32> to vector<4x256xf32>
    %459 = vector.shape_cast %458 : vector<4x256xf32> to vector<1x4x256xf32>
    %460 = tpu.concatenate %453, %455, %457, %459 in 0 : vector<1x4x256xf32>, vector<1x4x256xf32>, vector<1x4x256xf32>, vector<1x4x256xf32> -> vector<4x4x256xf32>
    %c0_79 = arith.constant 0 : index
    %c0_80 = arith.constant 0 : index
    %461 = vector.load %arg12[%c0_79, %c0_80] : memref<9x256xf32, #tpu.memory_space<vmem>>, vector<9x256xf32>
    %cst_81 = arith.constant 0.000000e+00 : f32
    %462 = vector.broadcast %cst_81 : f32 to vector<1x4x256xf32>
    %463 = tpu.concatenate %462, %460, %462 in 0 : vector<1x4x256xf32>, vector<4x4x256xf32>, vector<1x4x256xf32> -> vector<6x4x256xf32>
    %cst_82 = arith.constant 0.000000e+00 : f32
    %464 = vector.broadcast %cst_82 : f32 to vector<6x1x256xf32>
    %465 = tpu.concatenate %464, %463, %464 in 1 : vector<6x1x256xf32>, vector<6x4x256xf32>, vector<6x1x256xf32> -> vector<6x6x256xf32>
    %cst_83 = arith.constant 0.000000e+00 : f32
    %466 = vector.broadcast %cst_83 : f32 to vector<4x4x256xf32>
    %467 = vector.extract_strided_slice %465 {offsets = [0, 0, 0], sizes = [4, 4, 256], strides = [1, 1, 1]} : vector<6x6x256xf32> to vector<4x4x256xf32>
    %468 = vector.extract_strided_slice %461 {offsets = [0, 0], sizes = [1, 256], strides = [1, 1]} : vector<9x256xf32> to vector<1x256xf32>
    %469 = vector.shape_cast %468 : vector<1x256xf32> to vector<256xf32>
    %470 = vector.shape_cast %469 : vector<256xf32> to vector<1x1x256xf32>
    %471 = vector.broadcast %470 : vector<1x1x256xf32> to vector<4x4x256xf32>
    %472 = arith.mulf %467, %471 : vector<4x4x256xf32>
    %473 = arith.addf %466, %472 : vector<4x4x256xf32>
    %474 = vector.extract_strided_slice %465 {offsets = [0, 1, 0], sizes = [4, 4, 256], strides = [1, 1, 1]} : vector<6x6x256xf32> to vector<4x4x256xf32>
    %475 = vector.extract_strided_slice %461 {offsets = [1, 0], sizes = [1, 256], strides = [1, 1]} : vector<9x256xf32> to vector<1x256xf32>
    %476 = vector.shape_cast %475 : vector<1x256xf32> to vector<256xf32>
    %477 = vector.shape_cast %476 : vector<256xf32> to vector<1x1x256xf32>
    %478 = vector.broadcast %477 : vector<1x1x256xf32> to vector<4x4x256xf32>
    %479 = arith.mulf %474, %478 : vector<4x4x256xf32>
    %480 = arith.addf %473, %479 : vector<4x4x256xf32>
    %481 = vector.extract_strided_slice %465 {offsets = [0, 2, 0], sizes = [4, 4, 256], strides = [1, 1, 1]} : vector<6x6x256xf32> to vector<4x4x256xf32>
    %482 = vector.extract_strided_slice %461 {offsets = [2, 0], sizes = [1, 256], strides = [1, 1]} : vector<9x256xf32> to vector<1x256xf32>
    %483 = vector.shape_cast %482 : vector<1x256xf32> to vector<256xf32>
    %484 = vector.shape_cast %483 : vector<256xf32> to vector<1x1x256xf32>
    %485 = vector.broadcast %484 : vector<1x1x256xf32> to vector<4x4x256xf32>
    %486 = arith.mulf %481, %485 : vector<4x4x256xf32>
    %487 = arith.addf %480, %486 : vector<4x4x256xf32>
    %488 = vector.extract_strided_slice %465 {offsets = [1, 0, 0], sizes = [4, 4, 256], strides = [1, 1, 1]} : vector<6x6x256xf32> to vector<4x4x256xf32>
    %489 = vector.extract_strided_slice %461 {offsets = [3, 0], sizes = [1, 256], strides = [1, 1]} : vector<9x256xf32> to vector<1x256xf32>
    %490 = vector.shape_cast %489 : vector<1x256xf32> to vector<256xf32>
    %491 = vector.shape_cast %490 : vector<256xf32> to vector<1x1x256xf32>
    %492 = vector.broadcast %491 : vector<1x1x256xf32> to vector<4x4x256xf32>
    %493 = arith.mulf %488, %492 : vector<4x4x256xf32>
    %494 = arith.addf %487, %493 : vector<4x4x256xf32>
    %495 = vector.extract_strided_slice %465 {offsets = [1, 1, 0], sizes = [4, 4, 256], strides = [1, 1, 1]} : vector<6x6x256xf32> to vector<4x4x256xf32>
    %496 = vector.extract_strided_slice %461 {offsets = [4, 0], sizes = [1, 256], strides = [1, 1]} : vector<9x256xf32> to vector<1x256xf32>
    %497 = vector.shape_cast %496 : vector<1x256xf32> to vector<256xf32>
    %498 = vector.shape_cast %497 : vector<256xf32> to vector<1x1x256xf32>
    %499 = vector.broadcast %498 : vector<1x1x256xf32> to vector<4x4x256xf32>
    %500 = arith.mulf %495, %499 : vector<4x4x256xf32>
    %501 = arith.addf %494, %500 : vector<4x4x256xf32>
    %502 = vector.extract_strided_slice %465 {offsets = [1, 2, 0], sizes = [4, 4, 256], strides = [1, 1, 1]} : vector<6x6x256xf32> to vector<4x4x256xf32>
    %503 = vector.extract_strided_slice %461 {offsets = [5, 0], sizes = [1, 256], strides = [1, 1]} : vector<9x256xf32> to vector<1x256xf32>
    %504 = vector.shape_cast %503 : vector<1x256xf32> to vector<256xf32>
    %505 = vector.shape_cast %504 : vector<256xf32> to vector<1x1x256xf32>
    %506 = vector.broadcast %505 : vector<1x1x256xf32> to vector<4x4x256xf32>
    %507 = arith.mulf %502, %506 : vector<4x4x256xf32>
    %508 = arith.addf %501, %507 : vector<4x4x256xf32>
    %509 = vector.extract_strided_slice %465 {offsets = [2, 0, 0], sizes = [4, 4, 256], strides = [1, 1, 1]} : vector<6x6x256xf32> to vector<4x4x256xf32>
    %510 = vector.extract_strided_slice %461 {offsets = [6, 0], sizes = [1, 256], strides = [1, 1]} : vector<9x256xf32> to vector<1x256xf32>
    %511 = vector.shape_cast %510 : vector<1x256xf32> to vector<256xf32>
    %512 = vector.shape_cast %511 : vector<256xf32> to vector<1x1x256xf32>
    %513 = vector.broadcast %512 : vector<1x1x256xf32> to vector<4x4x256xf32>
    %514 = arith.mulf %509, %513 : vector<4x4x256xf32>
    %515 = arith.addf %508, %514 : vector<4x4x256xf32>
    %516 = vector.extract_strided_slice %465 {offsets = [2, 1, 0], sizes = [4, 4, 256], strides = [1, 1, 1]} : vector<6x6x256xf32> to vector<4x4x256xf32>
    %517 = vector.extract_strided_slice %461 {offsets = [7, 0], sizes = [1, 256], strides = [1, 1]} : vector<9x256xf32> to vector<1x256xf32>
    %518 = vector.shape_cast %517 : vector<1x256xf32> to vector<256xf32>
    %519 = vector.shape_cast %518 : vector<256xf32> to vector<1x1x256xf32>
    %520 = vector.broadcast %519 : vector<1x1x256xf32> to vector<4x4x256xf32>
    %521 = arith.mulf %516, %520 : vector<4x4x256xf32>
    %522 = arith.addf %515, %521 : vector<4x4x256xf32>
    %523 = vector.extract_strided_slice %465 {offsets = [2, 2, 0], sizes = [4, 4, 256], strides = [1, 1, 1]} : vector<6x6x256xf32> to vector<4x4x256xf32>
    %524 = vector.extract_strided_slice %461 {offsets = [8, 0], sizes = [1, 256], strides = [1, 1]} : vector<9x256xf32> to vector<1x256xf32>
    %525 = vector.shape_cast %524 : vector<1x256xf32> to vector<256xf32>
    %526 = vector.shape_cast %525 : vector<256xf32> to vector<1x1x256xf32>
    %527 = vector.broadcast %526 : vector<1x1x256xf32> to vector<4x4x256xf32>
    %528 = arith.mulf %523, %527 : vector<4x4x256xf32>
    %529 = arith.addf %522, %528 : vector<4x4x256xf32>
    %530 = vector.extract_strided_slice %529 {offsets = [0, 0, 0], sizes = [1, 4, 256], strides = [1, 1, 1]} : vector<4x4x256xf32> to vector<1x4x256xf32>
    %531 = vector.shape_cast %530 : vector<1x4x256xf32> to vector<4x256xf32>
    %532 = vector.extract_strided_slice %529 {offsets = [1, 0, 0], sizes = [1, 4, 256], strides = [1, 1, 1]} : vector<4x4x256xf32> to vector<1x4x256xf32>
    %533 = vector.shape_cast %532 : vector<1x4x256xf32> to vector<4x256xf32>
    %534 = vector.extract_strided_slice %529 {offsets = [2, 0, 0], sizes = [1, 4, 256], strides = [1, 1, 1]} : vector<4x4x256xf32> to vector<1x4x256xf32>
    %535 = vector.shape_cast %534 : vector<1x4x256xf32> to vector<4x256xf32>
    %536 = vector.extract_strided_slice %529 {offsets = [3, 0, 0], sizes = [1, 4, 256], strides = [1, 1, 1]} : vector<4x4x256xf32> to vector<1x4x256xf32>
    %537 = vector.shape_cast %536 : vector<1x4x256xf32> to vector<4x256xf32>
    %538 = tpu.concatenate %531, %533, %535, %537 in 0 : vector<4x256xf32>, vector<4x256xf32>, vector<4x256xf32>, vector<4x256xf32> -> vector<16x256xf32>
    %539 = arith.truncf %538 : vector<16x256xf32> to vector<16x256xbf16>
    %c0_84 = arith.constant 0 : index
    %c0_85 = arith.constant 0 : index
    %540 = vector.load %arg13[%c0_84, %c0_85] : memref<256x512xbf16, #tpu.memory_space<vmem>>, vector<256x512xbf16>
    %cst_86 = arith.constant dense<0.000000e+00> : vector<16x512xf32>
    %541 = tpu.matmul %539, %540, %cst_86 {dimension_numbers = #tpu.dot_dimension_numbers<[1], [0], [0], [1], [0, 0, 1, 1], [], []>} : vector<16x256xbf16>, vector<256x512xbf16>, vector<16x512xf32> -> vector<16x512xf32>
    %c0_87 = arith.constant 0 : index
    %c0_88 = arith.constant 0 : index
    %542 = vector.load %arg14[%c0_87, %c0_88] : memref<2x512xf32, #tpu.memory_space<vmem>>, vector<1x512xf32>
    %543 = vector.shape_cast %542 : vector<1x512xf32> to vector<512xf32>
    %544 = vector.shape_cast %543 : vector<512xf32> to vector<1x512xf32>
    %545 = vector.broadcast %544 : vector<1x512xf32> to vector<16x512xf32>
    %546 = arith.mulf %541, %545 : vector<16x512xf32>
    %c1_89 = arith.constant 1 : index
    %c0_90 = arith.constant 0 : index
    %547 = vector.load %arg14[%c1_89, %c0_90] : memref<2x512xf32, #tpu.memory_space<vmem>>, vector<1x512xf32>
    %548 = vector.shape_cast %547 : vector<1x512xf32> to vector<512xf32>
    %549 = vector.shape_cast %548 : vector<512xf32> to vector<1x512xf32>
    %550 = vector.broadcast %549 : vector<1x512xf32> to vector<16x512xf32>
    %551 = arith.addf %546, %550 : vector<16x512xf32>
    %cst_91 = arith.constant 0.000000e+00 : f32
    %552 = vector.broadcast %cst_91 : f32 to vector<16x512xf32>
    %553 = arith.maximumf %551, %552 : vector<16x512xf32>
    %cst_92 = arith.constant dense<0.000000e+00> : vector<512xf32>
    %554 = vector.multi_reduction <add>, %553, %cst_92 [0] : vector<16x512xf32> to vector<512xf32>
    %555 = vector.shape_cast %554 : vector<512xf32> to vector<1x512xf32>
    %cst_93 = arith.constant 6.250000e-02 : f32
    %556 = vector.broadcast %cst_93 : f32 to vector<1x512xf32>
    %557 = arith.mulf %555, %556 : vector<1x512xf32>
    %558 = vector.shape_cast %557 : vector<1x512xf32> to vector<1x1x512xf32>
    %c0_94 = arith.constant 0 : index
    %c0_95 = arith.constant 0 : index
    %c0_96 = arith.constant 0 : index
    %559 = vector.load %arg18[%c0_94, %c0_95, %c0_96] : memref<1x1x512xf32, #tpu.memory_space<vmem>>, vector<1x1x512xf32>
    tpu.vector_store %arg18[%c0_94, %c0_95, %c0_96], %558 {strides = array<i32>} : memref<1x1x512xf32, #tpu.memory_space<vmem>>, vector<1x1x512xf32>,
    %c0_97 = arith.constant 0 : index
    %c0_98 = arith.constant 0 : index
    %560 = vector.load %arg15[%c0_97, %c0_98] : memref<512x100xf32, #tpu.memory_space<vmem>>, vector<512x100xf32>
    %cst_99 = arith.constant dense<0.000000e+00> : vector<1x100xf32>
    %561 = tpu.matmul %557, %560, %cst_99 {dimension_numbers = #tpu.dot_dimension_numbers<[1], [0], [0], [1], [0, 0, 1, 1], [], []>} : vector<1x512xf32>, vector<512x100xf32>, vector<1x100xf32> -> vector<1x100xf32>
    %c0_100 = arith.constant 0 : index
    %c0_101 = arith.constant 0 : index
    %562 = vector.load %arg16[%c0_100, %c0_101] : memref<1x100xf32, #tpu.memory_space<vmem>>, vector<1x100xf32>
    %563 = arith.addf %561, %562 : vector<1x100xf32>
    %564 = vector.shape_cast %563 : vector<1x100xf32> to vector<1x1x100xf32>
    %c0_102 = arith.constant 0 : index
    %c0_103 = arith.constant 0 : index
    %c0_104 = arith.constant 0 : index
    %565 = vector.load %arg17[%c0_102, %c0_103, %c0_104] : memref<1x1x100xf32, #tpu.memory_space<vmem>>, vector<1x1x100xf32>
    tpu.vector_store %arg17[%c0_102, %c0_103, %c0_104], %564 {strides = array<i32>} : memref<1x1x100xf32, #tpu.memory_space<vmem>>, vector<1x1x100xf32>,
    return
  }
  func.func @transform_0(%arg0: i32) -> (i32, i32, i32, i32) {
    %c0_i32 = arith.constant 0 : i32
    %c0_i32_0 = arith.constant 0 : i32
    %c0_i32_1 = arith.constant 0 : i32
    %c0_i32_2 = arith.constant 0 : i32
    return %arg0, %c0_i32, %c0_i32_0, %c0_i32_1 : i32, i32, i32, i32
  }
  func.func @transform_1(%arg0: i32) -> (i32, i32) {
    %c0_i32 = arith.constant 0 : i32
    %c0_i32_0 = arith.constant 0 : i32
    %c0_i32_1 = arith.constant 0 : i32
    return %c0_i32, %c0_i32_0 : i32, i32
  }
  func.func @transform_2(%arg0: i32) -> (i32, i32) {
    %c0_i32 = arith.constant 0 : i32
    %c0_i32_0 = arith.constant 0 : i32
    %c0_i32_1 = arith.constant 0 : i32
    return %c0_i32, %c0_i32_0 : i32, i32
  }
  func.func @transform_3(%arg0: i32) -> (i32, i32) {
    %c0_i32 = arith.constant 0 : i32
    %c0_i32_0 = arith.constant 0 : i32
    %c0_i32_1 = arith.constant 0 : i32
    return %c0_i32, %c0_i32_0 : i32, i32
  }
  func.func @transform_4(%arg0: i32) -> (i32, i32) {
    %c0_i32 = arith.constant 0 : i32
    %c0_i32_0 = arith.constant 0 : i32
    %c0_i32_1 = arith.constant 0 : i32
    return %c0_i32, %c0_i32_0 : i32, i32
  }
  func.func @transform_5(%arg0: i32) -> (i32, i32) {
    %c0_i32 = arith.constant 0 : i32
    %c0_i32_0 = arith.constant 0 : i32
    %c0_i32_1 = arith.constant 0 : i32
    return %c0_i32, %c0_i32_0 : i32, i32
  }
  func.func @transform_6(%arg0: i32) -> (i32, i32) {
    %c0_i32 = arith.constant 0 : i32
    %c0_i32_0 = arith.constant 0 : i32
    %c0_i32_1 = arith.constant 0 : i32
    return %c0_i32, %c0_i32_0 : i32, i32
  }
  func.func @transform_7(%arg0: i32) -> (i32, i32) {
    %c0_i32 = arith.constant 0 : i32
    %c0_i32_0 = arith.constant 0 : i32
    %c0_i32_1 = arith.constant 0 : i32
    return %c0_i32, %c0_i32_0 : i32, i32
  }
  func.func @transform_8(%arg0: i32) -> (i32, i32) {
    %c0_i32 = arith.constant 0 : i32
    %c0_i32_0 = arith.constant 0 : i32
    %c0_i32_1 = arith.constant 0 : i32
    return %c0_i32, %c0_i32_0 : i32, i32
  }
  func.func @transform_9(%arg0: i32) -> (i32, i32) {
    %c0_i32 = arith.constant 0 : i32
    %c0_i32_0 = arith.constant 0 : i32
    %c0_i32_1 = arith.constant 0 : i32
    return %c0_i32, %c0_i32_0 : i32, i32
  }
  func.func @transform_10(%arg0: i32) -> (i32, i32) {
    %c0_i32 = arith.constant 0 : i32
    %c0_i32_0 = arith.constant 0 : i32
    %c0_i32_1 = arith.constant 0 : i32
    return %c0_i32, %c0_i32_0 : i32, i32
  }
  func.func @transform_11(%arg0: i32) -> (i32, i32) {
    %c0_i32 = arith.constant 0 : i32
    %c0_i32_0 = arith.constant 0 : i32
    %c0_i32_1 = arith.constant 0 : i32
    return %c0_i32, %c0_i32_0 : i32, i32
  }
  func.func @transform_12(%arg0: i32) -> (i32, i32) {
    %c0_i32 = arith.constant 0 : i32
    %c0_i32_0 = arith.constant 0 : i32
    %c0_i32_1 = arith.constant 0 : i32
    return %c0_i32, %c0_i32_0 : i32, i32
  }
  func.func @transform_13(%arg0: i32) -> (i32, i32) {
    %c0_i32 = arith.constant 0 : i32
    %c0_i32_0 = arith.constant 0 : i32
    %c0_i32_1 = arith.constant 0 : i32
    return %c0_i32, %c0_i32_0 : i32, i32
  }
  func.func @transform_14(%arg0: i32) -> (i32, i32) {
    %c0_i32 = arith.constant 0 : i32
    %c0_i32_0 = arith.constant 0 : i32
    %c0_i32_1 = arith.constant 0 : i32
    return %c0_i32, %c0_i32_0 : i32, i32
  }
  func.func @transform_15(%arg0: i32) -> (i32, i32) {
    %c0_i32 = arith.constant 0 : i32
    %c0_i32_0 = arith.constant 0 : i32
    %c0_i32_1 = arith.constant 0 : i32
    return %c0_i32, %c0_i32_0 : i32, i32
  }
  func.func @transform_16(%arg0: i32) -> (i32, i32, i32) {
    %c0_i32 = arith.constant 0 : i32
    %c0_i32_0 = arith.constant 0 : i32
    %c0_i32_1 = arith.constant 0 : i32
    return %arg0, %c0_i32, %c0_i32_0 : i32, i32, i32
  }
  func.func @transform_17(%arg0: i32) -> (i32, i32, i32) {
    %c0_i32 = arith.constant 0 : i32
    %c0_i32_0 = arith.constant 0 : i32
    %c0_i32_1 = arith.constant 0 : i32
    return %arg0, %c0_i32, %c0_i32_0 : i32, i32, i32
  }
}

</mosaic_0001>

<bundles_post_ra>
// kernel: resnet_attention3_forward.1
= control target key start
LH: loop header
LB: loop body
LE: loop exit
PB: predicated region body
PF: predicated region fallthrough
CT: control target
= control target key end

     0   :  { %s9731_s0 = inlined_call_operand.vmem [shape: f32[2,8,8,256], index: 0, kind: input, shape index: {}]   ;;  %s9732_s1 = inlined_call_operand.vmem [shape: f32[9,256], index: 1, kind: input, shape index: {}]   ;;  %s9733_s2 = inlined_call_operand.vmem [shape: bf16[256,256], index: 2, kind: input, shape index: {}]   ;;  %s9734_s3 = inlined_call_operand.vmem [shape: f32[2,256], index: 3, kind: input, shape index: {}]   ;;  %s9735_s4 = inlined_call_operand.vmem [shape: f32[9,256], index: 4, kind: input, shape index: {}]   ;;  %s9736_s5 = inlined_call_operand.vmem [shape: bf16[256,256], index: 5, kind: input, shape index: {}]   ;;  %s9737_s6 = inlined_call_operand.vmem [shape: f32[2,256], index: 6, kind: input, shape index: {}]   ;;  %s9738_s7 = inlined_call_operand.vmem [shape: f32[2,256], index: 7, kind: input, shape index: {}]   ;;  %s9739_s8 = inlined_call_operand.vmem [shape: f32[9,256], index: 8, kind: input, shape index: {}]   ;;  %s9740_s9 = inlined_call_operand.vmem [shape: bf16[256,256], index: 9, kind: input, shape index: {}]   ;;  %s9741_s10 = inlined_call_operand.vmem [shape: f32[2,256], index: 10, kind: input, shape index: {}]   ;;  %s9742_s11 = inlined_call_operand.vmem [shape: f32[9,256], index: 11, kind: input, shape index: {}]   ;;  %s9743_s12 = inlined_call_operand.vmem [shape: bf16[256,512], index: 12, kind: input, shape index: {}]   ;;  %s9744_s13 = inlined_call_operand.vmem [shape: f32[2,512], index: 13, kind: input, shape index: {}]   ;;  %s9745_s14 = inlined_call_operand.vmem [shape: f32[512,100], index: 14, kind: input, shape index: {}]   ;;  %s9746_s15 = inlined_call_operand.vmem [shape: f32[1,100], index: 15, kind: input, shape index: {}]   ;;  %s9747_s16 = inlined_call_operand.hbm [shape: f32[2,1,100], index: 16, kind: output, shape index: {0}]   ;;  %s9748_s17 = inlined_call_operand.vmem [shape: f32[2,1,512], index: 17, kind: output, shape index: {1}]  }
   0x1   :  { %9777 = sst [smem:[#allocation25_spill]] %s9731_s0 }
   0x2   :  { %9778 = sst [smem:[#allocation26_spill]] %s9732_s1 }
   0x3   :  { %9779 = sst [smem:[#allocation27_spill]] %s9733_s2 }
   0x4   :  { %9780 = sst [smem:[#allocation28_spill]] %s9734_s3 }
   0x5   :  { %23 = vsyncpa [#allocation3], 0 }
   0x6   :  { %25 = vsyncpa [#allocation3 + $0x1], 0  ;;  %s6262_s24 = smov 0   ;;  %s6264_s25 = smov 0  }
   0x7   :  { %s6266_s26 = smov 0   ;;  %s6268_s27 = smov 0  }
   0x8 LB: > { %9781 = sst [smem:[#allocation5_spill]] %s6157_s24  ;;  %s6283_s28 = sadd.s32 4294967295, %s6169_s27   ;;  %s6169_s27 = sphi %s6268_s27, %s9872_s27   ;;  %s6165_s26 = sphi %s6266_s26, %s9874_s26   ;;  %s6161_s25 = sphi %s6264_s25, %s9876_s25   ;;  %s6157_s24 = sphi %s6262_s24, %s9875_s24  }
   0x9   : > { %9782 = sst [smem:[#allocation6_spill]] %s6165_s26  ;;  %s5156_s29 = sadd.s32 4294967294, %s6169_s27  }
   0xa   : > { %9783 = sst [smem:[#allocation7_spill]] %s6169_s27  ;;  %s6287_s0 = sadd.s32 1, %s6169_s27  }
   0xb   : > { %9784 = sst [smem:[#allocation8_spill]] %s6287_s0  ;;  %s379_s30 = sadd.s32 1, %s6165_s26 }
   0xc   : > { %s376_s18 = ssub.s32 %s6169_s27, %s6287_s0  ;;  %p389_p0 = scmp.ne.s32.totalorder %s6165_s26, %s6161_s25 }
   0xd   : > { %p377_p1 = scmp.eq.s32.totalorder %s376_s18, 0  ;;  %p390_p2 = scmp.eq.s32.totalorder %s6283_s28, 1 }
   0xe   : > { %p395_p3 = scmp.ne.s32.totalorder %s6161_s25, %s6157_s24  ;;  %p396_p4 = scmp.eq.s32.totalorder %s5156_s29, 1 }
   0xf   : > { %s6298_s19 = scalar_select %p377_p1, %s6165_s26, %s379_s30  }
  0x10   : > { %p6300_p5 = por %p390_p2, %p389_p0  ;;  %p6304_p6 = por %p396_p4, %p395_p3 }
  0x11   : > { %9785 = sst [smem:[#allocation9_spill]] %s6298_s19  ;;  %p5159_p7 = scmp.ge.s32.totalorder %s6169_s27, 1 }
  0x12   : > { %s9787_s20 = scalar_select %p6304_p6, 1, 0 }
  0x13   : > { %p493_p8 = scmp.lt.s32.totalorder %s6169_s27, 3 }
  0x14   : > { %9788 = sst [smem:[#allocation10_spill]] %s9787_s20 }
  0x15   : > { %p494_p9 = pnand %p5159_p7, %p493_p8 }
  0x17   : > { %497 = sbr.rel (%p494_p9) target bundleno = 1302 (0x516), region = 84 }
  0x1c   : > { %s9789_s2 = sld [smem:[#allocation27_spill]]  ;;  %p548_p10 = scmp.lt.s32.totalorder %s6283_s28, 1  ;;  %vm628_vm0 = vcmask 1040384   ;;  %vm715_vm1 = vcmask 1046528   ;;  %vm790_vm2 = vcmask 1045504   ;;  %vm1227_vm3 = vcmask 1041408  }
  0x1d   : > { %s9790_s23 = sld [smem:[#allocation26_spill]]  ;;  %vm1236_vm4 = vcmask 1042432   ;;  %vm1257_vm5 = vcmask 1043456   ;;  %vm1573_vm6 = vcmask 1044480   ;;  %vm4901_vm7 = vcmask 1042434  }
  0x1e   : > { %s6529_s26 = scalar_select %p548_p10, %s6283_s28, 1  ;;  %vm5055_vm9 = vcmask 811008  }
  0x1f   : > { %s9793_s24 = sld [smem:[#allocation25_spill]] }
  0x20   : > { %s5818_s19 = sshll.u32 %s6529_s26, 7  ;;  %s9794_s3 = sld [smem:[#allocation28_spill]] }
  0x22   : > { %v5221_v0 = vld [vmem:[%s9789_s2 + $0x70] sm:$0xf]  ;;  %v5834_v1 = vld [vmem:[%s9789_s2 + $0x74] sm:$0xf0]  ;;  %v5833_v5 = vld [vmem:[%s9789_s2 + $0x74] sm:$0xf] }
  0x23   : > { %v5285_v2 = vld [vmem:[%s9789_s2 + $0xf0] sm:$0xf]  ;;  %v5222_v3 = vor.u32 %v5834_v1, %v5221_v0  ;;  %v5850_v4 = vld [vmem:[%s9789_s2 + $0xf4] sm:$0xf0]  ;;  %v5223_v6 = vld [vmem:[%s9789_s2 + $0x78] sm:$0xf0] }
  0x24   : > { %v5286_v7 = vor.u32 %v5850_v4, %v5285_v2  ;;  %v5226_v8 = vor.u32 %v5833_v5, %v5223_v6  ;;  %v5849_v9 = vld [vmem:[%s9789_s2 + $0xf4] sm:$0xf]  ;;  %v5287_v10 = vld [vmem:[%s9789_s2 + $0xf8] sm:$0xf0]  ;;  %v5213_v11 = vld [vmem:[%s9789_s2 + $0x60] sm:$0xf] }
  0x25   : > { %1456 = vmatpush.bf16.msra.mxu0 %v5222_v3  ;;  %v5290_v12 = vor.u32 %v5849_v9, %v5287_v10  ;;  %v5832_v13 = vld [vmem:[%s9789_s2 + $0x64] sm:$0xf0]  ;;  %v5277_v14 = vld [vmem:[%s9789_s2 + $0xe0] sm:$0xf]  ;;  %v5831_v18 = vld [vmem:[%s9789_s2 + $0x64] sm:$0xf]  ;;  %s6563_s27 = scalar_lea.vmem %s9793_s24, %s5818_s19  ;;  %s5070_s24 = scalar_lea.hbm %s9747_s16, %s6283_s28 }
  0x26   : > { %v5848_v15 = vld [vmem:[%s9789_s2 + $0xe4] sm:$0xf0]  ;;  %1470 = vmatpush.bf16.msra.mxu1 %v5286_v7  ;;  %1484 = vmatpush.bf16.msra.mxu2 %v5226_v8  ;;  %v5214_v16 = vor.u32 %v5832_v13, %v5213_v11  ;;  %v5215_v19 = vld [vmem:[%s9789_s2 + $0x68] sm:$0xf0]  ;;  %v5847_v20 = vld [vmem:[%s9789_s2 + $0xe4] sm:$0xf] }
  0x27   : > { %v5278_v17 = vor.u32 %v5848_v15, %v5277_v14  ;;  %1498 = vmatpush.bf16.msra.mxu3 %v5290_v12  ;;  %v5218_v21 = vor.u32 %v5831_v18, %v5215_v19  ;;  %v5279_v22 = vld [vmem:[%s9789_s2 + $0xe8] sm:$0xf0]  ;;  %v5205_v23 = vld [vmem:[%s9789_s2 + $0x50] sm:$0xf]  ;;  %v5830_v24 = vld [vmem:[%s9789_s2 + $0x54] sm:$0xf0] }
  0x28   : > { %v5282_v25 = vor.u32 %v5847_v20, %v5279_v22  ;;  %v5269_v26 = vld [vmem:[%s9789_s2 + $0xd0] sm:$0xf]  ;;  %v5846_v27 = vld [vmem:[%s9789_s2 + $0xd4] sm:$0xf0]  ;;  %v5829_v28 = vld [vmem:[%s9789_s2 + $0x54] sm:$0xf]  ;;  %v5206_v29 = vor.u32 %v5830_v24, %v5205_v23 }
  0x29   : > { %1457 = vmatpush.bf16.msra.mxu0 %v5214_v16  ;;  %v5207_v30 = vld [vmem:[%s9789_s2 + $0x58] sm:$0xf0]  ;;  %v5845_v31 = vld [vmem:[%s9789_s2 + $0xd4] sm:$0xf]  ;;  %v5270_v33 = vor.u32 %v5846_v27, %v5269_v26  ;;  %v5197_v35 = vld [vmem:[%s9789_s2 + $0x40] sm:$0xf] }
  0x2a   : > { %v5271_v32 = vld [vmem:[%s9789_s2 + $0xd8] sm:$0xf0]  ;;  %1471 = vmatpush.bf16.msra.mxu1 %v5278_v17  ;;  %1485 = vmatpush.bf16.msra.mxu2 %v5218_v21  ;;  %v5210_v34 = vor.u32 %v5829_v28, %v5207_v30  ;;  %v5828_v36 = vld [vmem:[%s9789_s2 + $0x44] sm:$0xf0]  ;;  %v5261_v37 = vld [vmem:[%s9789_s2 + $0xc0] sm:$0xf] }
  0x2b   : > { %1499 = vmatpush.bf16.msra.mxu3 %v5282_v25  ;;  %v5274_v38 = vor.u32 %v5845_v31, %v5271_v32  ;;  %v5844_v39 = vld [vmem:[%s9789_s2 + $0xc4] sm:$0xf0]  ;;  %v5827_v40 = vld [vmem:[%s9789_s2 + $0x44] sm:$0xf]  ;;  %v5199_v41 = vld [vmem:[%s9789_s2 + $0x48] sm:$0xf0]  ;;  %v5198_v44 = vor.u32 %v5828_v36, %v5197_v35 }
  0x2c   : > { %v5843_v42 = vld [vmem:[%s9789_s2 + $0xc4] sm:$0xf]  ;;  %v5263_v43 = vld [vmem:[%s9789_s2 + $0xc8] sm:$0xf0]  ;;  %v5262_v45 = vor.u32 %v5844_v39, %v5261_v37  ;;  %v5202_v46 = vor.u32 %v5827_v40, %v5199_v41  ;;  %v5189_v47 = vld [vmem:[%s9789_s2 + $0x30] sm:$0xf] }
  0x2d   : > { %1458 = vmatpush.bf16.msra.mxu0 %v5206_v29  ;;  %v5826_v48 = vld [vmem:[%s9789_s2 + $0x34] sm:$0xf0]  ;;  %v5253_v49 = vld [vmem:[%s9789_s2 + $0xb0] sm:$0xf]  ;;  %v5266_v50 = vor.u32 %v5843_v42, %v5263_v43  ;;  %v5825_v52 = vld [vmem:[%s9789_s2 + $0x34] sm:$0xf] }
  0x2e   : > { %1472 = vmatpush.bf16.msra.mxu1 %v5270_v33  ;;  %1486 = vmatpush.bf16.msra.mxu2 %v5210_v34  ;;  %v5842_v51 = vld [vmem:[%s9789_s2 + $0xb4] sm:$0xf0]  ;;  %v5191_v53 = vld [vmem:[%s9789_s2 + $0x38] sm:$0xf0]  ;;  %v5841_v54 = vld [vmem:[%s9789_s2 + $0xb4] sm:$0xf]  ;;  %v5190_v57 = vor.u32 %v5826_v48, %v5189_v47 }
  0x2f   : > { %1500 = vmatpush.bf16.msra.mxu3 %v5274_v38  ;;  %v5255_v55 = vld [vmem:[%s9789_s2 + $0xb8] sm:$0xf0]  ;;  %v5181_v56 = vld [vmem:[%s9789_s2 + $0x20] sm:$0xf]  ;;  %v5824_v58 = vld [vmem:[%s9789_s2 + $0x24] sm:$0xf0]  ;;  %v5254_v61 = vor.u32 %v5842_v51, %v5253_v49  ;;  %v5194_v62 = vor.u32 %v5825_v52, %v5191_v53 }
  0x30   : > { %v5245_v59 = vld [vmem:[%s9789_s2 + $0xa0] sm:$0xf]  ;;  %v5840_v60 = vld [vmem:[%s9789_s2 + $0xa4] sm:$0xf0]  ;;  %v5823_v63 = vld [vmem:[%s9789_s2 + $0x24] sm:$0xf]  ;;  %v5258_v2 = vor.u32 %v5841_v54, %v5255_v55  ;;  %v5182_v9 = vor.u32 %v5824_v58, %v5181_v56 }
  0x31   : > { %1459 = vmatpush.bf16.msra.mxu0 %v5198_v44  ;;  %v5183_v0 = vld [vmem:[%s9789_s2 + $0x28] sm:$0xf0]  ;;  %v5839_v1 = vld [vmem:[%s9789_s2 + $0xa4] sm:$0xf]  ;;  %v5173_v4 = vld [vmem:[%s9789_s2 + $0x10] sm:$0xf]  ;;  %v5246_v13 = vor.u32 %v5840_v60, %v5245_v59 }
  0x32   : > { %1473 = vmatpush.bf16.msra.mxu1 %v5262_v45  ;;  %1487 = vmatpush.bf16.msra.mxu2 %v5202_v46  ;;  %v5247_v3 = vld [vmem:[%s9789_s2 + $0xa8] sm:$0xf0]  ;;  %v5822_v5 = vld [vmem:[%s9789_s2 + $0x14] sm:$0xf0]  ;;  %v5237_v6 = vld [vmem:[%s9789_s2 + $0x90] sm:$0xf]  ;;  %v5186_v14 = vor.u32 %v5823_v63, %v5183_v0 }
  0x33   : > { %1501 = vmatpush.bf16.msra.mxu3 %v5266_v50  ;;  %v5838_v7 = vld [vmem:[%s9789_s2 + $0x94] sm:$0xf0]  ;;  %v5821_v8 = vld [vmem:[%s9789_s2 + $0x14] sm:$0xf]  ;;  %v5175_v10 = vld [vmem:[%s9789_s2 + $0x18] sm:$0xf0]  ;;  %v5250_v17 = vor.u32 %v5839_v1, %v5247_v3  ;;  %v5174_v18 = vor.u32 %v5822_v5, %v5173_v4 }
  0x34   : > { %v6475_v11 = vld [vmem:[%s9789_s2 + $0x94] sm:$0xf]  ;;  %v6480_v12 = vld [vmem:[%s9789_s2 + $0x98] sm:$0xf0]  ;;  %v6485_v15 = vld [vmem:[%s9789_s2] sm:$0xf]  ;;  %v5238_v25 = vor.u32 %v5838_v7, %v5237_v6  ;;  %v5178_v26 = vor.u32 %v5821_v8, %v5175_v10 }
  0x35   : > { %1460 = vmatpush.bf16.msra.mxu0 %v5190_v57  ;;  %v6490_v16 = vld [vmem:[%s9789_s2 + $0x4] sm:$0xf0]  ;;  %v6495_v19 = vld [vmem:[%s9789_s2 + $0x80] sm:$0xf]  ;;  %v6505_v21 = vld [vmem:[%s9789_s2 + $0x4] sm:$0xf]  ;;  %v5242_v27 = vor.u32 %v6475_v11, %v6480_v12 }
  0x36   : > { %1474 = vmatpush.bf16.msra.mxu1 %v5254_v61  ;;  %1488 = vmatpush.bf16.msra.mxu2 %v5194_v62  ;;  %v6500_v20 = vld [vmem:[%s9789_s2 + $0x84] sm:$0xf0]  ;;  %v6510_v22 = vld [vmem:[%s9789_s2 + $0x8] sm:$0xf0]  ;;  %v6515_v23 = vld [vmem:[%s9789_s2 + $0x84] sm:$0xf]  ;;  %v5166_v37 = vor.u32 %v6490_v16, %v6485_v15 }
  0x37   : > { %1502 = vmatpush.bf16.msra.mxu3 %v5258_v2  ;;  %v573_v24 = vld [vmem:[%s9790_s23] sm:$0xff]  ;;  %v6526_v28 = vld [vmem:[%s9789_s2 + $0x88] sm:$0xf0]  ;;  %v6171_v29 = vmov 0.0   ;;  %v5230_v41 = vor.u32 %v6500_v20, %v6495_v19  ;;  %v5170_v42 = vor.u32 %v6505_v21, %v6510_v22  ;;  %v559_v46 = vld [vmem:[%s6563_s27 + $0x10] sm:$0xff]  ;;  %s5074_s21 = sshll.u32 %s5070_s24, 4  ;;  %s5075_s21 = int_to_ptr.hbm [resolvable:$true] %s5074_s21 }
  0x38   : > { %v594_v30 = vrot.slane %v6171_v29, 7  ;;  %v6531_v31 = vperm.slane %v573_v24, 0  ;;  %v6533_v32 = vperm.slane %v573_v24, 1  ;;  %v6535_v33 = vperm.slane %v573_v24, 2  ;;  %v557_v45 = vld [vmem:[%s6563_s27] sm:$0xff]  ;;  %v563_v52 = vld [vmem:[%s6563_s27 + $0x30] sm:$0xff] }
  0x39   : > { %1461 = vmatpush.bf16.msra.mxu0 %v5182_v9  ;;  %v6537_v34 = vperm.slane %v573_v24, 3  ;;  %v6539_v35 = vperm.slane %v573_v24, 4  ;;  %v6541_v36 = vperm.slane %v573_v24, 5  ;;  %v6552_v40 = vperm.slane %v573_v24, 7  ;;  %v561_v47 = vld [vmem:[%s6563_s27 + $0x20] sm:$0xff]  ;;  %v567_v54 = vld [vmem:[%s6563_s27 + $0x50] sm:$0xff] }
  0x3a   : > { %1475 = vmatpush.bf16.msra.mxu1 %v5246_v13  ;;  %1489 = vmatpush.bf16.msra.mxu2 %v5186_v14  ;;  %v6547_v38 = vsel %vm628_vm0, 0.0, %v594_v30  ;;  %v6550_v39 = vsel %vm628_vm0, %v594_v30, 0.0  ;;  %v5234_v43 = vor.u32 %v6515_v23, %v6526_v28  ;;  %v6582_v51 = vperm.slane %v573_v24, 6  ;;  %v565_v53 = vld [vmem:[%s6563_s27 + $0x40] sm:$0xff]  ;;  %v571_v60 = vld [vmem:[%s6563_s27 + $0x70] sm:$0xff]  ;;  %s6121_s22 = sshra.s32 %s5075_s21, 4  ;;  %s6122_s22 = int_to_ptr.hbm [resolvable:$true] %s6121_s22 }
  0x3b   : > { %1503 = vmatpush.bf16.msra.mxu3 %v5250_v17  ;;  %9791 = vst [vmem:[#allocation11_spill] sm:$0xff] %v6547_v38  ;;  %v6567_v44 = vmul.f32 %v6533_v32, %v6547_v38  ;;  %v6574_v48 = vmul.f32 %v6531_v31, %v6547_v38  ;;  %v685_v49 = vmul.f32 %v6533_v32, %v6550_v39  ;;  %v595_v55 = vrot.slane %v557_v45, 7  ;;  %v569_v59 = vld [vmem:[%s6563_s27 + $0x60] sm:$0xff]  ;;  %s6123_s29 = scalar_lea.hbm %s6122_s22, 1  ;;  %s6127_s19 = scalar_lea.hbm %s9747_s16, 2 }
  0x3c   : > { %9792 = vst [vmem:[#allocation12_spill] sm:$0xff] %v6550_v39  ;;  %v6580_v50 = vmul.f32 %v6535_v33, %v6547_v38  ;;  %v597_v56 = vrot.slane %v559_v46, 7  ;;  %v599_v57 = vrot.slane %v561_v47, 7  ;;  %v6589_v58 = vmul.f32 %v6535_v33, %v6550_v39  ;;  %p6124_p11 = scmp.ne.s32.totalorder %s6122_s22, %s6123_s29  ;;  %p6128_p0 = scmp.lt.s32.totalorder %s6122_s22, %s9747_s16 }
  0x3d   : > { %1462 = vmatpush.bf16.msra.mxu0 %v5174_v18  ;;  %v601_v61 = vrot.slane %v563_v52, 7  ;;  %v603_v62 = vrot.slane %v565_v53, 7  ;;  %v605_v63 = vrot.slane %v567_v54, 7  ;;  %v716_v0 = vrot.slane %v6567_v44, 1  ;;  %p6129_p1 = scmp.lt.s32.totalorder %s6127_s19, %s6123_s29 }
  0x3e   : > { %1476 = vmatpush.bf16.msra.mxu1 %v5238_v25  ;;  %1490 = vmatpush.bf16.msra.mxu2 %v5178_v26  ;;  %v607_v1 = vrot.slane %v569_v59, 7  ;;  %v609_v2 = vrot.slane %v571_v60, 7  ;;  %v6595_v3 = vsel %vm628_vm0, 0.0, %v595_v55  ;;  %v6598_v4 = vsel %vm628_vm0, 0.0, %v597_v56  ;;  %p6125_p12 = pnand %p6124_p11, %p6300_p5 }
  0x3f   : > { %1504 = vmatpush.bf16.msra.mxu3 %v5242_v27  ;;  %v6601_v5 = vsel %vm628_vm0, 0.0, %v599_v57  ;;  %v6604_v6 = vsel %vm628_vm0, 0.0, %v601_v61  ;;  %v6607_v7 = vsel %vm628_vm0, 0.0, %v603_v62  ;;  %v6610_v8 = vsel %vm628_vm0, 0.0, %v605_v63  ;;  %p6130_p2 = por %p6129_p1, %p6128_p0 }
  0x40   : > { %v6613_v9 = vsel %vm628_vm0, 0.0, %v607_v1  ;;  %v6616_v10 = vsel %vm628_vm0, 0.0, %v609_v2  ;;  %v6619_v11 = vsel %vm628_vm0, %v595_v55, 0.0  ;;  %v6622_v12 = vsel %vm628_vm0, %v597_v56, 0.0  ;;  %p6126_p13 = pneg %p6125_p12 }
  0x41   : > { %1463 = vmatpush.bf16.msra.mxu0 %v5166_v37  ;;  %v6625_v13 = vsel %vm628_vm0, %v599_v57, 0.0  ;;  %v6628_v14 = vsel %vm628_vm0, %v601_v61, 0.0  ;;  %v6631_v15 = vsel %vm628_vm0, %v603_v62, 0.0  ;;  %v6634_v16 = vsel %vm628_vm0, %v605_v63, 0.0 }
  0x42   : > { %1477 = vmatpush.bf16.msra.mxu1 %v5230_v41  ;;  %1491 = vmatpush.bf16.msra.mxu2 %v5170_v42  ;;  %v6637_v17 = vsel %vm628_vm0, %v607_v1, 0.0  ;;  %v6640_v18 = vsel %vm628_vm0, %v609_v2, 0.0  ;;  %v667_v19 = vmul.f32 %v6531_v31, %v6598_v4  ;;  %v669_v20 = vmul.f32 %v6531_v31, %v6604_v6  ;;  %p6131_p3 = pnand %p6130_p2, %p6126_p13 }
  0x43   : > { %1505 = vmatpush.bf16.msra.mxu3 %v5234_v43  ;;  %v671_v21 = vmul.f32 %v6531_v31, %v6610_v8  ;;  %v687_v22 = vmul.f32 %v6533_v32, %v6598_v4  ;;  %v689_v23 = vmul.f32 %v6533_v32, %v6622_v12  ;;  %v691_v24 = vmul.f32 %v6533_v32, %v6604_v6 }
  0x44   : > { %v693_v25 = vmul.f32 %v6533_v32, %v6628_v14  ;;  %v695_v26 = vmul.f32 %v6533_v32, %v6610_v8  ;;  %v697_v27 = vmul.f32 %v6533_v32, %v6634_v16  ;;  %v717_v28 = vrot.slane %v685_v49, 1 }
  0x45   : > { %v722_v29 = vrot.slane %v687_v22, 1  ;;  %v723_v30 = vrot.slane %v689_v23, 1  ;;  %v728_v31 = vrot.slane %v691_v24, 1  ;;  %v762_v37 = vmul.f32 %v6535_v33, %v6598_v4 }
  0x46   : > { %v718_v41 = vsel %vm715_vm1, %v716_v0, %v717_v28  ;;  %v729_v42 = vrot.slane %v693_v25, 1  ;;  %v734_v43 = vrot.slane %v695_v26, 1  ;;  %v735_v44 = vrot.slane %v697_v27, 1 }
  0x47   : > { %v724_v45 = vsel %vm715_vm1, %v722_v29, %v723_v30  ;;  %v748_v46 = vadd.f32 %v718_v41, %v6574_v48  ;;  %v764_v47 = vmul.f32 %v6535_v33, %v6622_v12  ;;  %v766_v32 = vmul.f32 %v6535_v33, %v6604_v6 }
  0x48   : > { %v730_v49 = vsel %vm715_vm1, %v728_v31, %v729_v42  ;;  %v736_v52 = vsel %vm715_vm1, %v734_v43, %v735_v44  ;;  %v750_v53 = vadd.f32 %v724_v45, %v667_v19  ;;  %v768_v54 = vmul.f32 %v6535_v33, %v6628_v14 }
  0x49   : > { %v752_v55 = vadd.f32 %v730_v49, %v669_v20  ;;  %v754_v56 = vadd.f32 %v736_v52, %v671_v21  ;;  %v770_v57 = vmul.f32 %v6535_v33, %v6610_v8  ;;  %v772_v48 = vmul.f32 %v6535_v33, %v6634_v16 }
  0x4a   : > { %v791_v59 = vrot.slane %v6580_v50, 2  ;;  %v792_v60 = vrot.slane %v6589_v58, 2  ;;  %v797_v61 = vrot.slane %v762_v37, 2  ;;  %v798_v62 = vrot.slane %v764_v47, 2 }
  0x4b   : > { %v803_v63 = vrot.slane %v766_v32, 2  ;;  %v804_v0 = vrot.slane %v768_v54, 2  ;;  %v809_v1 = vrot.slane %v770_v57, 2  ;;  %v810_v2 = vrot.slane %v772_v48, 2 }
  0x4c   : > { %v793_v19 = vsel %vm790_vm2, %v791_v59, %v792_v60  ;;  %v799_v20 = vsel %vm790_vm2, %v797_v61, %v798_v62  ;;  %v833_v21 = vmul.f32 %v6537_v34, %v6595_v3  ;;  %v835_v33 = vmul.f32 %v6537_v34, %v6601_v5 }
  0x4d   : > { %v805_v50 = vsel %vm790_vm2, %v803_v63, %v804_v0  ;;  %v811_v58 = vsel %vm790_vm2, %v809_v1, %v810_v2  ;;  %v823_v22 = vadd.f32 %v793_v19, %v748_v46  ;;  %v825_v23 = vadd.f32 %v799_v20, %v750_v53 }
  0x4e   : > { %v827_v24 = vadd.f32 %v805_v50, %v752_v55  ;;  %v829_v25 = vadd.f32 %v811_v58, %v754_v56  ;;  %v837_v26 = vmul.f32 %v6537_v34, %v6607_v7  ;;  %v839_v27 = vmul.f32 %v6537_v34, %v6613_v9 }
  0x4f   : > { %v841_v28 = vadd.f32 %v833_v21, %v823_v22  ;;  %v843_v29 = vadd.f32 %v835_v33, %v825_v23  ;;  %v851_v30 = vmul.f32 %v6539_v35, %v6595_v3  ;;  %v853_v31 = vmul.f32 %v6539_v35, %v6619_v11 }
  0x50   : > { %v845_v37 = vadd.f32 %v837_v26, %v827_v24  ;;  %v847_v41 = vadd.f32 %v839_v27, %v829_v25  ;;  %v855_v42 = vmul.f32 %v6539_v35, %v6601_v5  ;;  %v857_v43 = vmul.f32 %v6539_v35, %v6625_v13 }
  0x51   : > { %v859_v44 = vmul.f32 %v6539_v35, %v6607_v7  ;;  %v861_v34 = vmul.f32 %v6539_v35, %v6631_v15  ;;  %v863_v45 = vmul.f32 %v6539_v35, %v6613_v9  ;;  %v865_v46 = vmul.f32 %v6539_v35, %v6637_v17 }
  0x52   : > { %v883_v47 = vrot.slane %v851_v30, 1  ;;  %v884_v32 = vrot.slane %v853_v31, 1  ;;  %v889_v49 = vrot.slane %v855_v42, 1  ;;  %v890_v52 = vrot.slane %v857_v43, 1 }
  0x53   : > { %v895_v53 = vrot.slane %v859_v44, 1  ;;  %v896_v54 = vrot.slane %v861_v34, 1  ;;  %v901_v55 = vrot.slane %v863_v45, 1  ;;  %v902_v56 = vrot.slane %v865_v46, 1 }
  0x54   : > { %v885_v57 = vsel %vm715_vm1, %v883_v47, %v884_v32  ;;  %v891_v48 = vsel %vm715_vm1, %v889_v49, %v890_v52  ;;  %v925_v59 = vmul.f32 %v6541_v36, %v6595_v3  ;;  %v927_v60 = vmul.f32 %v6541_v36, %v6619_v11 }
  0x55   : > { %v897_v35 = vsel %vm715_vm1, %v895_v53, %v896_v54  ;;  %v903_v61 = vsel %vm715_vm1, %v901_v55, %v902_v56  ;;  %v915_v62 = vadd.f32 %v885_v57, %v841_v28  ;;  %v917_v63 = vadd.f32 %v891_v48, %v843_v29  ;;  %v6019_v56 = vld [vmem:[%s9790_s23 + $0x10] ss:$0 sm:$0xff] }
  0x56   : > { %v919_v0 = vadd.f32 %v897_v35, %v845_v37  ;;  %v921_v1 = vadd.f32 %v903_v61, %v847_v41  ;;  %v929_v2 = vmul.f32 %v6541_v36, %v6601_v5  ;;  %v931_v19 = vmul.f32 %v6541_v36, %v6625_v13 }
  0x57   : > { %v933_v3 = vmul.f32 %v6541_v36, %v6607_v7  ;;  %v935_v11 = vmul.f32 %v6541_v36, %v6631_v15  ;;  %v937_v20 = vmul.f32 %v6541_v36, %v6613_v9  ;;  %v939_v21 = vmul.f32 %v6541_v36, %v6637_v17 }
  0x58   : > { %v957_v33 = vrot.slane %v925_v59, 2  ;;  %v958_v50 = vrot.slane %v927_v60, 2  ;;  %v963_v58 = vrot.slane %v929_v2, 2  ;;  %v964_v22 = vrot.slane %v931_v19, 2 }
  0x59   : > { %v969_v5 = vrot.slane %v933_v3, 2  ;;  %v970_v23 = vrot.slane %v935_v11, 2  ;;  %v975_v24 = vrot.slane %v937_v20, 2  ;;  %v976_v13 = vrot.slane %v939_v21, 2 }
  0x5a   : > { %v959_v25 = vsel %vm790_vm2, %v957_v33, %v958_v50  ;;  %v965_v7 = vsel %vm790_vm2, %v963_v58, %v964_v22  ;;  %v999_v15 = vmul.f32 %v6582_v51, %v6598_v4  ;;  %v1001_v9 = vmul.f32 %v6582_v51, %v6604_v6 }
  0x5b   : > { %v971_v36 = vsel %vm790_vm2, %v969_v5, %v970_v23  ;;  %v977_v17 = vsel %vm790_vm2, %v975_v24, %v976_v13  ;;  %v989_v26 = vadd.f32 %v959_v25, %v915_v62  ;;  %v991_v27 = vadd.f32 %v965_v7, %v917_v63 }
  0x5c   : > { %v993_v28 = vadd.f32 %v971_v36, %v919_v0  ;;  %v995_v29 = vadd.f32 %v977_v17, %v921_v1  ;;  %v1003_v30 = vmul.f32 %v6582_v51, %v6610_v8  ;;  %v1005_v31 = vmul.f32 %v6582_v51, %v6616_v10 }
  0x5d   : > { %v1007_v37 = vadd.f32 %v999_v15, %v989_v26  ;;  %v1009_v41 = vadd.f32 %v1001_v9, %v991_v27  ;;  %v1017_v42 = vmul.f32 %v6552_v40, %v6598_v4  ;;  %v1019_v43 = vmul.f32 %v6552_v40, %v6622_v12 }
  0x5e   : > { %v1011_v44 = vadd.f32 %v1003_v30, %v993_v28  ;;  %v1013_v34 = vadd.f32 %v1005_v31, %v995_v29  ;;  %v1021_v45 = vmul.f32 %v6552_v40, %v6604_v6  ;;  %v1023_v46 = vmul.f32 %v6552_v40, %v6628_v14 }
  0x5f   : > { %v1025_v47 = vmul.f32 %v6552_v40, %v6610_v8  ;;  %v1027_v51 = vmul.f32 %v6552_v40, %v6634_v16  ;;  %v1029_v32 = vmul.f32 %v6552_v40, %v6616_v10  ;;  %v1031_v49 = vmul.f32 %v6552_v40, %v6640_v18 }
  0x60   : > { %v1049_v52 = vrot.slane %v1017_v42, 1  ;;  %v1050_v53 = vrot.slane %v1019_v43, 1  ;;  %v1055_v54 = vrot.slane %v1021_v45, 1  ;;  %v1056_v55 = vrot.slane %v1023_v46, 1  ;;  %v558_v46 = vld [vmem:[%s6563_s27 + $0x8] sm:$0xff] }
  0x61   : > { %v1061_v57 = vrot.slane %v1025_v47, 1  ;;  %v1062_v48 = vrot.slane %v1027_v51, 1  ;;  %v1067_v59 = vrot.slane %v1029_v32, 1  ;;  %v1068_v60 = vrot.slane %v1031_v49, 1  ;;  %v560_v47 = vld [vmem:[%s6563_s27 + $0x18] sm:$0xff] }
  0x62   : > { %v1051_v35 = vsel %vm715_vm1, %v1049_v52, %v1050_v53  ;;  %v1057_v61 = vsel %vm715_vm1, %v1055_v54, %v1056_v55  ;;  %v1091_v62 = vmul.f32 %v6019_v56, %v6598_v4  ;;  %v1093_v40 = vmul.f32 %v6019_v56, %v6622_v12  ;;  %v562_v53 = vld [vmem:[%s6563_s27 + $0x28] sm:$0xff]  ;;  %v564_v54 = vld [vmem:[%s6563_s27 + $0x38] sm:$0xff] }
  0x63   : > { %v1063_v63 = vsel %vm715_vm1, %v1061_v57, %v1062_v48  ;;  %v1069_v0 = vsel %vm715_vm1, %v1067_v59, %v1068_v60  ;;  %v1081_v1 = vadd.f32 %v1051_v35, %v1007_v37  ;;  %v1083_v2 = vadd.f32 %v1057_v61, %v1009_v41  ;;  %v566_v55 = vld [vmem:[%s6563_s27 + $0x48] sm:$0xff]  ;;  %v568_v60 = vld [vmem:[%s6563_s27 + $0x58] sm:$0xff] }
  0x64   : > { %v1085_v19 = vadd.f32 %v1063_v63, %v1011_v44  ;;  %v1087_v3 = vadd.f32 %v1069_v0, %v1013_v34  ;;  %v1095_v11 = vmul.f32 %v6019_v56, %v6604_v6  ;;  %v1097_v20 = vmul.f32 %v6019_v56, %v6628_v14  ;;  %v570_v35 = vld [vmem:[%s6563_s27 + $0x68] sm:$0xff] }
  0x65   : > { %v1099_v21 = vmul.f32 %v6019_v56, %v6610_v8  ;;  %v1101_v33 = vmul.f32 %v6019_v56, %v6634_v16  ;;  %v1103_v4 = vmul.f32 %v6019_v56, %v6616_v10  ;;  %v1105_v12 = vmul.f32 %v6019_v56, %v6640_v18 }
  0x66   : > { %v1123_v50 = vrot.slane %v1091_v62, 2  ;;  %v1124_v58 = vrot.slane %v1093_v40, 2  ;;  %v1129_v22 = vrot.slane %v1095_v11, 2  ;;  %v1130_v5 = vrot.slane %v1097_v20, 2  ;;  %v572_v40 = vld [vmem:[%s6563_s27 + $0x78] sm:$0xff] }
  0x67   : > { %v1135_v23 = vrot.slane %v1099_v21, 2  ;;  %v1136_v24 = vrot.slane %v1101_v33, 2  ;;  %v1141_v13 = vrot.slane %v1103_v4, 2  ;;  %v1142_v25 = vrot.slane %v1105_v12, 2 }
  0x68   : > { %v1125_v6 = vsel %vm790_vm2, %v1123_v50, %v1124_v58  ;;  %v1131_v14 = vsel %vm790_vm2, %v1129_v22, %v1130_v5  ;;  %v596_v63 = vrot.slane %v558_v46, 7  ;;  %v598_v0 = vrot.slane %v560_v47, 7  ;;  %v6805_v58 = vld [vmem:[%s9790_s23 + $0x8] sm:$0xff] }
  0x69   : > { %v1137_v8 = vsel %vm790_vm2, %v1135_v23, %v1136_v24  ;;  %v1143_v16 = vsel %vm790_vm2, %v1141_v13, %v1142_v25  ;;  %v1155_v10 = vadd.f32 %v1125_v6, %v1081_v1  ;;  %v1157_v7 = vadd.f32 %v1131_v14, %v1083_v2 }
  0x6a   : > { %v1159_v18 = vadd.f32 %v1137_v8, %v1085_v19  ;;  %v1161_v15 = vadd.f32 %v1143_v16, %v1087_v3  ;;  %v600_v1 = vrot.slane %v562_v53, 7  ;;  %v602_v2 = vrot.slane %v564_v54, 7 }
  0x6b   : > { %v1171_v9 = vrot.slane %v1155_v10, 1  ;;  %v1173_v36 = vrot.slane %v1157_v7, 1  ;;  %v1187_v17 = vrot.slane %v1155_v10, 2  ;;  %v1189_v26 = vrot.slane %v1157_v7, 2 }
  0x6c   : > { %v1175_v27 = vrot.slane %v1159_v18, 1  ;;  %v1177_v28 = vrot.slane %v1161_v15, 1  ;;  %v1191_v29 = vrot.slane %v1159_v18, 2  ;;  %v1193_v30 = vrot.slane %v1161_v15, 2 }
  0x6d   : > { %v1203_v31 = vrot.slane %v1155_v10, 3  ;;  %v1205_v37 = vrot.slane %v1157_v7, 3  ;;  %v1207_v41 = vrot.slane %v1159_v18, 3  ;;  %v1209_v42 = vrot.slane %v1161_v15, 3 }
  0x6e   : > { %v1219_v43 = vsel %vm628_vm0, %v1155_v10, %v1171_v9  ;;  %v1221_v44 = vsel %vm628_vm0, %v1157_v7, %v1173_v36  ;;  %v1223_v34 = vsel %vm628_vm0, %v1159_v18, %v1175_v27  ;;  %v1225_v45 = vsel %vm628_vm0, %v1161_v15, %v1177_v28 }
  0x6f   : > { %v1228_v51 = vsel %vm1227_vm3, %v1219_v43, %v1187_v17  ;;  %v1230_v32 = vsel %vm1227_vm3, %v1221_v44, %v1189_v26  ;;  %v1232_v49 = vsel %vm1227_vm3, %v1223_v34, %v1191_v29  ;;  %v1234_v52 = vsel %vm1227_vm3, %v1225_v45, %v1193_v30 }
  0x70   : > { %v1237_v56 = vsel %vm1236_vm4, %v1228_v51, %v1203_v31  ;;  %v1239_v57 = vsel %vm1236_vm4, %v1230_v32, %v1205_v37  ;;  %v1241_v48 = vsel %vm1236_vm4, %v1232_v49, %v1207_v41  ;;  %v1243_v59 = vsel %vm1236_vm4, %v1234_v52, %v1209_v42 }
  0x71   : > { %v1247_v61 = vrot.slane %v1239_v57, 4  ;;  %v1253_v62 = vrot.slane %v1243_v59, 4  ;;  %v604_v19 = vrot.slane %v566_v55, 7  ;;  %v606_v20 = vrot.slane %v568_v60, 7 }
  0x72   : > { %v608_v21 = vrot.slane %v570_v35, 7  ;;  %v610_v4 = vrot.slane %v572_v40, 7  ;;  %v6797_v12 = vsel %vm628_vm0, 0.0, %v596_v63  ;;  %v6800_v50 = vsel %vm628_vm0, 0.0, %v598_v0 }
  0x73   : > { %v1258_v3 = vsel %vm1257_vm5, %v1237_v56, %v1247_v61  ;;  %v1260_v11 = vsel %vm1257_vm5, %v1241_v48, %v1253_v62  ;;  %v6808_v22 = vsel %vm628_vm0, 0.0, %v600_v1  ;;  %v6811_v5 = vsel %vm628_vm0, 0.0, %v602_v2 }
  0x74   : > { %v1262_v33 = vpack.c.bf16 %v1260_v11, %v1258_v3  ;;  %v6814_v23 = vsel %vm628_vm0, 0.0, %v604_v19  ;;  %v6817_v24 = vsel %vm628_vm0, 0.0, %v606_v20  ;;  %v6820_v13 = vsel %vm628_vm0, 0.0, %v608_v21 }
  0x75   : > { %v6823_v25 = vsel %vm628_vm0, 0.0, %v610_v4  ;;  %v6826_v6 = vsel %vm628_vm0, %v596_v63, 0.0  ;;  %v6829_v14 = vsel %vm628_vm0, %v598_v0, 0.0  ;;  %v6832_v8 = vsel %vm628_vm0, %v600_v1, 0.0 }
  0x76   : > { %1464 = vmatmul.bf16.vlgmr.msra.gmra.mxu0 %v1262_v33  ;;  %1492 = vmatmul.bf16.vlgmr.msra.gmra.mxu2 %v1262_v33  ;;  %v6835_v16 = vsel %vm628_vm0, %v602_v2, 0.0  ;;  %v6838_v10 = vsel %vm628_vm0, %v604_v19, 0.0  ;;  %v6841_v7 = vsel %vm628_vm0, %v606_v20, 0.0  ;;  %v6844_v18 = vsel %vm628_vm0, %v608_v21, 0.0 }
  0x77   : > { %v6847_v15 = vsel %vm628_vm0, %v610_v4, 0.0  ;;  %v664_v9 = vperm.slane %v6805_v58, 0  ;;  %v682_v36 = vperm.slane %v6805_v58, 1  ;;  %v757_v17 = vperm.slane %v6805_v58, 2 }
  0x78   : > { %v832_v26 = vperm.slane %v6805_v58, 3  ;;  %v6854_v27 = vperm.slane %v6805_v58, 4  ;;  %v6857_v28 = vperm.slane %v6805_v58, 5 }
  0x79   : > { %v666_v29 = vmul.f32 %v664_v9, %v6547_v38  ;;  %v668_v30 = vmul.f32 %v664_v9, %v6800_v50  ;;  %v670_v31 = vmul.f32 %v664_v9, %v6811_v5  ;;  %v672_v37 = vmul.f32 %v664_v9, %v6817_v24 }
  0x7a   : > { %v684_v41 = vmul.f32 %v682_v36, %v6547_v38  ;;  %v686_v42 = vmul.f32 %v682_v36, %v6550_v39  ;;  %v688_v43 = vmul.f32 %v682_v36, %v6800_v50  ;;  %v690_v44 = vmul.f32 %v682_v36, %v6829_v14 }
  0x7b   : > { %v692_v34 = vmul.f32 %v682_v36, %v6811_v5  ;;  %v694_v45 = vmul.f32 %v682_v36, %v6835_v16  ;;  %v696_v46 = vmul.f32 %v682_v36, %v6817_v24  ;;  %v698_v47 = vmul.f32 %v682_v36, %v6841_v7 }
  0x7c   : > { %v719_v51 = vrot.slane %v684_v41, 1  ;;  %v720_v32 = vrot.slane %v686_v42, 1  ;;  %v725_v49 = vrot.slane %v688_v43, 1  ;;  %v726_v52 = vrot.slane %v690_v44, 1 }
  0x7d   : > { %v731_v53 = vrot.slane %v692_v34, 1  ;;  %v732_v54 = vrot.slane %v694_v45, 1  ;;  %v737_v55 = vrot.slane %v696_v46, 1  ;;  %v738_v56 = vrot.slane %v698_v47, 1 }
  0x7e   : > { %v721_v57 = vsel %vm715_vm1, %v719_v51, %v720_v32  ;;  %v727_v48 = vsel %vm715_vm1, %v725_v49, %v726_v52  ;;  %v759_v59 = vmul.f32 %v757_v17, %v6547_v38  ;;  %v761_v60 = vmul.f32 %v757_v17, %v6550_v39 }
  0x7f   : > { %v733_v35 = vsel %vm715_vm1, %v731_v53, %v732_v54  ;;  %v739_v61 = vsel %vm715_vm1, %v737_v55, %v738_v56  ;;  %v749_v62 = vadd.f32 %v721_v57, %v666_v29  ;;  %v751_v40 = vadd.f32 %v727_v48, %v668_v30 }
  0x80   : > { %v753_v63 = vadd.f32 %v733_v35, %v670_v31  ;;  %v755_v0 = vadd.f32 %v739_v61, %v672_v37  ;;  %v763_v1 = vmul.f32 %v757_v17, %v6800_v50  ;;  %v765_v2 = vmul.f32 %v757_v17, %v6829_v14 }
  0x81   : > { %v767_v19 = vmul.f32 %v757_v17, %v6811_v5  ;;  %v769_v3 = vmul.f32 %v757_v17, %v6835_v16  ;;  %v771_v11 = vmul.f32 %v757_v17, %v6817_v24  ;;  %v773_v20 = vmul.f32 %v757_v17, %v6841_v7 }
  0x82   : > { %v794_v21 = vrot.slane %v759_v59, 2  ;;  %v795_v33 = vrot.slane %v761_v60, 2  ;;  %v800_v4 = vrot.slane %v763_v1, 2  ;;  %v801_v9 = vrot.slane %v765_v2, 2 }
  0x83   : > { %v806_v36 = vrot.slane %v767_v19, 2  ;;  %v807_v29 = vrot.slane %v769_v3, 2  ;;  %v812_v30 = vrot.slane %v771_v11, 2  ;;  %v813_v31 = vrot.slane %v773_v20, 2 }
  0x84   : > { %v796_v37 = vsel %vm790_vm2, %v794_v21, %v795_v33  ;;  %v802_v41 = vsel %vm790_vm2, %v800_v4, %v801_v9  ;;  %v834_v42 = vmul.f32 %v832_v26, %v6797_v12  ;;  %v836_v43 = vmul.f32 %v832_v26, %v6808_v22 }
  0x85   : > { %v808_v44 = vsel %vm790_vm2, %v806_v36, %v807_v29  ;;  %v814_v17 = vsel %vm790_vm2, %v812_v30, %v813_v31  ;;  %v824_v34 = vadd.f32 %v796_v37, %v749_v62  ;;  %v826_v45 = vadd.f32 %v802_v41, %v751_v40 }
  0x86   : > { %v828_v46 = vadd.f32 %v808_v44, %v753_v63  ;;  %v830_v47 = vadd.f32 %v814_v17, %v755_v0  ;;  %v838_v51 = vmul.f32 %v832_v26, %v6814_v23  ;;  %v840_v32 = vmul.f32 %v832_v26, %v6820_v13 }
  0x87   : > { %v842_v49 = vadd.f32 %v834_v42, %v824_v34  ;;  %v844_v52 = vadd.f32 %v836_v43, %v826_v45  ;;  %v852_v53 = vmul.f32 %v6854_v27, %v6797_v12  ;;  %v854_v54 = vmul.f32 %v6854_v27, %v6826_v6 }
  0x88   : > { %v846_v55 = vadd.f32 %v838_v51, %v828_v46  ;;  %v848_v56 = vadd.f32 %v840_v32, %v830_v47  ;;  %v856_v57 = vmul.f32 %v6854_v27, %v6808_v22  ;;  %v858_v48 = vmul.f32 %v6854_v27, %v6832_v8 }
  0x89   : > { %v860_v59 = vmul.f32 %v6854_v27, %v6814_v23  ;;  %v862_v26 = vmul.f32 %v6854_v27, %v6838_v10  ;;  %v864_v60 = vmul.f32 %v6854_v27, %v6820_v13  ;;  %v866_v35 = vmul.f32 %v6854_v27, %v6844_v18 }
  0x8a   : > { %v886_v61 = vrot.slane %v852_v53, 1  ;;  %v887_v62 = vrot.slane %v854_v54, 1  ;;  %v892_v40 = vrot.slane %v856_v57, 1  ;;  %v893_v63 = vrot.slane %v858_v48, 1 }
  0x8b   : > { %v898_v0 = vrot.slane %v860_v59, 1  ;;  %v899_v1 = vrot.slane %v862_v26, 1  ;;  %v904_v2 = vrot.slane %v864_v60, 1  ;;  %v905_v19 = vrot.slane %v866_v35, 1 }
  0x8c   : > { %v888_v3 = vsel %vm715_vm1, %v886_v61, %v887_v62  ;;  %v894_v11 = vsel %vm715_vm1, %v892_v40, %v893_v63  ;;  %v926_v20 = vmul.f32 %v6857_v28, %v6797_v12  ;;  %v928_v21 = vmul.f32 %v6857_v28, %v6826_v6 }
  0x8d   : > { %v900_v27 = vsel %vm715_vm1, %v898_v0, %v899_v1  ;;  %v906_v33 = vsel %vm715_vm1, %v904_v2, %v905_v19  ;;  %v916_v4 = vadd.f32 %v888_v3, %v842_v49  ;;  %v918_v9 = vadd.f32 %v894_v11, %v844_v52  ;;  %v6020_v2 = vld [vmem:[%s9790_s23 + $0x18] ss:$0 sm:$0xff] }
  0x8e   : > { %v920_v36 = vadd.f32 %v900_v27, %v846_v55  ;;  %v922_v29 = vadd.f32 %v906_v33, %v848_v56  ;;  %v930_v30 = vmul.f32 %v6857_v28, %v6808_v22  ;;  %v932_v31 = vmul.f32 %v6857_v28, %v6832_v8 }
  0x8f   : > { %v934_v12 = vmul.f32 %v6857_v28, %v6814_v23  ;;  %v936_v6 = vmul.f32 %v6857_v28, %v6838_v10  ;;  %v938_v37 = vmul.f32 %v6857_v28, %v6820_v13  ;;  %v940_v41 = vmul.f32 %v6857_v28, %v6844_v18 }
  0x90   : > { %v960_v42 = vrot.slane %v926_v20, 2  ;;  %v961_v43 = vrot.slane %v928_v21, 2  ;;  %v966_v44 = vrot.slane %v930_v30, 2  ;;  %v967_v17 = vrot.slane %v932_v31, 2 }
  0x91   : > { %v972_v22 = vrot.slane %v934_v12, 2  ;;  %v973_v34 = vrot.slane %v936_v6, 2  ;;  %v978_v45 = vrot.slane %v938_v37, 2  ;;  %v979_v8 = vrot.slane %v940_v41, 2 }
  0x92   : > { %v962_v46 = vsel %vm790_vm2, %v960_v42, %v961_v43  ;;  %v968_v23 = vsel %vm790_vm2, %v966_v44, %v967_v17  ;;  %v998_v10 = vperm.slane %v6805_v58, 6  ;;  %v1016_v47 = vperm.slane %v6805_v58, 7 }
  0x93   : > { %v974_v13 = vsel %vm790_vm2, %v972_v22, %v973_v34  ;;  %v980_v18 = vsel %vm790_vm2, %v978_v45, %v979_v8  ;;  %v990_v28 = vadd.f32 %v962_v46, %v916_v4  ;;  %v992_v51 = vadd.f32 %v968_v23, %v918_v9 }
  0x94   : > { %v994_v32 = vadd.f32 %v974_v13, %v920_v36  ;;  %v996_v49 = vadd.f32 %v980_v18, %v922_v29  ;;  %v1000_v52 = vmul.f32 %v998_v10, %v6800_v50  ;;  %v1002_v53 = vmul.f32 %v998_v10, %v6811_v5 }
  0x95   : > { %v1004_v54 = vmul.f32 %v998_v10, %v6817_v24  ;;  %v1006_v55 = vmul.f32 %v998_v10, %v6823_v25  ;;  %v1018_v56 = vmul.f32 %v1016_v47, %v6800_v50  ;;  %v1020_v58 = vmul.f32 %v1016_v47, %v6829_v14 }
  0x96   : > { %v1008_v57 = vadd.f32 %v1000_v52, %v990_v28  ;;  %v1010_v48 = vadd.f32 %v1002_v53, %v992_v51  ;;  %v1022_v59 = vmul.f32 %v1016_v47, %v6811_v5  ;;  %v1024_v26 = vmul.f32 %v1016_v47, %v6835_v16 }
  0x97   : > { %v1012_v60 = vadd.f32 %v1004_v54, %v994_v32  ;;  %v1014_v35 = vadd.f32 %v1006_v55, %v996_v49  ;;  %v1026_v61 = vmul.f32 %v1016_v47, %v6817_v24  ;;  %v1028_v62 = vmul.f32 %v1016_v47, %v6841_v7 }
  0x98   : > { %v1030_v40 = vmul.f32 %v1016_v47, %v6823_v25  ;;  %v1032_v63 = vmul.f32 %v1016_v47, %v6847_v15  ;;  %v1052_v0 = vrot.slane %v1018_v56, 1  ;;  %v1053_v1 = vrot.slane %v1020_v58, 1 }
  0x99   : > { %v1058_v19 = vrot.slane %v1022_v59, 1  ;;  %v1059_v3 = vrot.slane %v1024_v26, 1  ;;  %v1064_v11 = vrot.slane %v1026_v61, 1  ;;  %v1065_v20 = vrot.slane %v1028_v62, 1 }
  0x9a   : > { %v1054_v21 = vsel %vm715_vm1, %v1052_v0, %v1053_v1  ;;  %v1070_v27 = vrot.slane %v1030_v40, 1  ;;  %v1071_v33 = vrot.slane %v1032_v63, 1  ;;  %v1092_v4 = vmul.f32 %v6020_v2, %v6800_v50 }
  0x9b   : > { %v1060_v9 = vsel %vm715_vm1, %v1058_v19, %v1059_v3  ;;  %v1066_v36 = vsel %vm715_vm1, %v1064_v11, %v1065_v20  ;;  %v1082_v29 = vadd.f32 %v1054_v21, %v1008_v57  ;;  %v1094_v30 = vmul.f32 %v6020_v2, %v6829_v14 }
  0x9c   : > { %v1072_v31 = vsel %vm715_vm1, %v1070_v27, %v1071_v33  ;;  %v1084_v12 = vadd.f32 %v1060_v9, %v1010_v48  ;;  %v1086_v6 = vadd.f32 %v1066_v36, %v1012_v60  ;;  %v1096_v37 = vmul.f32 %v6020_v2, %v6811_v5  ;;  %v6981_v27 = vld [vmem:[%s9794_s3] ss:$2 sm:$0x3]  ;;  %v6986_v33 = vld [vmem:[%s9794_s3 + $0x1] ss:$2 sm:$0x3] }
  0x9d   : > { %v1088_v41 = vadd.f32 %v1072_v31, %v1014_v35  ;;  %v1098_v42 = vmul.f32 %v6020_v2, %v6835_v16  ;;  %v1100_v43 = vmul.f32 %v6020_v2, %v6817_v24  ;;  %v1102_v50 = vmul.f32 %v6020_v2, %v6841_v7  ;;  %v5354_v9 = vld [vmem:[%s9736_s5 + $0x70] sm:$0xf]  ;;  %v5866_v36 = vld [vmem:[%s9736_s5 + $0x74] sm:$0xf0]  ;;  %v5356_v31 = vld [vmem:[%s9736_s5 + $0x78] sm:$0xf0] }
  0x9e   : > { %v1104_v44 = vmul.f32 %v6020_v2, %v6823_v25  ;;  %v1106_v17 = vmul.f32 %v6020_v2, %v6847_v15  ;;  %v1126_v22 = vrot.slane %v1092_v4, 2  ;;  %v1127_v34 = vrot.slane %v1094_v30, 2  ;;  %v6991_v4 = vld [vmem:[%s9735_s4] sm:$0xff]  ;;  %v5865_v30 = vld [vmem:[%s9736_s5 + $0x74] sm:$0xf]  ;;  %s5162_s3 = sshll.u32 %s6529_s26, 2 }
  0x9f   : > { %v1132_v14 = vrot.slane %v1096_v37, 2  ;;  %v1133_v45 = vrot.slane %v1098_v42, 2  ;;  %v1138_v8 = vrot.slane %v1100_v43, 2  ;;  %v1139_v46 = vrot.slane %v1102_v50, 2  ;;  %s556_s30 = scalar_lea.vmem %s9748_s17, %s5162_s3  ;;  %s540_s26 = sand.u32 1, %s6161_s25  }
  0xa0   : > { %v1128_v23 = vsel %vm790_vm2, %v1126_v22, %v1127_v34  ;;  %v1144_v5 = vrot.slane %v1104_v44, 2  ;;  %v1145_v10 = vrot.slane %v1106_v17, 2  ;;  %v1514_v37 = vperm.slane %v6981_v27, 0  ;;  %v5346_v44 = vld [vmem:[%s9736_s5 + $0x60] sm:$0xf]  ;;  %v7030_v34 = vld [vmem:[%s9735_s4 + $0x8] sm:$0xff] }
  0xa1   : > { %v1134_v16 = vsel %vm790_vm2, %v1132_v14, %v1133_v45  ;;  %v1140_v24 = vsel %vm790_vm2, %v1138_v8, %v1139_v46  ;;  %v1156_v47 = vadd.f32 %v1128_v23, %v1082_v29  ;;  %v5355_v29 = vor.u32 %v5866_v36, %v5354_v9  ;;  %v5864_v17 = vld [vmem:[%s9736_s5 + $0x64] sm:$0xf0]  ;;  %v5863_v45 = vld [vmem:[%s9736_s5 + $0x64] sm:$0xf]  ;;  %v5348_v8 = vld [vmem:[%s9736_s5 + $0x68] sm:$0xf0] }
  0xa2   : > { %v1146_v7 = vsel %vm790_vm2, %v1144_v5, %v1145_v10  ;;  %v1158_v25 = vadd.f32 %v1134_v16, %v1084_v12  ;;  %v1160_v13 = vadd.f32 %v1140_v24, %v1086_v6  ;;  %v5359_v12 = vor.u32 %v5865_v30, %v5356_v31  ;;  %v5418_v23 = vld [vmem:[%s9736_s5 + $0xf0] sm:$0xf]  ;;  %v5882_v5 = vld [vmem:[%s9736_s5 + $0xf4] sm:$0xf0]  ;;  %v5881_v10 = vld [vmem:[%s9736_s5 + $0xf4] sm:$0xf] }
  0xa3   : > { %v1162_v15 = vadd.f32 %v1146_v7, %v1088_v41  ;;  %v1172_v18 = vrot.slane %v1156_v47, 1  ;;  %v1188_v28 = vrot.slane %v1156_v47, 2  ;;  %v1204_v51 = vrot.slane %v1156_v47, 3  ;;  %2099 = vmatpush.bf16.msrb.mxu0 %v5355_v29  ;;  %v5420_v7 = vld [vmem:[%s9736_s5 + $0xf8] sm:$0xf0]  ;;  %s541_s18 = scalar_lea.vmem [#allocation2], %s540_s26 }
  0xa4   : > { %v1174_v32 = vrot.slane %v1158_v25, 1  ;;  %v1176_v49 = vrot.slane %v1160_v13, 1  ;;  %v1190_v52 = vrot.slane %v1158_v25, 2  ;;  %v1192_v53 = vrot.slane %v1160_v13, 2  ;;  %2127 = vmatpush.bf16.msrb.mxu2 %v5359_v12  ;;  %v5877_v9 = vld [vmem:[%s9736_s5 + $0xd4] sm:$0xf] }
  0xa5   : > { %v1178_v54 = vrot.slane %v1162_v15, 1  ;;  %v1194_v55 = vrot.slane %v1162_v15, 2  ;;  %v1206_v56 = vrot.slane %v1158_v25, 3  ;;  %v1208_v58 = vrot.slane %v1160_v13, 3  ;;  %v5404_v29 = vld [vmem:[%s9736_s5 + $0xd8] sm:$0xf0] }
  0xa6   : > { %v1210_v57 = vrot.slane %v1162_v15, 3  ;;  %v1220_v48 = vsel %vm628_vm0, %v1156_v47, %v1172_v18  ;;  %v1222_v59 = vsel %vm628_vm0, %v1158_v25, %v1174_v32  ;;  %v1224_v26 = vsel %vm628_vm0, %v1160_v13, %v1176_v49  ;;  %v5862_v18 = vld [vmem:[%s9736_s5 + $0x54] sm:$0xf0]  ;;  %v5322_v30 = vld [vmem:[%s9736_s5 + $0x30] sm:$0xf]  ;;  %s5072_s2 = sshll.u32 %s541_s18, 4  ;;  %s5073_s2 = int_to_ptr.vmem [resolvable:$true] %s5072_s2 }
  0xa7   : > { %v1226_v60 = vsel %vm628_vm0, %v1162_v15, %v1178_v54  ;;  %v1229_v35 = vsel %vm1227_vm3, %v1220_v48, %v1188_v28  ;;  %v1231_v61 = vsel %vm1227_vm3, %v1222_v59, %v1190_v52  ;;  %v1233_v62 = vsel %vm1227_vm3, %v1224_v26, %v1192_v53  ;;  %v5338_v15 = vld [vmem:[%s9736_s5 + $0x50] sm:$0xf]  ;;  %v5861_v28 = vld [vmem:[%s9736_s5 + $0x54] sm:$0xf]  ;;  %v5340_v52 = vld [vmem:[%s9736_s5 + $0x58] sm:$0xf0] }
  0xa8   : > { %v1235_v40 = vsel %vm1227_vm3, %v1226_v60, %v1194_v55  ;;  %v1238_v63 = vsel %vm1236_vm4, %v1229_v35, %v1204_v51  ;;  %v1240_v0 = vsel %vm1236_vm4, %v1231_v61, %v1206_v56  ;;  %v1242_v1 = vsel %vm1236_vm4, %v1233_v62, %v1208_v58  ;;  %v5410_v55 = vld [vmem:[%s9736_s5 + $0xe0] sm:$0xf]  ;;  %v5880_v56 = vld [vmem:[%s9736_s5 + $0xe4] sm:$0xf0]  ;;  %v5879_v58 = vld [vmem:[%s9736_s5 + $0xe4] sm:$0xf] }
  0xa9   : > { %v1244_v2 = vsel %vm1236_vm4, %v1235_v40, %v1210_v57  ;;  %v1248_v19 = vrot.slane %v1240_v0, 4  ;;  %v7007_v6 = vsel %vm1573_vm6, %v6547_v38, 0.0  ;;  %v1525_v41 = vperm.slane %v6986_v33, 0  ;;  %v5412_v26 = vld [vmem:[%s9736_s5 + $0xe8] sm:$0xf0]  ;;  %s5058_s3 = scalar_lea.sflag [#allocation3], %s540_s26 }
  0xaa   : > { %v1254_v3 = vrot.slane %v1244_v2, 4  ;;  %9795 = vst [vmem:[#allocation13_spill] sm:$0xff] %v7007_v6  ;;  %v7012_v42 = vperm.slane %v6991_v4, 1  ;;  %v7015_v43 = vperm.slane %v6991_v4, 0  ;;  %v7018_v50 = vperm.slane %v6991_v4, 2 }
  0xab   : > { %v1259_v11 = vsel %vm1257_vm5, %v1238_v63, %v1248_v19  ;;  %v1515_v22 = vperm.slane %v6981_v27, 1  ;;  %v5347_v14 = vor.u32 %v5864_v17, %v5346_v44  ;;  %v5351_v46 = vor.u32 %v5863_v45, %v5348_v8  ;;  %v5330_v61 = vld [vmem:[%s9736_s5 + $0x40] sm:$0xf]  ;;  %v5860_v62 = vld [vmem:[%s9736_s5 + $0x44] sm:$0xf0] }
  0xac   : > { %v1261_v20 = vsel %vm1257_vm5, %v1242_v1, %v1254_v3  ;;  %v7048_v16 = vperm.slane %v6991_v4, 3  ;;  %v1526_v24 = vperm.slane %v6986_v33, 1  ;;  %v5419_v47 = vor.u32 %v5882_v5, %v5418_v23  ;;  %v5859_v40 = vld [vmem:[%s9736_s5 + $0x44] sm:$0xf]  ;;  %v5332_v2 = vld [vmem:[%s9736_s5 + $0x48] sm:$0xf0] }
  0xad   : > { %v1263_v21 = vpack.c.bf16 %v1261_v20, %v1259_v11  ;;  %2100 = vmatpush.bf16.msrb.mxu0 %v5347_v14  ;;  %v7056_v25 = vmul.f32 %v7012_v42, %v7007_v6  ;;  %2128 = vmatpush.bf16.msrb.mxu2 %v5351_v46  ;;  %v5423_v13 = vor.u32 %v5881_v10, %v5420_v7  ;;  %v7068_v51 = vperm.slane %v6991_v4, 4  ;;  %v5402_v20 = vld [vmem:[%s9736_s5 + $0xd0] sm:$0xf]  ;;  %v5858_v31 = vld [vmem:[%s9736_s5 + $0x34] sm:$0xf0] }
  0xae   : > { %v7071_v32 = vperm.slane %v7030_v34, 1  ;;  %2113 = vmatpush.bf16.msrb.mxu1 %v5419_v47  ;;  %v5339_v49 = vor.u32 %v5862_v18, %v5338_v15  ;;  %v7078_v53 = vmul.f32 %v7018_v50, %v7007_v6  ;;  %v5343_v54 = vor.u32 %v5861_v28, %v5340_v52  ;;  %v5857_v14 = vld [vmem:[%s9736_s5 + $0x34] sm:$0xf]  ;;  %v5324_v45 = vld [vmem:[%s9736_s5 + $0x38] sm:$0xf0] }
  0xaf   : > { %1478 = vmatmul.bf16.vlgmr.msra.gmra.mxu1 %v1263_v21  ;;  %1506 = vmatmul.bf16.vlgmr.msra.gmra.mxu3 %v1263_v21  ;;  %v7090_v57 = vperm.slane %v7030_v34, 0  ;;  %v7093_v48 = vperm.slane %v7030_v34, 2  ;;  %v5411_v59 = vor.u32 %v5880_v56, %v5410_v55  ;;  %v1619_v60 = vrot.slane %v7056_v25, 1  ;;  %v5878_v21 = vld [vmem:[%s9736_s5 + $0xd4] sm:$0xf0] }
  0xb0   : > { %2141 = vmatpush.bf16.msrb.mxu3 %v5423_v13  ;;  %v5415_v35 = vor.u32 %v5879_v58, %v5412_v26  ;;  %v7109_v63 = vperm.slane %v7030_v34, 3  ;;  %v7112_v0 = vperm.slane %v7030_v34, 4  ;;  %v5331_v1 = vor.u32 %v5860_v62, %v5330_v61  ;;  %v5394_v8 = vld [vmem:[%s9736_s5 + $0xc0] sm:$0xf]  ;;  %v5876_v23 = vld [vmem:[%s9736_s5 + $0xc4] sm:$0xf0] }
  0xb1   : > { %2101 = vmatpush.bf16.msrb.mxu0 %v5339_v49  ;;  %2129 = vmatpush.bf16.msrb.mxu2 %v5343_v54  ;;  %v1661_v19 = vrot.slane %v7078_v53, 2  ;;  %v5335_v11 = vor.u32 %v5859_v40, %v5332_v2  ;;  %v5403_v36 = vor.u32 %v5878_v21, %v5402_v20  ;;  %v1585_v12 = vmul.f32 %v7015_v43, %v7007_v6  ;;  %v5875_v5 = vld [vmem:[%s9736_s5 + $0xc4] sm:$0xf]  ;;  %v5396_v10 = vld [vmem:[%s9736_s5 + $0xc8] sm:$0xf0] }
  0xb2   : > { %2114 = vmatpush.bf16.msrb.mxu1 %v5411_v59  ;;  %v5407_v44 = vor.u32 %v5877_v9, %v5404_v29  ;;  %v5323_v17 = vor.u32 %v5858_v31, %v5322_v30  ;;  %v5327_v46 = vor.u32 %v5857_v14, %v5324_v45  ;;  %v5395_v7 = vor.u32 %v5876_v23, %v5394_v8  ;;  %v5314_v13 = vld [vmem:[%s9736_s5 + $0x20] sm:$0xf]  ;;  %v5856_v15 = vld [vmem:[%s9736_s5 + $0x24] sm:$0xf0]  ;;  %v5855_v18 = vld [vmem:[%s9736_s5 + $0x24] sm:$0xf] }
  0xb3   : > { %v5399_v25 = vor.u32 %v5875_v5, %v5396_v10  ;;  %v5315_v49 = vor.u32 %v5856_v15, %v5314_v13  ;;  %v5316_v52 = vld [vmem:[%s9736_s5 + $0x28] sm:$0xf0]  ;;  %v5386_v53 = vld [vmem:[%s9736_s5 + $0xb0] sm:$0xf]  ;;  %v5874_v54 = vld [vmem:[%s9736_s5 + $0xb4] sm:$0xf0]  ;;  %v1635_v55 = vadd.f32 %v1619_v60, %v1585_v12  ;;  %v7218_v12 = vmul.f32 %v7090_v57, %v7007_v6 }
  0xb4   : > { %2142 = vmatpush.bf16.msrb.mxu3 %v5415_v35  ;;  %v5319_v58 = vor.u32 %v5855_v18, %v5316_v52  ;;  %v5873_v59 = vld [vmem:[%s9736_s5 + $0xb4] sm:$0xf]  ;;  %v5388_v26 = vld [vmem:[%s9736_s5 + $0xb8] sm:$0xf0]  ;;  %v5306_v35 = vld [vmem:[%s9736_s5 + $0x10] sm:$0xf]  ;;  %v5387_v60 = vor.u32 %v5874_v54, %v5386_v53  ;;  %v7231_v5 = vmul.f32 %v7071_v32, %v7007_v6 }
  0xb5   : > { %2102 = vmatpush.bf16.msrb.mxu0 %v5331_v1  ;;  %2130 = vmatpush.bf16.msrb.mxu2 %v5335_v11  ;;  %v5854_v62 = vld [vmem:[%s9736_s5 + $0x14] sm:$0xf0]  ;;  %v5853_v40 = vld [vmem:[%s9736_s5 + $0x14] sm:$0xf]  ;;  %v5308_v1 = vld [vmem:[%s9736_s5 + $0x18] sm:$0xf0]  ;;  %v5391_v2 = vor.u32 %v5873_v59, %v5388_v26  ;;  %v7214_v31 = vadd.f32 %v1661_v19, %v1635_v55 }
  0xb6   : > { %2115 = vmatpush.bf16.msrb.mxu1 %v5403_v36  ;;  %v5872_v11 = vld [vmem:[%s9736_s5 + $0xa4] sm:$0xf0]  ;;  %v5871_v20 = vld [vmem:[%s9736_s5 + $0xa4] sm:$0xf]  ;;  %v5307_v9 = vor.u32 %v5854_v62, %v5306_v35  ;;  %v5380_v36 = vld [vmem:[%s9736_s5 + $0xa8] sm:$0xf0]  ;;  %v5311_v14 = vor.u32 %v5853_v40, %v5308_v1 }
  0xb7   : > { %v5298_v29 = vld [vmem:[%s9736_s5] sm:$0xf]  ;;  %v5852_v30 = vld [vmem:[%s9736_s5 + $0x4] sm:$0xf0]  ;;  %v5383_v8 = vor.u32 %v5871_v20, %v5380_v36  ;;  %v5300_v23 = vld [vmem:[%s9736_s5 + $0x8] sm:$0xf0] }
  0xb8   : > { %2143 = vmatpush.bf16.msrb.mxu3 %v5407_v44  ;;  %v5370_v19 = vld [vmem:[%s9736_s5 + $0x90] sm:$0xf]  ;;  %v5869_v13 = vld [vmem:[%s9736_s5 + $0x94] sm:$0xf]  ;;  %v7240_v15 = vperm.slane %v6991_v4, 5  ;;  %v7246_v53 = vperm.slane %v6991_v4, 6 }
  0xb9   : > { %2103 = vmatpush.bf16.msrb.mxu0 %v5323_v17  ;;  %2131 = vmatpush.bf16.msrb.mxu2 %v5327_v46  ;;  %v5851_v46 = vld [vmem:[%s9736_s5 + $0x4] sm:$0xf]  ;;  %v5372_v52 = vld [vmem:[%s9736_s5 + $0x98] sm:$0xf0]  ;;  %v7249_v54 = vperm.slane %v6991_v4, 7 }
  0xba   : > { %2116 = vmatpush.bf16.msrb.mxu1 %v5395_v7  ;;  %v5299_v7 = vor.u32 %v5852_v30, %v5298_v29  ;;  %v7254_v55 = vld [vmem:[%s9735_s4 + $0x10] ss:$0 sm:$0xff]  ;;  %v5375_v35 = vor.u32 %v5869_v13, %v5372_v52 }
  0xbb   : > { %v7264_v4 = vmul.f32 %v7249_v54, %v7007_v6 }
  0xbc   : > { %2144 = vmatpush.bf16.msrb.mxu3 %v5399_v25  ;;  %v5870_v25 = vld [vmem:[%s9736_s5 + $0x94] sm:$0xf0] }
  0xbd   : > { %2104 = vmatpush.bf16.msrb.mxu0 %v5315_v49  ;;  %2132 = vmatpush.bf16.msrb.mxu2 %v5319_v58  ;;  %v5371_v49 = vor.u32 %v5870_v25, %v5370_v19 }
  0xbe   : > { %2117 = vmatpush.bf16.msrb.mxu1 %v5387_v60  ;;  %v7268_v60 = vmul.f32 %v7254_v55, %v7007_v6 }
  0xc0   : > { %2145 = vmatpush.bf16.msrb.mxu3 %v5391_v2 }
  0xc1   : > { %2105 = vmatpush.bf16.msrb.mxu0 %v5307_v9  ;;  %2133 = vmatpush.bf16.msrb.mxu2 %v5311_v14  ;;  %v1871_v9 = vrot.slane %v7268_v60, 2 }
  0xc4   : > { %2146 = vmatpush.bf16.msrb.mxu3 %v5383_v8 }
  0xc5   : > { %2106 = vmatpush.bf16.msrb.mxu0 %v5299_v7 }
  0xc8   : > { %2147 = vmatpush.bf16.msrb.mxu3 %v5375_v35 }
  0xf3   : > { %v1465_v3 = vpop.f32.mrf.mxu0 }
  0xf9   : > { %v1493_v56 = vpop.f32.mrf.mxu2 }
  0xfb   : > { %v1467_v17 = vpop.f32.mrf.mxu0 }
 0x101   : > { %v1495_v20 = vpop.f32.mrf.mxu2 }
 0x12c   : > { %v1479_v47 = vpop.f32.mrf.mxu1 }
 0x12d   : > { %v1480_v28 = vadd.f32 %v1479_v47, %v1465_v3  ;;  %v5378_v3 = vld [vmem:[%s9736_s5 + $0xa0] sm:$0xf] }
 0x12e   : > { %v5379_v45 = vor.u32 %v5872_v11, %v5378_v3 }
 0x12f   : > { %v1518_v61 = vmul.f32 %v1514_v37, %v1480_v28  ;;  %v5303_v28 = vor.u32 %v5851_v46, %v5300_v23 }
 0x130   : > { %2118 = vmatpush.bf16.msrb.mxu1 %v5379_v45 }
 0x131   : > { %v1529_v21 = vadd.f32 %v1525_v41, %v1518_v61  ;;  %v7260_v61 = vmul.f32 %v7246_v53, %v7007_v6  ;;  %2134 = vmatpush.bf16.msrb.mxu2 %v5303_v28 }
 0x132   : > { %v1507_v44 = vpop.f32.mrf.mxu3 }
 0x133   : > { %v1533_v10 = vmax.f32 %v1529_v21, 0.0  ;;  %v1508_v47 = vadd.f32 %v1507_v44, %v1493_v56  ;;  %v1829_v21 = vrot.slane %v7264_v4, 1 }
 0x134   : > { %v1481_v18 = vpop.f32.mrf.mxu1  ;;  %2119 = vmatpush.bf16.msrb.mxu1 %v5371_v49 }
 0x135   : > { %v1549_v56 = vrot.slane %v1533_v10, 7  ;;  %v5292_v58 = vrot.slane %v1533_v10, 11  ;;  %v1519_v59 = vmul.f32 %v1515_v22, %v1508_v47  ;;  %v1482_v26 = vadd.f32 %v1481_v18, %v1467_v17 }
 0x137   : > { %v1565_v62 = vsel %vm628_vm0, 0.0, %v1549_v56  ;;  %v1567_v40 = vsel %vm628_vm0, 0.0, %v5292_v58  ;;  %v1530_v1 = vadd.f32 %v1526_v24, %v1519_v59  ;;  %v1520_v2 = vmul.f32 %v1514_v37, %v1482_v26 }
 0x138   : > { %v7277_v3 = vsel %vm1573_vm6, %v1565_v62, 0.0  ;;  %v7280_v11 = vsel %vm1573_vm6, %v1567_v40, 0.0 }
 0x139   : > { %v1587_v36 = vmul.f32 %v7015_v43, %v7277_v3  ;;  %v1605_v29 = vmul.f32 %v7012_v42, %v7277_v3  ;;  %v1647_v37 = vmul.f32 %v7018_v50, %v7277_v3  ;;  %v7292_v30 = vmul.f32 %v7048_v16, %v7277_v3 }
 0x13a   : > { %v7296_v44 = vmul.f32 %v7068_v51, %v7277_v3  ;;  %v1534_v17 = vmax.f32 %v1530_v1, 0.0  ;;  %v1531_v14 = vadd.f32 %v1525_v41, %v1520_v2  ;;  %v1509_v45 = vpop.f32.mrf.mxu3  ;;  %v1589_v8 = vmul.f32 %v7015_v43, %v7280_v11 }
 0x13b   : > { %v1621_v46 = vrot.slane %v1605_v29, 1  ;;  %v1663_v23 = vrot.slane %v1647_v37, 2  ;;  %v1510_v19 = vadd.f32 %v1509_v45, %v1495_v20  ;;  %v1607_v10 = vmul.f32 %v7012_v42, %v7280_v11 }
 0x13c   : > { %v1550_v47 = vrot.slane %v1534_v17, 7  ;;  %v5293_v7 = vrot.slane %v1534_v17, 11  ;;  %v1535_v25 = vmax.f32 %v1531_v14, 0.0  ;;  %v1649_v13 = vmul.f32 %v7018_v50, %v7280_v11 }
 0x13d   : > { %v1637_v41 = vadd.f32 %v1621_v46, %v1587_v36  ;;  %v1521_v18 = vmul.f32 %v1515_v22, %v1510_v19  ;;  %v1623_v28 = vrot.slane %v1607_v10, 1  ;;  %v1689_v52 = vmul.f32 %v7048_v16, %v7280_v11 }
 0x13e   : > { %v1566_v49 = vsel %vm628_vm0, 0.0, %v1550_v47  ;;  %v1568_v56 = vsel %vm628_vm0, 0.0, %v5293_v7  ;;  %v1553_v58 = vrot.slane %v1535_v25, 7  ;;  %v5294_v59 = vrot.slane %v1535_v25, 11 }
 0x13f   : > { %v1679_v26 = vadd.f32 %v1663_v23, %v1637_v41  ;;  %v7313_v35 = vsel %vm1573_vm6, %v1566_v49, 0.0  ;;  %v7316_v62 = vsel %vm1573_vm6, %v1568_v56, 0.0  ;;  %v1532_v27 = vadd.f32 %v1526_v24, %v1521_v18 }
 0x140   : > { %v1588_v22 = vmul.f32 %v7090_v57, %v7313_v35  ;;  %v1606_v40 = vmul.f32 %v7071_v32, %v7313_v35  ;;  %v1648_v1 = vmul.f32 %v7093_v48, %v7313_v35  ;;  %v7328_v2 = vmul.f32 %v7109_v63, %v7313_v35 }
 0x141   : > { %v7332_v20 = vmul.f32 %v7112_v0, %v7313_v35  ;;  %v1569_v33 = vsel %vm628_vm0, 0.0, %v1553_v58  ;;  %v1571_v24 = vsel %vm628_vm0, 0.0, %v5294_v59  ;;  %v1536_v36 = vmax.f32 %v1532_v27, 0.0 }
 0x142   : > { %v1622_v29 = vrot.slane %v1606_v40, 1  ;;  %v1664_v37 = vrot.slane %v1648_v1, 2  ;;  %v7337_v17 = vsel %vm1573_vm6, %v1569_v33, 0.0  ;;  %v7340_v14 = vsel %vm1573_vm6, %v1571_v24, 0.0 }
 0x143   : > { %v1693_v45 = vmul.f32 %v7048_v16, %v7340_v14  ;;  %v1711_v46 = vmul.f32 %v7068_v51, %v7340_v14  ;;  %v1554_v23 = vrot.slane %v1536_v36, 7  ;;  %v5295_v19 = vrot.slane %v1536_v36, 11 }
 0x144   : > { %v1638_v10 = vadd.f32 %v1622_v29, %v1588_v22  ;;  %v1591_v47 = vmul.f32 %v7015_v43, %v7337_v17  ;;  %v1609_v7 = vmul.f32 %v7012_v42, %v7337_v17  ;;  %v1639_v25 = vadd.f32 %v1623_v28, %v1589_v8 }
 0x145   : > { %v1727_v41 = vrot.slane %v1711_v46, 1  ;;  %v1570_v18 = vsel %vm628_vm0, 0.0, %v1554_v23  ;;  %v1572_v49 = vsel %vm628_vm0, 0.0, %v5295_v19  ;;  %v1651_v56 = vmul.f32 %v7018_v50, %v7337_v17 }
 0x146   : > { %v7354_v58 = vadd.f32 %v1664_v37, %v1638_v10  ;;  %v7357_v59 = vsel %vm1573_vm6, %v1570_v18, 0.0  ;;  %v7360_v27 = vsel %vm1573_vm6, %v1572_v49, 0.0  ;;  %v1625_v43 = vrot.slane %v1609_v7, 1 }
 0x147   : > { %v7364_v42 = vmul.f32 %v7109_v63, %v7360_v27  ;;  %v7368_v8 = vmul.f32 %v7112_v0, %v7360_v27  ;;  %v1665_v28 = vrot.slane %v1649_v13, 2  ;;  %v1667_v22 = vrot.slane %v1651_v56, 2 }
 0x148   : > { %v1641_v50 = vadd.f32 %v1625_v43, %v1591_v47  ;;  %v1691_v40 = vmul.f32 %v7048_v16, %v7337_v17  ;;  %v1695_v1 = vadd.f32 %v7292_v30, %v7214_v31  ;;  %v1697_v33 = vadd.f32 %v1689_v52, %v1679_v26 }
 0x149   : > { %v1728_v24 = vrot.slane %v7368_v8, 1  ;;  %v1681_v36 = vadd.f32 %v1665_v28, %v1639_v25  ;;  %v1707_v29 = vmul.f32 %v7068_v51, %v7280_v11  ;;  %v1709_v37 = vmul.f32 %v7068_v51, %v7337_v17 }
 0x14a   : > { %v1683_v46 = vadd.f32 %v1667_v22, %v1641_v50  ;;  %v1721_v13 = vrot.slane %v7296_v44, 1  ;;  %v1747_v23 = vmul.f32 %v7240_v15, %v7277_v3  ;;  %v1749_v16 = vmul.f32 %v7240_v15, %v7280_v11 }
 0x14b   : > { %v1699_v31 = vadd.f32 %v1691_v40, %v1681_v36  ;;  %v1723_v30 = vrot.slane %v1707_v29, 1  ;;  %v1725_v52 = vrot.slane %v1709_v37, 1  ;;  %v1751_v26 = vmul.f32 %v7240_v15, %v7337_v17  ;;  %v5868_v36 = vld [vmem:[%s9736_s5 + $0x84] sm:$0xf0] }
 0x14c   : > { %v1701_v19 = vadd.f32 %v1693_v45, %v1683_v46  ;;  %v1737_v10 = vadd.f32 %v1721_v13, %v1695_v1  ;;  %v1753_v51 = vmul.f32 %v7240_v15, %v7340_v14  ;;  %v1763_v47 = vrot.slane %v1747_v23, 2 }
 0x14d   : > { %v1739_v7 = vadd.f32 %v1723_v30, %v1697_v33  ;;  %v1741_v44 = vadd.f32 %v1725_v52, %v1699_v31  ;;  %v1765_v25 = vrot.slane %v1749_v16, 2  ;;  %v1767_v18 = vrot.slane %v1751_v26, 2  ;;  %v5362_v33 = vld [vmem:[%s9736_s5 + $0x80] sm:$0xf]  ;;  %v5867_v30 = vld [vmem:[%s9736_s5 + $0x84] sm:$0xf] }
 0x14e   : > { %v1743_v3 = vadd.f32 %v1727_v41, %v1701_v19  ;;  %v1769_v49 = vrot.slane %v1753_v51, 2  ;;  %v1779_v56 = vadd.f32 %v1763_v47, %v1737_v10  ;;  %v1789_v43 = vmul.f32 %v7246_v53, %v7280_v11  ;;  %v5364_v52 = vld [vmem:[%s9736_s5 + $0x88] sm:$0xf0] }
 0x14f   : > { %v1781_v28 = vadd.f32 %v1765_v25, %v1739_v7  ;;  %v1783_v22 = vadd.f32 %v1767_v18, %v1741_v44  ;;  %v1791_v45 = vmul.f32 %v7246_v53, %v7337_v17  ;;  %v1793_v50 = vmul.f32 %v7246_v53, %v7340_v14 }
 0x150   : > { %v1785_v15 = vadd.f32 %v1769_v49, %v1743_v3  ;;  %v1797_v40 = vadd.f32 %v1789_v43, %v1779_v56  ;;  %v1807_v1 = vmul.f32 %v7249_v54, %v7280_v11  ;;  %v1809_v41 = vmul.f32 %v7249_v54, %v7337_v17 }
 0x151   : > { %v1799_v29 = vadd.f32 %v1791_v45, %v1781_v28  ;;  %v1801_v37 = vadd.f32 %v1793_v50, %v1783_v22  ;;  %v1811_v53 = vmul.f32 %v7249_v54, %v7340_v14  ;;  %v1849_v46 = vmul.f32 %v7254_v55, %v7280_v11 }
 0x152   : > { %v1803_v13 = vadd.f32 %v7260_v61, %v1785_v15  ;;  %v1823_v23 = vrot.slane %v1807_v1, 1  ;;  %v1825_v16 = vrot.slane %v1809_v41, 1  ;;  %v1851_v31 = vmul.f32 %v7254_v55, %v7337_v17 }
 0x153   : > { %v1827_v26 = vrot.slane %v1811_v53, 1  ;;  %v1853_v54 = vmul.f32 %v7254_v55, %v7340_v14  ;;  %v1865_v11 = vrot.slane %v1849_v46, 2  ;;  %v5363_v19 = vor.u32 %v5868_v36, %v5362_v33 }
 0x154   : > { %v1839_v61 = vadd.f32 %v1823_v23, %v1797_v40  ;;  %v1841_v10 = vadd.f32 %v1825_v16, %v1799_v29  ;;  %v1845_v51 = vadd.f32 %v1829_v21, %v1803_v13  ;;  %v1867_v17 = vrot.slane %v1851_v31, 2 }
 0x155   : > { %v1843_v47 = vadd.f32 %v1827_v26, %v1801_v37  ;;  %v1869_v7 = vrot.slane %v1853_v54, 2  ;;  %2120 = vmatpush.bf16.msrb.mxu1 %v5363_v19  ;;  %v5367_v44 = vor.u32 %v5867_v30, %v5364_v52  ;;  %v1590_v25 = vmul.f32 %v7090_v57, %v7316_v62 }
 0x156   : > { %v1881_v18 = vadd.f32 %v1865_v11, %v1839_v61  ;;  %v1883_v3 = vadd.f32 %v1867_v17, %v1841_v10  ;;  %v1887_v55 = vadd.f32 %v1871_v9, %v1845_v51  ;;  %v1592_v14 = vmul.f32 %v7090_v57, %v7357_v59 }
 0x157   : > { %v1885_v49 = vadd.f32 %v1869_v7, %v1843_v47  ;;  %2148 = vmatpush.bf16.msrb.mxu3 %v5367_v44  ;;  %v1608_v4 = vmul.f32 %v7071_v32, %v7316_v62  ;;  %v1610_v21 = vmul.f32 %v7071_v32, %v7357_v59  ;;  %v1620_v56 = vrot.slane %v7231_v5, 1 }
 0x158   : > { %v1891_v43 = vrot.slane %v1883_v3, 4  ;;  %v1897_v28 = vrot.slane %v1887_v55, 4  ;;  %v1646_v22 = vmul.f32 %v7093_v48, %v7007_v6  ;;  %v1650_v60 = vmul.f32 %v7093_v48, %v7316_v62 }
 0x159   : > { %v1624_v9 = vrot.slane %v1608_v4, 1  ;;  %v1626_v57 = vrot.slane %v1610_v21, 1  ;;  %v1636_v45 = vadd.f32 %v1620_v56, %v7218_v12  ;;  %v1652_v50 = vmul.f32 %v7093_v48, %v7357_v59 }
 0x15a   : > { %v1901_v15 = vsel %vm1257_vm5, %v1881_v18, %v1891_v43  ;;  %v1903_v32 = vsel %vm1257_vm5, %v1885_v49, %v1897_v28  ;;  %v1662_v5 = vrot.slane %v1646_v22, 2  ;;  %v1666_v40 = vrot.slane %v1650_v60, 2 }
 0x15b   : > { %v1905_v1 = vpack.c.bf16 %v1903_v32, %v1901_v15  ;;  %v1640_v41 = vadd.f32 %v1624_v9, %v1590_v25  ;;  %v1642_v33 = vadd.f32 %v1626_v57, %v1592_v14  ;;  %v1668_v36 = vrot.slane %v1652_v50, 2 }
 0x15c   : > { %v1678_v29 = vadd.f32 %v1662_v5, %v1636_v45  ;;  %v1690_v37 = vmul.f32 %v7109_v63, %v7316_v62  ;;  %v1692_v12 = vmul.f32 %v7109_v63, %v7357_v59  ;;  %v1708_v48 = vmul.f32 %v7112_v0, %v7316_v62 }
 0x15d   : > { %2107 = vmatmul.bf16.vlgmr.msrb.gmra.mxu0 %v1905_v1  ;;  %2135 = vmatmul.bf16.vlgmr.msrb.gmra.mxu2 %v1905_v1  ;;  %v1682_v53 = vadd.f32 %v1666_v40, %v1640_v41  ;;  %v1684_v46 = vadd.f32 %v1668_v36, %v1642_v33  ;;  %v1710_v13 = vmul.f32 %v7112_v0, %v7357_v59  ;;  %v1722_v23 = vrot.slane %v7332_v20, 1 }
 0x15e   : > { %v1696_v16 = vadd.f32 %v7328_v2, %v1678_v29  ;;  %v1698_v31 = vadd.f32 %v1690_v37, %v7354_v58  ;;  %v1724_v30 = vrot.slane %v1708_v48, 1  ;;  %v1746_v52 = vperm.slane %v7030_v34, 5 }
 0x15f   : > { %v1700_v63 = vadd.f32 %v1692_v12, %v1682_v53  ;;  %v1702_v26 = vadd.f32 %v7364_v42, %v1684_v46  ;;  %v1726_v54 = vrot.slane %v1710_v13, 1  ;;  %v1788_v11 = vperm.slane %v7030_v34, 6 }
 0x160   : > { %v1738_v19 = vadd.f32 %v1722_v23, %v1696_v16  ;;  %v1740_v61 = vadd.f32 %v1724_v30, %v1698_v31  ;;  %v1748_v10 = vmul.f32 %v1746_v52, %v7313_v35  ;;  %v1750_v0 = vmul.f32 %v1746_v52, %v7316_v62  ;;  %v6022_v35 = vld [vmem:[%s9735_s4 + $0x18] ss:$0 sm:$0xff] }
 0x161   : > { %v1742_v20 = vadd.f32 %v1726_v54, %v1700_v63  ;;  %v1744_v2 = vadd.f32 %v1728_v24, %v1702_v26  ;;  %v1752_v58 = vmul.f32 %v1746_v52, %v7357_v59  ;;  %v1754_v51 = vmul.f32 %v1746_v52, %v7360_v27  ;;  %v7487_v63 = vld [vmem:[%s9737_s6 + $0x1] ss:$2 sm:$0x3] }
 0x162   : > { %v1764_v17 = vrot.slane %v1748_v10, 2  ;;  %v1766_v47 = vrot.slane %v1750_v0, 2  ;;  %v1790_v44 = vmul.f32 %v1788_v11, %v7316_v62  ;;  %v1796_v25 = vmul.f32 %v1788_v11, %v7007_v6  ;;  %9797 = vst [vmem:[#allocation15_spill] sm:$0xff] %v7487_v63  ;;  %v5425_v0 = vld [vmem:[%s9738_s7 + $0x1] ss:$2 sm:$0x3] }
 0x163   : > { %v1768_v42 = vrot.slane %v1752_v58, 2  ;;  %v1770_v7 = vrot.slane %v1754_v51, 2  ;;  %v1792_v8 = vmul.f32 %v1788_v11, %v7357_v59  ;;  %v1806_v24 = vperm.slane %v7030_v34, 7 }
 0x164   : > { %v1780_v18 = vadd.f32 %v1764_v17, %v1738_v19  ;;  %v1782_v3 = vadd.f32 %v1766_v47, %v1740_v61  ;;  %v1794_v49 = vmul.f32 %v1788_v11, %v7360_v27  ;;  %v1852_v4 = vmul.f32 %v6022_v35, %v7357_v59  ;;  %v2192_v61 = vld [vmem:[%s9738_s7] ss:$2 sm:$0x3] }
 0x165   : > { %v1784_v55 = vadd.f32 %v1768_v42, %v1742_v20  ;;  %v1786_v14 = vadd.f32 %v1770_v7, %v1744_v2  ;;  %v1808_v43 = vmul.f32 %v1806_v24, %v7316_v62  ;;  %v1810_v28 = vmul.f32 %v1806_v24, %v7357_v59 }
 0x166   : > { %v1798_v21 = vadd.f32 %v1790_v44, %v1780_v18  ;;  %v1800_v56 = vadd.f32 %v1792_v8, %v1782_v3  ;;  %v1812_v9 = vmul.f32 %v1806_v24, %v7360_v27  ;;  %v1814_v57 = vmul.f32 %v1806_v24, %v7007_v6 }
 0x167   : > { %v1802_v22 = vadd.f32 %v1794_v49, %v1784_v55  ;;  %v1804_v60 = vadd.f32 %v1796_v25, %v1786_v14  ;;  %v1826_v45 = vrot.slane %v1810_v28, 1  ;;  %v1850_v34 = vmul.f32 %v6022_v35, %v7316_v62 }
 0x168   : > { %v1856_v50 = vmul.f32 %v6022_v35, %v7007_v6  ;;  %v1824_v15 = vrot.slane %v1808_v43, 1  ;;  %v1828_v32 = vrot.slane %v1812_v9, 1  ;;  %v1830_v5 = vrot.slane %v1814_v57, 1 }
 0x169   : > { %v1854_v40 = vmul.f32 %v6022_v35, %v7360_v27  ;;  %v1842_v1 = vadd.f32 %v1826_v45, %v1800_v56  ;;  %v1868_v41 = vrot.slane %v1852_v4, 2  ;;  %v1866_v12 = vrot.slane %v1850_v34, 2  ;;  %v7482_v27 = vld [vmem:[%s9737_s6] ss:$2 sm:$0x3] }
 0x16a   : > { %v1872_v33 = vrot.slane %v1856_v50, 2  ;;  %v1840_v59 = vadd.f32 %v1824_v15, %v1798_v21  ;;  %v1844_v36 = vadd.f32 %v1828_v32, %v1802_v22  ;;  %v1846_v29 = vadd.f32 %v1830_v5, %v1804_v60  ;;  %9796 = vst [vmem:[#allocation14_spill] sm:$0xff] %v7482_v27 }
 0x16b   : > { %v1884_v37 = vadd.f32 %v1868_v41, %v1842_v1  ;;  %v1870_v48 = vrot.slane %v1854_v40, 2  ;;  %v2157_v26 = vperm.slane %v7482_v27, 0  ;;  %v2168_v19 = vperm.slane %v7487_v63, 0 }
 0x16c   : > { %v1888_v53 = vadd.f32 %v1872_v33, %v1846_v29  ;;  %v1882_v13 = vadd.f32 %v1866_v12, %v1840_v59  ;;  %v2194_v2 = vperm.slane %v2192_v61, 0  ;;  %v9757_v58 = vperm.slane %v7482_v27, 1 }
 0x16d   : > { %v1892_v46 = vrot.slane %v1884_v37, 4  ;;  %v1886_v62 = vadd.f32 %v1870_v48, %v1844_v36  ;;  %v2209_v42 = vperm.slane %v5425_v0, 0  ;;  %v9756_v44 = vperm.slane %v7487_v63, 1 }
 0x16e   : > { %v1898_v23 = vrot.slane %v1888_v53, 4  ;;  %v7503_v21 = vperm.slane %v2192_v61, 1  ;;  %v7505_v22 = vperm.slane %v5425_v0, 1 }
 0x16f   : > { %v1902_v16 = vsel %vm1257_vm5, %v1882_v13, %v1892_v46 }
 0x170   : > { %v1904_v31 = vsel %vm1257_vm5, %v1886_v62, %v1898_v23  ;;  %9798 = vst [vmem:[#allocation16_spill] sm:$0xff] %v7503_v21 }
 0x171   : > { %v1906_v30 = vpack.c.bf16 %v1904_v31, %v1902_v16  ;;  %9799 = vst [vmem:[#allocation17_spill] sm:$0xff] %v7505_v22 }
 0x173   : > { %2121 = vmatmul.bf16.vlgmr.msrb.gmra.mxu1 %v1906_v30  ;;  %2149 = vmatmul.bf16.vlgmr.msrb.gmra.mxu3 %v1906_v30 }
 0x1da   : > { %v2108_v52 = vpop.f32.mrf.mxu0 }
 0x1e0   : > { %v2136_v51 = vpop.f32.mrf.mxu2 }
 0x1e2   : > { %v2110_v25 = vpop.f32.mrf.mxu0 }
 0x1f0   : > { %v2122_v54 = vpop.f32.mrf.mxu1 }
 0x1f1   : > { %v2123_v11 = vadd.f32 %v2122_v54, %v2108_v52 }
 0x1f3   : > { %v2161_v10 = vmul.f32 %v2157_v26, %v2123_v11 }
 0x1f5   : > { %v2172_v20 = vadd.f32 %v2168_v19, %v2161_v10 }
 0x1f6   : > { %v2150_v17 = vpop.f32.mrf.mxu3 }
 0x1f7   : > { %v2176_v47 = vmax.f32 %v2172_v20, 0.0  ;;  %v2151_v7 = vadd.f32 %v2150_v17, %v2136_v51 }
 0x1f8   : > { %v2124_v35 = vpop.f32.mrf.mxu1 }
 0x1f9   : > { %v2182_v18 = vrot.slane %v2176_v47, 4  ;;  %v2198_v3 = vmul.f32 %v2194_v2, %v2176_v47  ;;  %v2162_v8 = vmul.f32 %v9757_v58, %v2151_v7  ;;  %v2125_v24 = vadd.f32 %v2124_v35, %v2110_v25 }
 0x1fb   : > { %v2200_v55 = vmul.f32 %v2194_v2, %v2182_v18  ;;  %v2213_v14 = vadd.f32 %v2209_v42, %v2198_v3  ;;  %v2173_v49 = vadd.f32 %v9756_v44, %v2162_v8  ;;  %v2163_v4 = vmul.f32 %v2157_v26, %v2125_v24 }
 0x1fd   : > { %v2215_v56 = vadd.f32 %v2209_v42, %v2200_v55  ;;  %v2177_v43 = vmax.f32 %v2173_v49, 0.0  ;;  %v2174_v28 = vadd.f32 %v2168_v19, %v2163_v4  ;;  %v2221_v60 = vmax.f32 %v2213_v14, 0.0 }
 0x1ff   : > { %v2223_v9 = vmax.f32 %v2215_v56, 0.0  ;;  %v2183_v57 = vrot.slane %v2177_v43, 4  ;;  %v2199_v45 = vmul.f32 %v7503_v21, %v2177_v43  ;;  %v2178_v34 = vmax.f32 %v2174_v28, 0.0 }
 0x200   : > { %v2233_v59 = vmul.f32 0.75, %v2221_v60  ;;  %v2239_v29 = vmul.f32 0.25, %v2221_v60 }
 0x201   : > { %v2229_v50 = vmul.f32 0.0, %v2223_v9  ;;  %v2201_v15 = vmul.f32 %v7503_v21, %v2183_v57  ;;  %v2235_v32 = vmul.f32 0.25, %v2223_v9  ;;  %v2214_v5 = vadd.f32 %v7505_v22, %v2199_v45 }
 0x202   : > { %v2188_v40 = vrot.slane %v2178_v34, 4  ;;  %v2202_v1 = vmul.f32 %v2194_v2, %v2178_v34  ;;  %v2241_v41 = vmul.f32 0.75, %v2223_v9 }
 0x203   : > { %v2231_v33 = vadd.f32 %v2229_v50, %v2221_v60  ;;  %v2216_v36 = vadd.f32 %v7505_v22, %v2201_v15  ;;  %v7511_v37 = vmax.f32 %v2214_v5, 0.0  ;;  %v7515_v31 = vadd.f32 %v2235_v32, %v2233_v59 }
 0x204   : > { %v2204_v12 = vmul.f32 %v2194_v2, %v2188_v40  ;;  %v2217_v48 = vadd.f32 %v2209_v42, %v2202_v1  ;;  %v7517_v30 = vadd.f32 %v2241_v41, %v2239_v29 }
 0x205   : > { %9800 = vst [vmem:[#allocation18_spill] sm:$0xff] %v7511_v37  ;;  %v2263_v53 = vmul.f32 0.0, %v2231_v33  ;;  %v2343_v46 = vmul.f32 0.75, %v2231_v33  ;;  %v2359_v13 = vmul.f32 0.25, %v2231_v33  ;;  %v7513_v62 = vmax.f32 %v2216_v36, 0.0 }
 0x206   : > { %v2219_v23 = vadd.f32 %v2209_v42, %v2204_v12  ;;  %v2225_v16 = vmax.f32 %v2217_v48, 0.0  ;;  %v7521_v17 = vmul.f32 0.75, %v7511_v37 }
 0x207   : > { %9801 = vst [vmem:[#allocation19_spill] sm:$0xff] %v7513_v62  ;;  %v2295_v52 = vrot.slane %v2263_v53, 1  ;;  %v2391_v26 = vrot.slane %v2359_v13, 1  ;;  %v2455_v54 = vrot.slane %v2343_v46, 1  ;;  %v2503_v11 = vadd.f32 %v2359_v13, %v2343_v46 }
 0x208   : > { %v2230_v19 = vmul.f32 0.0, %v7513_v62  ;;  %v2227_v61 = vmax.f32 %v2219_v23, 0.0  ;;  %v2245_v10 = vmul.f32 0.25, %v2225_v16  ;;  %v2249_v0 = vmul.f32 0.75, %v2225_v16  ;;  %9802 = vst [vmem:[#allocation20_spill] sm:$0xff] %v7521_v17 }
 0x209   : > { %v2327_v20 = vadd.f32 %v2295_v52, %v2231_v33  ;;  %v2423_v2 = vadd.f32 %v2391_v26, %v2343_v46  ;;  %v2487_v51 = vadd.f32 %v2455_v54, %v2359_v13  ;;  %v2759_v47 = vrot.slane %v2503_v11, 4 }
 0x20a   : > { %v2232_v42 = vadd.f32 %v2230_v19, %v7511_v37  ;;  %v7524_v7 = vadd.f32 %v2245_v10, %v2241_v41  ;;  %v2253_v25 = vmul.f32 0.25, %v2227_v61  ;;  %v7526_v8 = vadd.f32 %v2249_v0, %v2235_v32 }
 0x20b   : > { %v2535_v35 = vrot.slane %v2423_v2, 7  ;;  %v2583_v18 = vrot.slane %v2487_v51, 6  ;;  %v2615_v3 = vrot.slane %v2423_v2, 6  ;;  %v2647_v24 = vrot.slane %v2487_v51, 5 }
 0x20c   : > { %v2679_v55 = vrot.slane %v2423_v2, 5  ;;  %v2264_v14 = vmul.f32 0.0, %v2232_v42  ;;  %v2344_v49 = vmul.f32 0.75, %v2232_v42  ;;  %v2711_v4 = vrot.slane %v2487_v51, 4 }
 0x20d   : > { %v2791_v56 = vsel %vm628_vm0, %v2327_v20, %v2535_v35  ;;  %v2360_v43 = vmul.f32 0.25, %v2232_v42  ;;  %v2257_v28 = vmul.f32 0.75, %v2227_v61  ;;  %v7530_v45 = vadd.f32 %v2253_v25, %v2249_v0 }
 0x20e   : > { %v2807_v60 = vsel %vm1227_vm3, %v2791_v56, %v2583_v18  ;;  %v2296_v9 = vrot.slane %v2264_v14, 1  ;;  %v2456_v57 = vrot.slane %v2344_v49, 1  ;;  %v2265_v32 = vmul.f32 0.0, %v7515_v31 }
 0x20f   : > { %v2823_v34 = vsel %vm1236_vm4, %v2807_v60, %v2615_v3  ;;  %v2392_v50 = vrot.slane %v2360_v43, 1  ;;  %v2504_v15 = vadd.f32 %v2360_v43, %v2344_v49  ;;  %v2259_v41 = vadd.f32 %v2257_v28, %v2245_v10 }
 0x210   : > { %v2839_v5 = vsel %vm1257_vm5, %v2823_v34, %v2647_v24  ;;  %v2328_v40 = vadd.f32 %v2296_v9, %v2232_v42  ;;  %v2488_v1 = vadd.f32 %v2456_v57, %v2360_v43  ;;  %v2261_v29 = vadd.f32 %v2257_v28, %v2253_v25 }
 0x211   : > { %v2855_v33 = vsel %vm1573_vm6, %v2839_v5, %v2679_v55  ;;  %v2424_v59 = vadd.f32 %v2392_v50, %v2344_v49  ;;  %v2760_v36 = vrot.slane %v2504_v15, 4  ;;  %v2267_v46 = vmul.f32 0.0, %v7517_v30 }
 0x212   : > { %v2871_v12 = vsel %vm790_vm2, %v2855_v33, %v2711_v4  ;;  %v2584_v48 = vrot.slane %v2488_v1, 6  ;;  %v2648_v53 = vrot.slane %v2488_v1, 5  ;;  %v2269_v54 = vmul.f32 0.0, %v7524_v7 }
 0x213   : > { %v2887_v13 = vsel %vm715_vm1, %v2871_v12, %v2759_v47  ;;  %v2536_v23 = vrot.slane %v2424_v59, 7  ;;  %v2616_v16 = vrot.slane %v2424_v59, 6  ;;  %v2680_v52 = vrot.slane %v2424_v59, 5 }
 0x214   : > { %v2903_v26 = vsub.f32 0.0, %v2887_v13  ;;  %v2271_v11 = vmul.f32 0.0, %v7526_v8  ;;  %v2273_v19 = vmul.f32 0.0, %v7530_v45  ;;  %v2275_v10 = vmul.f32 0.0, %v2259_v41 }
 0x215   : > { %v2792_v61 = vsel %vm628_vm0, %v2328_v40, %v2536_v23  ;;  %v2277_v0 = vmul.f32 0.0, %v2261_v29  ;;  %v2297_v20 = vrot.slane %v2265_v32, 1  ;;  %v2299_v42 = vrot.slane %v2267_v46, 1 }
 0x216   : > { %v2919_v2 = vmul.f32 1.442695, %v2903_v26  ;;  %v2808_v51 = vsel %vm1227_vm3, %v2792_v61, %v2584_v48  ;;  %v2301_v47 = vrot.slane %v2269_v54, 1  ;;  %v2303_v35 = vrot.slane %v2271_v11, 1 }
 0x217   : > { %v2824_v25 = vsel %vm1236_vm4, %v2808_v51, %v2616_v16  ;;  %v2305_v18 = vrot.slane %v2273_v19, 1  ;;  %v2307_v3 = vrot.slane %v2275_v10, 1  ;;  %v2712_v24 = vrot.slane %v2488_v1, 4 }
 0x218   : > { %6027 = vpow2.f32 %v2919_v2  ;;  %v2840_v55 = vsel %vm1257_vm5, %v2824_v25, %v2648_v53  ;;  %v2309_v14 = vrot.slane %v2277_v0, 1  ;;  %v7548_v4 = vadd.f32 %v2297_v20, %v7515_v31 }
 0x219   : > { %v2856_v49 = vsel %vm1573_vm6, %v2840_v55, %v2680_v52  ;;  %v7551_v56 = vadd.f32 %v2299_v42, %v7517_v30  ;;  %v7554_v43 = vadd.f32 %v2301_v47, %v7524_v7  ;;  %v7558_v60 = vadd.f32 %v2303_v35, %v7526_v8 }
 0x21a   : > { %v2872_v28 = vsel %vm790_vm2, %v2856_v49, %v2712_v24  ;;  %v7561_v9 = vadd.f32 %v2305_v18, %v7530_v45  ;;  %v7563_v57 = vadd.f32 %v2307_v3, %v2259_v41  ;;  %v7566_v50 = vadd.f32 %v2309_v14, %v2261_v29 }
 0x21b   : > { %v2888_v34 = vsel %vm715_vm1, %v2872_v28, %v2760_v36  ;;  %v2345_v15 = vmul.f32 0.75, %v7515_v31  ;;  %v2347_v32 = vmul.f32 0.75, %v7517_v30  ;;  %v2349_v40 = vmul.f32 0.75, %v7524_v7 }
 0x21c   : > { %9803 = vst [vmem:[#allocation21_spill] sm:$0xff] %v7563_v57  ;;  %v2904_v5 = vsub.f32 0.0, %v2888_v34  ;;  %v2351_v1 = vmul.f32 0.75, %v7526_v8  ;;  %v2353_v33 = vmul.f32 0.75, %v7530_v45  ;;  %v2355_v59 = vmul.f32 0.75, %v2259_v41 }
 0x21d   : > { %9804 = vst [vmem:[#allocation22_spill] sm:$0xff] %v7566_v50  ;;  %v2361_v12 = vmul.f32 0.25, %v7515_v31  ;;  %v2363_v48 = vmul.f32 0.25, %v7517_v30  ;;  %v2365_v36 = vmul.f32 0.25, %v7524_v7  ;;  %v2367_v13 = vmul.f32 0.25, %v7526_v8 }
 0x21e   : > { %v6028_v53 = vpop.eup %6027  ;;  %v2921_v46 = vmul.f32 1.442695, %v2904_v5  ;;  %v2369_v23 = vmul.f32 0.25, %v7530_v45  ;;  %v2371_v16 = vmul.f32 0.25, %v2259_v41  ;;  %v2373_v26 = vmul.f32 0.25, %v2261_v29 }
 0x21f   : > { %v2951_v52 = vadd.f32 1.0, %v6028_v53  ;;  %v2393_v54 = vrot.slane %v2361_v12, 1  ;;  %v2395_v11 = vrot.slane %v2363_v48, 1  ;;  %v2397_v19 = vrot.slane %v2365_v36, 1 }
 0x220   : > { %6029 = vpow2.f32 %v2921_v46  ;;  %v2399_v61 = vrot.slane %v2367_v13, 1  ;;  %v2401_v10 = vrot.slane %v2369_v23, 1  ;;  %v2357_v31 = vmul.f32 0.75, %v2261_v29 }
 0x221   : > { %6031 = vrcp.f32 %v2951_v52  ;;  %v2403_v30 = vrot.slane %v2371_v16, 1  ;;  %v2405_v0 = vrot.slane %v2373_v26, 1  ;;  %v7578_v7 = vadd.f32 %v2393_v54, %v2345_v15 }
 0x222   : > { %v7580_v20 = vadd.f32 %v2395_v11, %v2347_v32  ;;  %v7582_v8 = vadd.f32 %v2397_v19, %v2349_v40  ;;  %v7584_v45 = vadd.f32 %v2399_v61, %v2351_v1  ;;  %v7586_v41 = vadd.f32 %v2401_v10, %v2353_v33 }
 0x223   : > { %v7588_v2 = vadd.f32 %v2403_v30, %v2355_v59  ;;  %v2457_v51 = vrot.slane %v2345_v15, 1  ;;  %v2459_v42 = vrot.slane %v2347_v32, 1  ;;  %v2461_v47 = vrot.slane %v2349_v40, 1 }
 0x224   : > { %v2463_v25 = vrot.slane %v2351_v1, 1  ;;  %v2465_v35 = vrot.slane %v2353_v33, 1  ;;  %v2467_v29 = vrot.slane %v2355_v59, 1  ;;  %v7590_v18 = vadd.f32 %v2405_v0, %v2357_v31 }
 0x225   : > { %v2469_v3 = vrot.slane %v2357_v31, 1  ;;  %v7592_v24 = vadd.f32 %v2457_v51, %v2361_v12  ;;  %v7594_v55 = vadd.f32 %v2459_v42, %v2363_v48  ;;  %v7596_v49 = vadd.f32 %v2461_v47, %v2365_v36 }
 0x226   : > { %v6030_v14 = vpop.eup %6029  ;;  %v7598_v28 = vadd.f32 %v2463_v25, %v2367_v13  ;;  %v7600_v34 = vadd.f32 %v2465_v35, %v2369_v23  ;;  %v7602_v5 = vadd.f32 %v2361_v12, %v2345_v15  ;;  %v7608_v52 = vadd.f32 %v2467_v29, %v2371_v16 }
 0x227   : > { %v7604_v53 = vpop.eup %6031  ;;  %v7606_v46 = vadd.f32 1.0, %v6030_v14  ;;  %v7610_v54 = vadd.f32 %v2469_v3, %v2373_v26  ;;  %v7612_v11 = vadd.f32 %v2363_v48, %v2347_v32  ;;  %v7614_v19 = vadd.f32 %v2365_v36, %v2349_v40 }
 0x228   : > { %9805 = vst [vmem:[#allocation23_spill] sm:$0xff] %v7604_v53  ;;  %v7616_v61 = vadd.f32 %v2367_v13, %v2351_v1  ;;  %v7618_v10 = vadd.f32 %v2369_v23, %v2353_v33  ;;  %v7620_v30 = vadd.f32 %v2371_v16, %v2355_v59  ;;  %v7622_v15 = vadd.f32 %v2373_v26, %v2357_v31 }
 0x229   : > { %9806 = vst [vmem:[#allocation24_spill] sm:$0xff] %v7606_v46  ;;  %v2537_v12 = vrot.slane %v7578_v7, 7  ;;  %v2539_v0 = vrot.slane %v7580_v20, 7  ;;  %v2541_v51 = vrot.slane %v7582_v8, 7  ;;  %v2543_v42 = vrot.slane %v7584_v45, 7 }
 0x22a   : > { %v2545_v32 = vrot.slane %v7586_v41, 7  ;;  %v2547_v40 = vrot.slane %v7588_v2, 7  ;;  %v2549_v1 = vrot.slane %v7590_v18, 7  ;;  %v2585_v33 = vrot.slane %v7592_v24, 6 }
 0x22b   : > { %v2587_v59 = vrot.slane %v7594_v55, 6  ;;  %v2589_v48 = vrot.slane %v7596_v49, 6  ;;  %v2591_v36 = vrot.slane %v7598_v28, 6  ;;  %v2593_v13 = vrot.slane %v7600_v34, 6 }
 0x22c   : > { %v2595_v23 = vrot.slane %v7608_v52, 6  ;;  %v2597_v16 = vrot.slane %v7610_v54, 6  ;;  %v2617_v26 = vrot.slane %v7578_v7, 6  ;;  %v2619_v31 = vrot.slane %v7580_v20, 6 }
 0x22d   : > { %v2621_v47 = vrot.slane %v7582_v8, 6  ;;  %v2623_v25 = vrot.slane %v7584_v45, 6  ;;  %v2625_v35 = vrot.slane %v7586_v41, 6  ;;  %v2627_v29 = vrot.slane %v7588_v2, 6 }
 0x22e   : > { %v2629_v3 = vrot.slane %v7590_v18, 6  ;;  %v2649_v14 = vrot.slane %v7592_v24, 5  ;;  %v2651_v44 = vrot.slane %v7594_v55, 5  ;;  %v2653_v58 = vrot.slane %v7596_v49, 5 }
 0x22f   : > { %v2655_v6 = vrot.slane %v7598_v28, 5  ;;  %v2657_v39 = vrot.slane %v7600_v34, 5  ;;  %v2659_v38 = vrot.slane %v7608_v52, 5  ;;  %v2661_v53 = vrot.slane %v7610_v54, 5 }
 0x230   : > { %v2681_v22 = vrot.slane %v7578_v7, 5  ;;  %v2683_v21 = vrot.slane %v7580_v20, 5  ;;  %v2685_v17 = vrot.slane %v7582_v8, 5  ;;  %v2687_v63 = vrot.slane %v7584_v45, 5 }
 0x231   : > { %v2689_v62 = vrot.slane %v7586_v41, 5  ;;  %v2691_v27 = vrot.slane %v7588_v2, 5  ;;  %v2693_v37 = vrot.slane %v7590_v18, 5  ;;  %v2713_v46 = vrot.slane %v7592_v24, 4 }
 0x232   : > { %v2715_v50 = vrot.slane %v7594_v55, 4  ;;  %v2717_v57 = vrot.slane %v7596_v49, 4  ;;  %v2719_v7 = vrot.slane %v7598_v28, 4  ;;  %v2721_v20 = vrot.slane %v7600_v34, 4 }
 0x233   : > { %v2723_v8 = vrot.slane %v7608_v52, 4  ;;  %v2725_v45 = vrot.slane %v7610_v54, 4  ;;  %v2761_v41 = vrot.slane %v7602_v5, 4  ;;  %v2763_v2 = vrot.slane %v7612_v11, 4 }
 0x234   : > { %v2765_v18 = vrot.slane %v7614_v19, 4  ;;  %v2767_v24 = vrot.slane %v7616_v61, 4  ;;  %v2769_v55 = vrot.slane %v7618_v10, 4  ;;  %v2771_v49 = vrot.slane %v7620_v30, 4  ;;  %v9807_v19 = vld [vmem:[#allocation21_spill] sm:$0xff]  ;;  %v9808_v10 = vld [vmem:[#allocation22_spill] sm:$0xff] }
 0x235   : > { %v2773_v28 = vrot.slane %v7622_v15, 4  ;;  %v2793_v34 = vsel %vm628_vm0, %v7548_v4, %v2537_v12  ;;  %v2795_v52 = vsel %vm628_vm0, %v7551_v56, %v2539_v0  ;;  %v2797_v5 = vsel %vm628_vm0, %v7554_v43, %v2541_v51 }
 0x236   : > { %v2799_v54 = vsel %vm628_vm0, %v7558_v60, %v2543_v42  ;;  %v2801_v11 = vsel %vm628_vm0, %v7561_v9, %v2545_v32  ;;  %v2803_v61 = vsel %vm628_vm0, %v9807_v19, %v2547_v40  ;;  %v2805_v30 = vsel %vm628_vm0, %v9808_v10, %v2549_v1 }
 0x237   : > { %v2809_v4 = vsel %vm1227_vm3, %v2793_v34, %v2585_v33  ;;  %v2811_v15 = vsel %vm1227_vm3, %v2795_v52, %v2587_v59  ;;  %v2813_v56 = vsel %vm1227_vm3, %v2797_v5, %v2589_v48  ;;  %v2815_v43 = vsel %vm1227_vm3, %v2799_v54, %v2591_v36  ;;  %v2138_v34 = vpop.f32.mrf.mxu2 }
 0x238   : > { %v2817_v12 = vsel %vm1227_vm3, %v2801_v11, %v2593_v13  ;;  %v2819_v60 = vsel %vm1227_vm3, %v2803_v61, %v2595_v23  ;;  %v2821_v9 = vsel %vm1227_vm3, %v2805_v30, %v2597_v16  ;;  %v2825_v0 = vsel %vm1236_vm4, %v2809_v4, %v2617_v26  ;;  %v9811_v61 = vld [vmem:[#allocation14_spill] sm:$0xff]  ;;  %v9813_v4 = vld [vmem:[#allocation19_spill] sm:$0xff] }
 0x239   : > { %v2827_v51 = vsel %vm1236_vm4, %v2811_v15, %v2619_v31  ;;  %v2829_v42 = vsel %vm1236_vm4, %v2813_v56, %v2621_v47  ;;  %v2831_v32 = vsel %vm1236_vm4, %v2815_v43, %v2623_v25  ;;  %v2833_v40 = vsel %vm1236_vm4, %v2817_v12, %v2625_v35  ;;  %v9814_v12 = vld [vmem:[#allocation15_spill] sm:$0xff] }
 0x23a   : > { %v2835_v1 = vsel %vm1236_vm4, %v2819_v60, %v2627_v29  ;;  %v2837_v33 = vsel %vm1236_vm4, %v2821_v9, %v2629_v3  ;;  %v2841_v59 = vsel %vm1257_vm5, %v2825_v0, %v2649_v14  ;;  %v2843_v48 = vsel %vm1257_vm5, %v2827_v51, %v2651_v44  ;;  %v2152_v29 = vpop.f32.mrf.mxu3  ;;  %v9816_v0 = vld [vmem:[#allocation20_spill] sm:$0xff] }
 0x23b   : > { %v2845_v36 = vsel %vm1257_vm5, %v2829_v42, %v2653_v58  ;;  %v2847_v13 = vsel %vm1257_vm5, %v2831_v32, %v2655_v6  ;;  %v2849_v23 = vsel %vm1257_vm5, %v2833_v40, %v2657_v39  ;;  %v2851_v16 = vsel %vm1257_vm5, %v2835_v1, %v2659_v38 }
 0x23c   : > { %v2853_v26 = vsel %vm1257_vm5, %v2837_v33, %v2661_v53  ;;  %v2857_v31 = vsel %vm1573_vm6, %v2841_v59, %v2681_v22  ;;  %v2859_v47 = vsel %vm1573_vm6, %v2843_v48, %v2683_v21  ;;  %v2861_v25 = vsel %vm1573_vm6, %v2845_v36, %v2685_v17 }
 0x23d   : > { %v2863_v35 = vsel %vm1573_vm6, %v2847_v13, %v2687_v63  ;;  %v2865_v44 = vsel %vm1573_vm6, %v2849_v23, %v2689_v62  ;;  %v2867_v58 = vsel %vm1573_vm6, %v2851_v16, %v2691_v27  ;;  %v2869_v6 = vsel %vm1573_vm6, %v2853_v26, %v2693_v37 }
 0x23e   : > { %v2873_v39 = vsel %vm790_vm2, %v2857_v31, %v2713_v46  ;;  %v2875_v38 = vsel %vm790_vm2, %v2859_v47, %v2715_v50  ;;  %v2877_v53 = vsel %vm790_vm2, %v2861_v25, %v2717_v57  ;;  %v2879_v22 = vsel %vm790_vm2, %v2863_v35, %v2719_v7  ;;  %v9818_v31 = vld [vmem:[#allocation16_spill] sm:$0xff] }
 0x23f   : > { %v2881_v21 = vsel %vm790_vm2, %v2865_v44, %v2721_v20  ;;  %v2883_v17 = vsel %vm790_vm2, %v2867_v58, %v2723_v8  ;;  %v2885_v63 = vsel %vm790_vm2, %v2869_v6, %v2725_v45  ;;  %v2889_v62 = vsel %vm715_vm1, %v2873_v39, %v2761_v41 }
 0x240   : > { %v2891_v27 = vsel %vm715_vm1, %v2875_v38, %v2763_v2  ;;  %v2893_v37 = vsel %vm715_vm1, %v2877_v53, %v2765_v18  ;;  %v2895_v46 = vsel %vm715_vm1, %v2879_v22, %v2767_v24  ;;  %v2897_v50 = vsel %vm715_vm1, %v2881_v21, %v2769_v55  ;;  %v9809_v18 = vld [vmem:[#allocation24_spill] sm:$0xff]  ;;  %v9810_v55 = vld [vmem:[#allocation18_spill] sm:$0xff]  ;;  %v9819_v21 = vld [vmem:[#allocation17_spill] sm:$0xff] }
 0x241   : > { %v2899_v57 = vsel %vm715_vm1, %v2883_v17, %v2771_v49  ;;  %v2901_v3 = vsel %vm715_vm1, %v2885_v63, %v2773_v28  ;;  %v2905_v14 = vsub.f32 0.0, %v2889_v62  ;;  %v2907_v7 = vsub.f32 0.0, %v2891_v27 }
 0x242   : > { %v2909_v20 = vsub.f32 0.0, %v2893_v37  ;;  %v2911_v8 = vsub.f32 0.0, %v2895_v46  ;;  %v2913_v45 = vsub.f32 0.0, %v2897_v50  ;;  %v2915_v41 = vsub.f32 0.0, %v2899_v57 }
 0x243   : > { %v2917_v52 = vsub.f32 0.0, %v2901_v3  ;;  %v2923_v2 = vmul.f32 1.442695, %v2905_v14  ;;  %v2153_v5 = vadd.f32 %v2152_v29, %v2138_v34  ;;  %6033 = vrcp.f32 %v9809_v18 }
 0x244   : > { %v2927_v24 = vmul.f32 1.442695, %v2907_v7  ;;  %v2931_v54 = vmul.f32 1.442695, %v2909_v20  ;;  %v2935_v11 = vmul.f32 1.442695, %v2911_v8 }
 0x245   : > { %v2240_v19 = vmul.f32 0.25, %v9810_v55  ;;  %6035 = vpow2.f32 %v2923_v2  ;;  %v2939_v49 = vmul.f32 1.442695, %v2913_v45  ;;  %v2943_v28 = vmul.f32 1.442695, %v2915_v41 }
 0x246   : > { %6037 = vpow2.f32 %v2927_v24  ;;  %v9812_v10 = vperm.slane %v9811_v61, 1  ;;  %v7734_v15 = vmul.f32 0.25, %v9813_v4  ;;  %v2242_v56 = vmul.f32 0.75, %v9813_v4 }
 0x247   : > { %6039 = vpow2.f32 %v2931_v54  ;;  %v2947_v43 = vmul.f32 1.442695, %v2917_v52  ;;  %v9815_v60 = vperm.slane %v9814_v12, 1 }
 0x248   : > { %v2164_v30 = vmul.f32 %v9812_v10, %v2153_v5  ;;  %6041 = vpow2.f32 %v2935_v11  ;;  %v2238_v51 = vadd.f32 %v7734_v15, %v9816_v0  ;;  %v2244_v42 = vadd.f32 %v2242_v56, %v2240_v19 }
 0x249   : > { %6043 = vpow2.f32 %v2939_v49  ;;  %v7741_v32 = vpop.eup %6033 }
 0x24a   : > { %v2175_v9 = vadd.f32 %v9815_v60, %v2164_v30  ;;  %9817 = vst [vmem:[#allocation21_spill] sm:$0xff] %v7741_v32  ;;  %6045 = vpow2.f32 %v2943_v28  ;;  %v2266_v1 = vmul.f32 0.0, %v2238_v51  ;;  %v2268_v33 = vmul.f32 0.0, %v2244_v42 }
 0x24b   : > { %v6036_v59 = vpop.eup %6035  ;;  %6047 = vpow2.f32 %v2947_v43  ;;  %v2346_v48 = vmul.f32 0.75, %v2238_v51  ;;  %v7743_v36 = vmul.f32 0.75, %v2244_v42  ;;  %v2362_v13 = vmul.f32 0.25, %v2238_v51 }
 0x24c   : > { %v2179_v40 = vmax.f32 %v2175_v9, 0.0  ;;  %v6038_v23 = vpop.eup %6037  ;;  %v2953_v16 = vadd.f32 1.0, %v6036_v59  ;;  %v2298_v25 = vrot.slane %v2266_v1, 1  ;;  %v2300_v58 = vrot.slane %v2268_v33, 1 }
 0x24d   : > { %v6040_v35 = vpop.eup %6039  ;;  %v2955_v44 = vadd.f32 1.0, %v6038_v23  ;;  %v7746_v6 = vmul.f32 0.25, %v2244_v42  ;;  %v2394_v39 = vrot.slane %v2362_v13, 1  ;;  %v2458_v2 = vrot.slane %v2346_v48, 1 }
 0x24e   : > { %v2189_v26 = vrot.slane %v2179_v40, 4  ;;  %v2203_v47 = vmul.f32 %v9818_v31, %v2179_v40  ;;  %v6042_v38 = vpop.eup %6041  ;;  %v2957_v53 = vadd.f32 1.0, %v6040_v35  ;;  %6049 = vrcp.f32 %v2953_v16 }
 0x24f   : > { %v6044_v63 = vpop.eup %6043  ;;  %v2959_v62 = vadd.f32 1.0, %v6042_v38  ;;  %6051 = vrcp.f32 %v2955_v44  ;;  %v7750_v27 = vadd.f32 %v2298_v25, %v2238_v51  ;;  %v7752_v37 = vadd.f32 %v2300_v58, %v2244_v42 }
 0x250   : > { %v2205_v22 = vmul.f32 %v9818_v31, %v2189_v26  ;;  %v2218_v17 = vadd.f32 %v9819_v21, %v2203_v47  ;;  %v6046_v46 = vpop.eup %6045  ;;  %v2961_v29 = vadd.f32 1.0, %v6044_v63  ;;  %6053 = vrcp.f32 %v2957_v53 }
 0x251   : > { %v6048_v3 = vpop.eup %6047  ;;  %v2963_v14 = vadd.f32 1.0, %v6046_v46  ;;  %6055 = vrcp.f32 %v2959_v62  ;;  %v2396_v7 = vrot.slane %v7746_v6, 1  ;;  %v7756_v20 = vadd.f32 %v2394_v39, %v2346_v48 }
 0x252   : > { %v2220_v50 = vadd.f32 %v9819_v21, %v2205_v22  ;;  %v2226_v57 = vmax.f32 %v2218_v17, 0.0  ;;  %v2965_v8 = vadd.f32 1.0, %v6048_v3  ;;  %6057 = vrcp.f32 %v2961_v29 }
 0x253   : > { %6059 = vrcp.f32 %v2963_v14  ;;  %v7759_v52 = vadd.f32 %v2396_v7, %v7743_v36  ;;  %v2460_v19 = vrot.slane %v7743_v36, 1  ;;  %v7767_v49 = vadd.f32 %v2458_v2, %v2362_v13 }
 0x254   : > { %v2228_v45 = vmax.f32 %v2220_v50, 0.0  ;;  %v2246_v34 = vmul.f32 0.25, %v2226_v57  ;;  %v2250_v41 = vmul.f32 0.75, %v2226_v57  ;;  %v7761_v5 = vpop.eup %6049  ;;  %6061 = vrcp.f32 %v2965_v8 }
 0x255   : > { %9820 = vst [vmem:[#allocation22_spill] sm:$0xff] %v7761_v5  ;;  %v7763_v11 = vpop.eup %6051  ;;  %v7769_v28 = vadd.f32 %v2362_v13, %v2346_v48  ;;  %v2682_v32 = vrot.slane %v7756_v20, 5  ;;  %v2714_v5 = vrot.slane %v7767_v49, 4 }
 0x256   : > { %v2248_v18 = vadd.f32 %v2246_v34, %v2242_v56  ;;  %v2254_v24 = vmul.f32 0.25, %v2228_v45  ;;  %v2258_v54 = vmul.f32 0.75, %v2228_v45  ;;  %9821 = vst [vmem:[#allocation24_spill] sm:$0xff] %v7763_v11  ;;  %v2252_v55 = vadd.f32 %v2250_v41, %v7734_v15  ;;  %v7771_v61 = vpop.eup %6053 }
 0x257   : > { %9822 = vst [vmem:[#allocation18_spill] sm:$0xff] %v7771_v61  ;;  %v7773_v12 = vpop.eup %6055 }
 0x258   : > { %v2256_v10 = vadd.f32 %v2254_v24, %v2250_v41  ;;  %v2260_v30 = vadd.f32 %v2258_v54, %v2246_v34  ;;  %v2262_v4 = vadd.f32 %v2258_v54, %v2254_v24  ;;  %v2270_v43 = vmul.f32 0.0, %v2248_v18  ;;  %9823 = vst [vmem:[#allocation14_spill] sm:$0xff] %v7773_v12  ;;  %v7775_v51 = vpop.eup %6057 }
 0x259   : > { %v2272_v56 = vmul.f32 0.0, %v2252_v55  ;;  %v2350_v60 = vmul.f32 0.75, %v2248_v18  ;;  %v2352_v9 = vmul.f32 0.75, %v2252_v55  ;;  %v2366_v0 = vmul.f32 0.25, %v2248_v18  ;;  %9824 = vst [vmem:[#allocation19_spill] sm:$0xff] %v7775_v51  ;;  %v7777_v33 = vpop.eup %6059 }
 0x25a   : > { %v2274_v15 = vmul.f32 0.0, %v2256_v10  ;;  %v2276_v42 = vmul.f32 0.0, %v2260_v30  ;;  %v2278_v40 = vmul.f32 0.0, %v2262_v4  ;;  %v2302_v1 = vrot.slane %v2270_v43, 1  ;;  %9825 = vst [vmem:[#allocation15_spill] sm:$0xff] %v7777_v33  ;;  %v7779_v16 = vpop.eup %6061 }
 0x25b   : > { %v2304_v59 = vrot.slane %v2272_v56, 1  ;;  %v2354_v48 = vmul.f32 0.75, %v2256_v10  ;;  %v2356_v13 = vmul.f32 0.75, %v2260_v30  ;;  %v2358_v23 = vmul.f32 0.75, %v2262_v4  ;;  %9826 = vst [vmem:[#allocation20_spill] sm:$0xff] %v7779_v16 }
 0x25c   : > { %v2306_v26 = vrot.slane %v2274_v15, 1  ;;  %v2308_v31 = vrot.slane %v2276_v42, 1  ;;  %v2310_v47 = vrot.slane %v2278_v40, 1  ;;  %v7781_v25 = vadd.f32 %v2302_v1, %v2248_v18 }
 0x25d   : > { %v7783_v35 = vadd.f32 %v2304_v59, %v2252_v55  ;;  %v2368_v44 = vmul.f32 0.25, %v2252_v55  ;;  %v2370_v58 = vmul.f32 0.25, %v2256_v10  ;;  %v2372_v39 = vmul.f32 0.25, %v2260_v30 }
 0x25e   : > { %v7785_v38 = vadd.f32 %v2306_v26, %v2256_v10  ;;  %v7787_v53 = vadd.f32 %v2308_v31, %v2260_v30  ;;  %v7789_v22 = vadd.f32 %v2310_v47, %v2262_v4  ;;  %v2374_v21 = vmul.f32 0.25, %v2262_v4 }
 0x25f   : > { %v2398_v17 = vrot.slane %v2366_v0, 1  ;;  %v2400_v63 = vrot.slane %v2368_v44, 1  ;;  %v2402_v62 = vrot.slane %v2370_v58, 1  ;;  %v2404_v46 = vrot.slane %v2372_v39, 1 }
 0x260   : > { %9827 = vst [vmem:[#allocation16_spill] sm:$0xff] %v7787_v53  ;;  %v2406_v29 = vrot.slane %v2374_v21, 1  ;;  %v2462_v50 = vrot.slane %v2350_v60, 1  ;;  %v2464_v57 = vrot.slane %v2352_v9, 1  ;;  %v2466_v3 = vrot.slane %v2354_v48, 1 }
 0x261   : > { %9828 = vst [vmem:[#allocation17_spill] sm:$0xff] %v7789_v22  ;;  %v7791_v14 = vadd.f32 %v2398_v17, %v2350_v60  ;;  %v7793_v7 = vadd.f32 %v2400_v63, %v2352_v9  ;;  %v7795_v8 = vadd.f32 %v2402_v62, %v2354_v48  ;;  %v7797_v45 = vadd.f32 %v2404_v46, %v2356_v13 }
 0x262   : > { %v7799_v34 = vadd.f32 %v2406_v29, %v2358_v23  ;;  %v2468_v41 = vrot.slane %v2356_v13, 1  ;;  %v2470_v2 = vrot.slane %v2358_v23, 1  ;;  %v7802_v18 = vadd.f32 %v2460_v19, %v7746_v6 }
 0x263   : > { %v7804_v24 = vadd.f32 %v2462_v50, %v2366_v0  ;;  %v7806_v54 = vadd.f32 %v2464_v57, %v2368_v44  ;;  %v7808_v55 = vadd.f32 %v2466_v3, %v2370_v58  ;;  %v7812_v10 = vadd.f32 %v7746_v6, %v7743_v36 }
 0x264   : > { %v7814_v30 = vadd.f32 %v2468_v41, %v2372_v39  ;;  %v7816_v4 = vadd.f32 %v2470_v2, %v2374_v21  ;;  %v7818_v43 = vadd.f32 %v2366_v0, %v2350_v60  ;;  %v7820_v56 = vadd.f32 %v2368_v44, %v2352_v9 }
 0x265   : > { %v7822_v19 = vadd.f32 %v2370_v58, %v2354_v48  ;;  %v7824_v15 = vadd.f32 %v2372_v39, %v2356_v13  ;;  %v7826_v42 = vadd.f32 %v2374_v21, %v2358_v23  ;;  %v2538_v40 = vrot.slane %v7756_v20, 7 }
 0x266   : > { %v2540_v1 = vrot.slane %v7759_v52, 7  ;;  %v2542_v36 = vrot.slane %v7791_v14, 7  ;;  %v2544_v6 = vrot.slane %v7793_v7, 7  ;;  %v2546_v59 = vrot.slane %v7795_v8, 7 }
 0x267   : > { %v2548_v60 = vrot.slane %v7797_v45, 7  ;;  %v2550_v9 = vrot.slane %v7799_v34, 7  ;;  %v2586_v0 = vrot.slane %v7767_v49, 6  ;;  %v2588_v48 = vrot.slane %v7802_v18, 6 }
 0x268   : > { %v2590_v13 = vrot.slane %v7804_v24, 6  ;;  %v2592_v23 = vrot.slane %v7806_v54, 6  ;;  %v2594_v26 = vrot.slane %v7808_v55, 6  ;;  %v2596_v31 = vrot.slane %v7814_v30, 6 }
 0x269   : > { %v2598_v47 = vrot.slane %v7816_v4, 6  ;;  %v2618_v44 = vrot.slane %v7756_v20, 6  ;;  %v2620_v58 = vrot.slane %v7759_v52, 6  ;;  %v2622_v39 = vrot.slane %v7791_v14, 6 }
 0x26a   : > { %v2624_v21 = vrot.slane %v7793_v7, 6  ;;  %v2626_v17 = vrot.slane %v7795_v8, 6  ;;  %v2628_v63 = vrot.slane %v7797_v45, 6  ;;  %v2630_v62 = vrot.slane %v7799_v34, 6 }
 0x26b   : > { %v2650_v46 = vrot.slane %v7767_v49, 5  ;;  %v2652_v29 = vrot.slane %v7802_v18, 5  ;;  %v2654_v50 = vrot.slane %v7804_v24, 5  ;;  %v2656_v57 = vrot.slane %v7806_v54, 5 }
 0x26c   : > { %v2658_v3 = vrot.slane %v7808_v55, 5  ;;  %v2660_v41 = vrot.slane %v7814_v30, 5  ;;  %v2662_v2 = vrot.slane %v7816_v4, 5  ;;  %v2684_v16 = vrot.slane %v7759_v52, 5 }
 0x26d   : > { %v2686_v33 = vrot.slane %v7791_v14, 5  ;;  %v2688_v51 = vrot.slane %v7793_v7, 5  ;;  %v2690_v12 = vrot.slane %v7795_v8, 5  ;;  %v2692_v61 = vrot.slane %v7797_v45, 5 }
 0x26e   : > { %v2694_v11 = vrot.slane %v7799_v34, 5  ;;  %v2716_v22 = vrot.slane %v7802_v18, 4  ;;  %v2718_v53 = vrot.slane %v7804_v24, 4  ;;  %v2720_v20 = vrot.slane %v7806_v54, 4 }
 0x26f   : > { %v2722_v52 = vrot.slane %v7808_v55, 4  ;;  %v2724_v14 = vrot.slane %v7814_v30, 4  ;;  %v2726_v7 = vrot.slane %v7816_v4, 4  ;;  %v2762_v8 = vrot.slane %v7769_v28, 4 }
 0x270   : > { %v2764_v45 = vrot.slane %v7812_v10, 4  ;;  %v2766_v34 = vrot.slane %v7818_v43, 4  ;;  %v2768_v49 = vrot.slane %v7820_v56, 4  ;;  %v2770_v18 = vrot.slane %v7822_v19, 4  ;;  %v9829_v43 = vld [vmem:[#allocation16_spill] sm:$0xff]  ;;  %v9830_v19 = vld [vmem:[#allocation17_spill] sm:$0xff] }
 0x271   : > { %v2772_v24 = vrot.slane %v7824_v15, 4  ;;  %v2774_v54 = vrot.slane %v7826_v42, 4  ;;  %v2794_v55 = vsel %vm628_vm0, %v7750_v27, %v2538_v40  ;;  %v2796_v30 = vsel %vm628_vm0, %v7752_v37, %v2540_v1 }
 0x272   : > { %v2798_v28 = vsel %vm628_vm0, %v7781_v25, %v2542_v36  ;;  %v2800_v10 = vsel %vm628_vm0, %v7783_v35, %v2544_v6  ;;  %v2802_v4 = vsel %vm628_vm0, %v7785_v38, %v2546_v59  ;;  %v2804_v56 = vsel %vm628_vm0, %v9829_v43, %v2548_v60 }
 0x273   : > { %v2806_v15 = vsel %vm628_vm0, %v9830_v19, %v2550_v9  ;;  %v2810_v27 = vsel %vm1227_vm3, %v2794_v55, %v2586_v0  ;;  %v2812_v42 = vsel %vm1227_vm3, %v2796_v30, %v2588_v48  ;;  %v2814_v37 = vsel %vm1227_vm3, %v2798_v28, %v2590_v13  ;;  %v7973_v55 = vld [vmem:[%s9740_s9 + $0xf4] sm:$0xf0]  ;;  %v7978_v30 = vld [vmem:[%s9740_s9 + $0xf4] sm:$0xf]  ;;  %v7988_v28 = vld [vmem:[%s9740_s9 + $0x50] sm:$0xf] }
 0x274   : > { %v2816_v25 = vsel %vm1227_vm3, %v2800_v10, %v2592_v23  ;;  %v2818_v40 = vsel %vm1227_vm3, %v2802_v4, %v2594_v26  ;;  %v2820_v35 = vsel %vm1227_vm3, %v2804_v56, %v2596_v31  ;;  %v2822_v38 = vsel %vm1227_vm3, %v2806_v15, %v2598_v47  ;;  %v7993_v10 = vld [vmem:[%s9740_s9 + $0x54] sm:$0xf0]  ;;  %v7998_v15 = vld [vmem:[%s9740_s9 + $0x54] sm:$0xf] }
 0x275   : > { %v2826_v1 = vsel %vm1236_vm4, %v2810_v27, %v2618_v44  ;;  %v2828_v36 = vsel %vm1236_vm4, %v2812_v42, %v2620_v58  ;;  %v2830_v6 = vsel %vm1236_vm4, %v2814_v37, %v2622_v39  ;;  %v2832_v59 = vsel %vm1236_vm4, %v2816_v25, %v2624_v21  ;;  %v8003_v27 = vld [vmem:[%s9740_s9 + $0x58] sm:$0xf0]  ;;  %v8008_v42 = vld [vmem:[%s9740_s9 + $0xe0] sm:$0xf]  ;;  %v8013_v37 = vld [vmem:[%s9740_s9 + $0xe4] sm:$0xf0] }
 0x276   : > { %v2834_v60 = vsel %vm1236_vm4, %v2818_v40, %v2626_v17  ;;  %v2836_v9 = vsel %vm1236_vm4, %v2820_v35, %v2628_v63  ;;  %v2838_v0 = vsel %vm1236_vm4, %v2822_v38, %v2630_v62  ;;  %v2842_v48 = vsel %vm1257_vm5, %v2826_v1, %v2650_v46  ;;  %v8018_v25 = vld [vmem:[%s9740_s9 + $0xe4] sm:$0xf]  ;;  %v8023_v40 = vld [vmem:[%s9740_s9 + $0xe8] sm:$0xf0] }
 0x277   : > { %v2844_v13 = vsel %vm1257_vm5, %v2828_v36, %v2652_v29  ;;  %v2846_v23 = vsel %vm1257_vm5, %v2830_v6, %v2654_v50  ;;  %v2848_v26 = vsel %vm1257_vm5, %v2832_v59, %v2656_v57  ;;  %v2850_v31 = vsel %vm1257_vm5, %v2834_v60, %v2658_v3  ;;  %v8028_v6 = vld [vmem:[%s9740_s9 + $0x40] sm:$0xf]  ;;  %v8033_v59 = vld [vmem:[%s9740_s9 + $0x44] sm:$0xf0]  ;;  %v8038_v60 = vld [vmem:[%s9740_s9 + $0x44] sm:$0xf] }
 0x278   : > { %v2852_v47 = vsel %vm1257_vm5, %v2836_v9, %v2660_v41  ;;  %v2854_v44 = vsel %vm1257_vm5, %v2838_v0, %v2662_v2  ;;  %v2858_v58 = vsel %vm1573_vm6, %v2842_v48, %v2682_v32  ;;  %v2860_v39 = vsel %vm1573_vm6, %v2844_v13, %v2684_v16  ;;  %v8043_v9 = vld [vmem:[%s9740_s9 + $0x48] sm:$0xf0]  ;;  %v8048_v0 = vld [vmem:[%s9740_s9 + $0xd0] sm:$0xf]  ;;  %v8053_v48 = vld [vmem:[%s9740_s9 + $0xd4] sm:$0xf0] }
 0x279   : > { %v2862_v21 = vsel %vm1573_vm6, %v2846_v23, %v2686_v33  ;;  %v2864_v17 = vsel %vm1573_vm6, %v2848_v26, %v2688_v51  ;;  %v2866_v63 = vsel %vm1573_vm6, %v2850_v31, %v2690_v12  ;;  %v2868_v62 = vsel %vm1573_vm6, %v2852_v47, %v2692_v61  ;;  %v5484_v51 = vld [vmem:[%s9740_s9 + $0x70] sm:$0xf]  ;;  %v5898_v33 = vld [vmem:[%s9740_s9 + $0x74] sm:$0xf0]  ;;  %v8058_v47 = vld [vmem:[%s9740_s9 + $0xd4] sm:$0xf] }
 0x27a   : > { %v2870_v46 = vsel %vm1573_vm6, %v2854_v44, %v2694_v11  ;;  %v2874_v29 = vsel %vm790_vm2, %v2858_v58, %v2714_v5  ;;  %v2876_v50 = vsel %vm790_vm2, %v2860_v39, %v2716_v22  ;;  %v2878_v57 = vsel %vm790_vm2, %v2862_v21, %v2718_v53  ;;  %v5897_v53 = vld [vmem:[%s9740_s9 + $0x74] sm:$0xf]  ;;  %v5486_v22 = vld [vmem:[%s9740_s9 + $0x78] sm:$0xf0]  ;;  %v8068_v58 = vld [vmem:[%s9740_s9 + $0x30] sm:$0xf] }
 0x27b   : > { %v2880_v32 = vsel %vm790_vm2, %v2864_v17, %v2720_v20  ;;  %v2882_v16 = vsel %vm790_vm2, %v2866_v63, %v2722_v52  ;;  %v2884_v12 = vsel %vm790_vm2, %v2868_v62, %v2724_v14  ;;  %v2886_v61 = vsel %vm790_vm2, %v2870_v46, %v2726_v7  ;;  %v7947_v52 = vld [vmem:[%s9740_s9 + $0x60] sm:$0xf]  ;;  %v7952_v14 = vld [vmem:[%s9740_s9 + $0x64] sm:$0xf0]  ;;  %v7957_v7 = vld [vmem:[%s9740_s9 + $0x64] sm:$0xf] }
 0x27c   : > { %v2890_v11 = vsel %vm715_vm1, %v2874_v29, %v2762_v8  ;;  %v2892_v5 = vsel %vm715_vm1, %v2876_v50, %v2764_v45  ;;  %v2894_v3 = vsel %vm715_vm1, %v2878_v57, %v2766_v34  ;;  %v2896_v41 = vsel %vm715_vm1, %v2880_v32, %v2768_v49  ;;  %v7962_v8 = vld [vmem:[%s9740_s9 + $0x68] sm:$0xf0]  ;;  %v8063_v44 = vld [vmem:[%s9740_s9 + $0xd8] sm:$0xf0]  ;;  %v8073_v39 = vld [vmem:[%s9740_s9 + $0x34] sm:$0xf0] }
 0x27d   : > { %v2898_v2 = vsel %vm715_vm1, %v2882_v16, %v2770_v18  ;;  %v2900_v20 = vsel %vm715_vm1, %v2884_v12, %v2772_v24  ;;  %v2902_v45 = vsel %vm715_vm1, %v2886_v61, %v2774_v54  ;;  %v2906_v34 = vsub.f32 0.0, %v2890_v11  ;;  %v7968_v24 = vld [vmem:[%s9740_s9 + $0xf0] sm:$0xf]  ;;  %v7983_v54 = vld [vmem:[%s9740_s9 + $0xf8] sm:$0xf0] }
 0x27e   : > { %v2908_v49 = vsub.f32 0.0, %v2892_v5  ;;  %v2910_v18 = vsub.f32 0.0, %v2894_v3  ;;  %v2912_v4 = vsub.f32 0.0, %v2896_v41  ;;  %v2914_v43 = vsub.f32 0.0, %v2898_v2  ;;  %v8078_v21 = vld [vmem:[%s9740_s9 + $0x34] sm:$0xf] }
 0x27f   : > { %v2916_v56 = vsub.f32 0.0, %v2900_v20  ;;  %v2918_v19 = vsub.f32 0.0, %v2902_v45  ;;  %v2925_v35 = vmul.f32 1.442695, %v2906_v34  ;;  %v5485_v36 = vor.u32 %v5898_v33, %v5484_v51  ;;  %v8083_v17 = vld [vmem:[%s9740_s9 + $0x38] sm:$0xf0] }
 0x280   : > { %v2929_v38 = vmul.f32 1.442695, %v2908_v49  ;;  %v2933_v1 = vmul.f32 1.442695, %v2910_v18  ;;  %v2937_v13 = vmul.f32 1.442695, %v2912_v4  ;;  %v5489_v31 = vor.u32 %v5897_v53, %v5486_v22 }
 0x281   : > { %v2941_v23 = vmul.f32 1.442695, %v2914_v43  ;;  %v2945_v26 = vmul.f32 1.442695, %v2916_v56  ;;  %6063 = vpow2.f32 %v2925_v35  ;;  %v2949_v63 = vmul.f32 1.442695, %v2918_v19  ;;  %3871 = vmatpush.bf16.msra.mxu0 %v5485_v36 }
 0x282   : > { %v5477_v62 = vor.u32 %v7952_v14, %v7947_v52  ;;  %v5481_v46 = vor.u32 %v7957_v7, %v7962_v8  ;;  %v8092_v29 = vld [vmem:[%s9740_s9 + $0xc0] sm:$0xf]  ;;  %v8097_v50 = vld [vmem:[%s9740_s9 + $0xc4] sm:$0xf0]  ;;  %v8102_v57 = vld [vmem:[%s9740_s9 + $0xc4] sm:$0xf]  ;;  %6065 = vpow2.f32 %v2929_v38  ;;  %3899 = vmatpush.bf16.msra.mxu2 %v5489_v31  ;;  %v5549_v12 = vor.u32 %v7973_v55, %v7968_v24 }
 0x283   : > { %v8107_v32 = vld [vmem:[%s9740_s9 + $0xc8] sm:$0xf0]  ;;  %v8112_v16 = vld [vmem:[%s9740_s9 + $0x20] sm:$0xf]  ;;  %v8117_v51 = vld [vmem:[%s9740_s9 + $0x24] sm:$0xf0]  ;;  %v5553_v61 = vor.u32 %v7978_v30, %v7983_v54  ;;  %v5469_v11 = vor.u32 %v7993_v10, %v7988_v28  ;;  %6067 = vpow2.f32 %v2933_v1  ;;  %v5473_v2 = vor.u32 %v7998_v15, %v8003_v27 }
 0x284   : > { %v8128_v5 = vld [vmem:[%s9740_s9 + $0x24] sm:$0xf]  ;;  %v8133_v33 = vld [vmem:[%s9740_s9 + $0x28] sm:$0xf0]  ;;  %v8138_v53 = vld [vmem:[%s9740_s9 + $0xb0] sm:$0xf]  ;;  %v5541_v20 = vor.u32 %v8013_v37, %v8008_v42  ;;  %v5545_v52 = vor.u32 %v8018_v25, %v8023_v40  ;;  %6069 = vpow2.f32 %v2937_v13  ;;  %3885 = vmatpush.bf16.msra.mxu1 %v5549_v12  ;;  %v5461_v45 = vor.u32 %v8033_v59, %v8028_v6 }
 0x285   : > { %v8143_v22 = vld [vmem:[%s9740_s9 + $0xb4] sm:$0xf0]  ;;  %v8148_v3 = vld [vmem:[%s9740_s9 + $0xb4] sm:$0xf]  ;;  %v8153_v41 = vld [vmem:[%s9740_s9 + $0xb8] sm:$0xf0]  ;;  %3913 = vmatpush.bf16.msra.mxu3 %v5553_v61  ;;  %v5465_v34 = vor.u32 %v8038_v60, %v8043_v9  ;;  %v5533_v49 = vor.u32 %v8053_v48, %v8048_v0  ;;  %6071 = vpow2.f32 %v2941_v23  ;;  %3872 = vmatpush.bf16.msra.mxu0 %v5477_v62  ;;  %v5537_v30 = vor.u32 %v8058_v47, %v8063_v44 }
 0x286   : > { %v8164_v14 = vld [vmem:[%s9740_s9 + $0x10] sm:$0xf]  ;;  %v8169_v7 = vld [vmem:[%s9740_s9 + $0x14] sm:$0xf0]  ;;  %v8174_v8 = vld [vmem:[%s9740_s9 + $0x14] sm:$0xf]  ;;  %v5453_v54 = vor.u32 %v8073_v39, %v8068_v58  ;;  %v5457_v28 = vor.u32 %v8078_v21, %v8083_v17  ;;  %6073 = vpow2.f32 %v2945_v26  ;;  %3900 = vmatpush.bf16.msra.mxu2 %v5481_v46  ;;  %v5525_v56 = vor.u32 %v8097_v50, %v8092_v29 }
 0x287   : > { %v8185_v18 = vld [vmem:[%s9740_s9 + $0x18] sm:$0xf0]  ;;  %v8190_v24 = vld [vmem:[%s9740_s9 + $0xa0] sm:$0xf]  ;;  %v8195_v55 = vld [vmem:[%s9740_s9 + $0xa4] sm:$0xf0]  ;;  %v5529_v19 = vor.u32 %v8102_v57, %v8107_v32  ;;  %v6064_v25 = vpop.eup %6063  ;;  %6075 = vpow2.f32 %v2949_v63  ;;  %v5517_v35 = vor.u32 %v8143_v22, %v8138_v53  ;;  %v5521_v38 = vor.u32 %v8148_v3, %v8153_v41 }
 0x288   : > { %v8206_v10 = vld [vmem:[%s9740_s9 + $0xa4] sm:$0xf]  ;;  %v8211_v4 = vld [vmem:[%s9740_s9 + $0xa8] sm:$0xf0]  ;;  %v8216_v43 = vld [vmem:[%s9740_s9] sm:$0xf]  ;;  %v6066_v48 = vpop.eup %6065  ;;  %3886 = vmatpush.bf16.msra.mxu1 %v5541_v20  ;;  %v9839_v53 = vor.u32 %v8117_v51, %v8112_v16 }
 0x289   : > { %v8227_v27 = vld [vmem:[%s9740_s9 + $0x4] sm:$0xf0]  ;;  %v8232_v42 = vld [vmem:[%s9740_s9 + $0x4] sm:$0xf]  ;;  %v8237_v37 = vld [vmem:[%s9740_s9 + $0x8] sm:$0xf0]  ;;  %3914 = vmatpush.bf16.msra.mxu3 %v5545_v52  ;;  %v6068_v44 = vpop.eup %6067  ;;  %3873 = vmatpush.bf16.msra.mxu0 %v5469_v11 }
 0x28a   : > { %v8248_v1 = vld [vmem:[%s9740_s9 + $0x90] sm:$0xf]  ;;  %v8253_v36 = vld [vmem:[%s9740_s9 + $0x94] sm:$0xf0]  ;;  %v8258_v0 = vld [vmem:[%s9740_s9 + $0x94] sm:$0xf]  ;;  %v6070_v61 = vpop.eup %6069  ;;  %3901 = vmatpush.bf16.msra.mxu2 %v5473_v2 }
 0x28b   : > { %v2954_v13 = vadd.f32 1.0, %v6064_v25  ;;  %v8269_v47 = vld [vmem:[%s9740_s9 + $0x98] sm:$0xf0]  ;;  %v2956_v63 = vadd.f32 1.0, %v6066_v48  ;;  %v2958_v20 = vadd.f32 1.0, %v6068_v44  ;;  %v6072_v25 = vpop.eup %6071  ;;  %v2960_v48 = vadd.f32 1.0, %v6070_v61 }
 0x28c   : > { %v6091_v26 = vld [vmem:[%s6563_s27] sm:$0xff]  ;;  %v6092_v12 = vld [vmem:[%s6563_s27 + $0x10] sm:$0xff]  ;;  %v2962_v2 = vadd.f32 1.0, %v6072_v25  ;;  %3887 = vmatpush.bf16.msra.mxu1 %v5533_v49 }
 0x28d   : > { %6077 = vrcp.f32 %v2954_v13  ;;  %v9831_v46 = vld [vmem:[#allocation23_spill] sm:$0xff]  ;;  %v9832_v62 = vld [vmem:[#allocation22_spill] sm:$0xff]  ;;  %v6074_v13 = vpop.eup %6073  ;;  %3915 = vmatpush.bf16.msra.mxu3 %v5537_v30  ;;  %v9833_v31 = vld [vmem:[#allocation24_spill] sm:$0xff]  ;;  %3874 = vmatpush.bf16.msra.mxu0 %v5461_v45 }
 0x28e   : > { %6079 = vrcp.f32 %v2956_v63  ;;  %v2983_v23 = vmul.f32 %v6091_v26, %v9831_v46  ;;  %v2985_v44 = vmul.f32 %v6092_v12, %v9832_v62  ;;  %v6093_v52 = vld [vmem:[%s6563_s27 + $0x20] sm:$0xff]  ;;  %v6094_v61 = vld [vmem:[%s6563_s27 + $0x30] sm:$0xff]  ;;  %v6076_v15 = vpop.eup %6075  ;;  %v2964_v26 = vadd.f32 1.0, %v6074_v13  ;;  %3902 = vmatpush.bf16.msra.mxu2 %v5465_v34 }
 0x28f   : > { %6081 = vrcp.f32 %v2958_v20  ;;  %v2987_v11 = vmul.f32 %v6093_v52, %v9833_v31  ;;  %v9834_v63 = vld [vmem:[#allocation18_spill] sm:$0xff]  ;;  %v6096_v49 = vld [vmem:[%s6563_s27 + $0x50] sm:$0xff]  ;;  %v9836_v30 = vld [vmem:[#allocation19_spill] sm:$0xff]  ;;  %v2966_v25 = vadd.f32 1.0, %v6076_v15 }
 0x290   : > { %v2989_v40 = vmul.f32 %v6094_v61, %v9834_v63  ;;  %6083 = vrcp.f32 %v2960_v48  ;;  %v6095_v62 = vld [vmem:[%s6563_s27 + $0x40] sm:$0xff]  ;;  %v2993_v20 = vmul.f32 %v6096_v49, %v9836_v30  ;;  %v6098_v48 = vld [vmem:[%s6563_s27 + $0x70] sm:$0xff]  ;;  %v3019_v6 = vrot.slane %v2983_v23, 7  ;;  %3888 = vmatpush.bf16.msra.mxu1 %v5525_v56 }
 0x291   : > { %v9835_v46 = vld [vmem:[#allocation14_spill] sm:$0xff]  ;;  %6085 = vrcp.f32 %v2962_v2  ;;  %v9837_v52 = vld [vmem:[#allocation15_spill] sm:$0xff]  ;;  %v9838_v61 = vld [vmem:[#allocation20_spill] sm:$0xff]  ;;  %v3021_v59 = vrot.slane %v2985_v44, 7  ;;  %v3023_v45 = vrot.slane %v2987_v11, 7  ;;  %3916 = vmatpush.bf16.msra.mxu3 %v5529_v19  ;;  %3875 = vmatpush.bf16.msra.mxu0 %v5453_v54  ;;  %v9840_v30 = vor.u32 %v8128_v5, %v8133_v33 }
 0x292   : > { %v2991_v12 = vmul.f32 %v6095_v62, %v9835_v46  ;;  %v6097_v31 = vld [vmem:[%s6563_s27 + $0x60] sm:$0xff]  ;;  %v2997_v63 = vmul.f32 %v6098_v48, %v9838_v61  ;;  %6087 = vrcp.f32 %v2964_v26  ;;  %v3025_v60 = vrot.slane %v2989_v40, 7  ;;  %3903 = vmatpush.bf16.msra.mxu2 %v5457_v28 }
 0x293   : > { %v2995_v13 = vmul.f32 %v6097_v31, %v9837_v52  ;;  %v8303_v62 = vpop.eup %6077  ;;  %6089 = vrcp.f32 %v2966_v25  ;;  %v3029_v34 = vrot.slane %v2993_v20, 7  ;;  %v8317_v44 = vsel %vm628_vm0, 0.0, %v3019_v6  ;;  %v8330_v57 = vld [vmem:[%s9739_s8] sm:$0xff] }
 0x294   : > { %v3027_v9 = vrot.slane %v2991_v12, 7  ;;  %v8311_v15 = vpop.eup %6079  ;;  %v3033_v11 = vrot.slane %v2997_v63, 7  ;;  %v8320_v29 = vsel %vm628_vm0, 0.0, %v3021_v59  ;;  %v8333_v58 = vsel %vm628_vm0, 0.0, %v3023_v45  ;;  %3889 = vmatpush.bf16.msra.mxu1 %v5517_v35  ;;  %v9841_v31 = vld [vmem:[#allocation11_spill] sm:$0xff] }
 0x295   : > { %v3031_v23 = vrot.slane %v2995_v13, 7  ;;  %v8322_v50 = vpop.eup %6081  ;;  %v8336_v39 = vsel %vm628_vm0, 0.0, %v3025_v60  ;;  %v8342_v54 = vsel %vm628_vm0, 0.0, %v3029_v34  ;;  %v8353_v28 = vsel %vm628_vm0, %v3019_v6, 0.0  ;;  %3917 = vmatpush.bf16.msra.mxu3 %v5521_v38  ;;  %3876 = vmatpush.bf16.msra.mxu0 %v9839_v53  ;;  %v9844_v6 = vld [vmem:[#allocation12_spill] sm:$0xff] }
 0x296   : > { %v8339_v32 = vsel %vm628_vm0, 0.0, %v3027_v9  ;;  %v8344_v56 = vpop.eup %6083  ;;  %v8350_v17 = vsel %vm628_vm0, 0.0, %v3033_v11  ;;  %v8356_v19 = vsel %vm628_vm0, %v3021_v59, 0.0  ;;  %v8367_v2 = vsel %vm628_vm0, %v3023_v45, 0.0  ;;  %3904 = vmatpush.bf16.msra.mxu2 %v9840_v30 }
 0x297   : > { %v8347_v21 = vsel %vm628_vm0, 0.0, %v3031_v23  ;;  %v8358_v40 = vpop.eup %6085  ;;  %v8370_v26 = vsel %vm628_vm0, %v3025_v60, 0.0  ;;  %v8373_v46 = vsel %vm628_vm0, %v3027_v9, 0.0  ;;  %v8376_v12 = vsel %vm628_vm0, %v3029_v34, 0.0 }
 0x298   : > { %v8378_v49 = vpop.eup %6087  ;;  %v8384_v22 = vsel %vm628_vm0, %v3031_v23, 0.0  ;;  %v8387_v3 = vsel %vm628_vm0, %v3033_v11, 0.0  ;;  %v3083_v41 = vperm.slane %v8330_v57, 0  ;;  %v3101_v35 = vperm.slane %v8330_v57, 1 }
 0x299   : > { %v8391_v38 = vpop.eup %6089  ;;  %v3175_v20 = vperm.slane %v8330_v57, 2  ;;  %v8398_v16 = vperm.slane %v8330_v57, 3  ;;  %v8401_v51 = vperm.slane %v8330_v57, 4  ;;  %v8404_v25 = vperm.slane %v8330_v57, 5 }
 0x29a   : > { %v3085_v52 = vmul.f32 %v3083_v41, %v9841_v31  ;;  %v3087_v13 = vmul.f32 %v3083_v41, %v8320_v29  ;;  %v3089_v48 = vmul.f32 %v3083_v41, %v8336_v39  ;;  %v3091_v5 = vmul.f32 %v3083_v41, %v8342_v54 }
 0x29b   : > { %v9842_v33 = vor.u32 %v8195_v55, %v8190_v24  ;;  %v9843_v61 = vor.u32 %v8206_v10, %v8211_v4  ;;  %v3103_v63 = vmul.f32 %v3101_v35, %v9841_v31  ;;  %v3105_v59 = vmul.f32 %v3101_v35, %v9844_v6 }
 0x29c   : > { %v3107_v45 = vmul.f32 %v3101_v35, %v8320_v29  ;;  %v8420_v60 = vperm.slane %v8330_v57, 6  ;;  %v9845_v9 = vor.u32 %v8169_v7, %v8164_v14  ;;  %v3109_v24 = vmul.f32 %v3101_v35, %v8356_v19 }
 0x29d   : > { %3890 = vmatpush.bf16.msra.mxu1 %v9842_v33  ;;  %3918 = vmatpush.bf16.msra.mxu3 %v9843_v61  ;;  %v3111_v55 = vmul.f32 %v3101_v35, %v8336_v39  ;;  %v3113_v10 = vmul.f32 %v3101_v35, %v8370_v26  ;;  %v3115_v4 = vmul.f32 %v3101_v35, %v8342_v54  ;;  %v3135_v11 = vrot.slane %v3103_v63, 1 }
 0x29e   : > { %3877 = vmatpush.bf16.msra.mxu0 %v9845_v9  ;;  %v9846_v34 = vor.u32 %v8174_v8, %v8185_v18  ;;  %v3117_v23 = vmul.f32 %v3101_v35, %v8376_v12  ;;  %v3136_v53 = vrot.slane %v3105_v59, 1  ;;  %v3141_v41 = vrot.slane %v3107_v45, 1 }
 0x29f   : > { %v3142_v30 = vrot.slane %v3109_v24, 1  ;;  %v3147_v14 = vrot.slane %v3111_v55, 1  ;;  %v3148_v7 = vrot.slane %v3113_v10, 1  ;;  %v3153_v33 = vrot.slane %v3115_v4, 1 }
 0x2a0   : > { %3905 = vmatpush.bf16.msra.mxu2 %v9846_v34  ;;  %v9847_v61 = vor.u32 %v8253_v36, %v8248_v1  ;;  %v9848_v9 = vor.u32 %v8258_v0, %v8269_v47  ;;  %v3137_v8 = vsel %vm715_vm1, %v3135_v11, %v3136_v53  ;;  %v3154_v18 = vrot.slane %v3117_v23, 1 }
 0x2a1   : > { %v3177_v35 = vmul.f32 %v3175_v20, %v9841_v31  ;;  %v3179_v63 = vmul.f32 %v3175_v20, %v9844_v6  ;;  %v9849_v59 = vor.u32 %v8227_v27, %v8216_v43  ;;  %v3143_v45 = vsel %vm715_vm1, %v3141_v41, %v3142_v30 }
 0x2a2   : > { %3891 = vmatpush.bf16.msra.mxu1 %v9847_v61  ;;  %3919 = vmatpush.bf16.msra.mxu3 %v9848_v9  ;;  %v3149_v1 = vsel %vm715_vm1, %v3147_v14, %v3148_v7  ;;  %v3167_v36 = vadd.f32 %v3137_v8, %v3085_v52  ;;  %v3181_v24 = vmul.f32 %v3175_v20, %v8320_v29 }
 0x2a3   : > { %3878 = vmatpush.bf16.msra.mxu0 %v9849_v59  ;;  %v9850_v0 = vor.u32 %v8232_v42, %v8237_v37  ;;  %v3155_v47 = vsel %vm715_vm1, %v3153_v33, %v3154_v18  ;;  %v3169_v55 = vadd.f32 %v3143_v45, %v3087_v13  ;;  %v3171_v10 = vadd.f32 %v3149_v1, %v3089_v48 }
 0x2a4   : > { %v3183_v4 = vmul.f32 %v3175_v20, %v8356_v19  ;;  %v3173_v34 = vadd.f32 %v3155_v47, %v3091_v5  ;;  %v3185_v43 = vmul.f32 %v3175_v20, %v8336_v39  ;;  %v3187_v27 = vmul.f32 %v3175_v20, %v8370_v26 }
 0x2a5   : > { %3906 = vmatpush.bf16.msra.mxu2 %v9850_v0  ;;  %v3189_v23 = vmul.f32 %v3175_v20, %v8342_v54  ;;  %v3191_v52 = vmul.f32 %v3175_v20, %v8376_v12  ;;  %v3209_v11 = vrot.slane %v3177_v35, 2  ;;  %v3210_v53 = vrot.slane %v3179_v63, 2 }
 0x2a6   : > { %v3215_v41 = vrot.slane %v3181_v24, 2  ;;  %v3216_v42 = vrot.slane %v3183_v4, 2  ;;  %v3221_v37 = vrot.slane %v3185_v43, 2  ;;  %v3222_v30 = vrot.slane %v3187_v27, 2 }
 0x2a7   : > { %v3227_v14 = vrot.slane %v3189_v23, 2  ;;  %v3211_v13 = vsel %vm790_vm2, %v3209_v11, %v3210_v53  ;;  %v3228_v48 = vrot.slane %v3191_v52, 2  ;;  %v3251_v5 = vmul.f32 %v8398_v16, %v8317_v44 }
 0x2a8   : > { %v3253_v7 = vmul.f32 %v8398_v16, %v8333_v58  ;;  %v3217_v33 = vsel %vm790_vm2, %v3215_v41, %v3216_v42  ;;  %v3223_v20 = vsel %vm790_vm2, %v3221_v37, %v3222_v30  ;;  %v3241_v61 = vadd.f32 %v3211_v13, %v3167_v36 }
 0x2a9   : > { %v3255_v9 = vmul.f32 %v8398_v16, %v8339_v32  ;;  %v3229_v8 = vsel %vm790_vm2, %v3227_v14, %v3228_v48  ;;  %v3243_v18 = vadd.f32 %v3217_v33, %v3169_v55  ;;  %v3245_v35 = vadd.f32 %v3223_v20, %v3171_v10 }
 0x2aa   : > { %v3257_v63 = vmul.f32 %v8398_v16, %v8347_v21  ;;  %v3247_v59 = vadd.f32 %v3229_v8, %v3173_v34  ;;  %v3259_v45 = vadd.f32 %v3251_v5, %v3241_v61  ;;  %v3269_v1 = vmul.f32 %v8401_v51, %v8317_v44 }
 0x2ab   : > { %v3271_v24 = vmul.f32 %v8401_v51, %v8353_v28  ;;  %v3261_v0 = vadd.f32 %v3253_v7, %v3243_v18  ;;  %v3263_v36 = vadd.f32 %v3255_v9, %v3245_v35  ;;  %v3273_v47 = vmul.f32 %v8401_v51, %v8333_v58 }
 0x2ac   : > { %v3275_v55 = vmul.f32 %v8401_v51, %v8367_v2  ;;  %v3265_v10 = vadd.f32 %v3257_v63, %v3247_v59  ;;  %v3277_v16 = vmul.f32 %v8401_v51, %v8339_v32  ;;  %v3279_v4 = vmul.f32 %v8401_v51, %v8373_v46 }
 0x2ad   : > { %v3281_v34 = vmul.f32 %v8401_v51, %v8347_v21  ;;  %v3283_v43 = vmul.f32 %v8401_v51, %v8384_v22  ;;  %v3301_v27 = vrot.slane %v3269_v1, 1  ;;  %v3302_v23 = vrot.slane %v3271_v24, 1 }
 0x2ae   : > { %v3307_v52 = vrot.slane %v3273_v47, 1  ;;  %v3308_v11 = vrot.slane %v3275_v55, 1  ;;  %v3313_v53 = vrot.slane %v3277_v16, 1  ;;  %v3314_v41 = vrot.slane %v3279_v4, 1 }
 0x2af   : > { %v3319_v42 = vrot.slane %v3281_v34, 1  ;;  %v3303_v37 = vsel %vm715_vm1, %v3301_v27, %v3302_v23  ;;  %v3320_v30 = vrot.slane %v3283_v43, 1  ;;  %v3343_v14 = vmul.f32 %v8404_v25, %v8317_v44 }
 0x2b0   : > { %v3345_v13 = vmul.f32 %v8404_v25, %v8353_v28  ;;  %v3309_v48 = vsel %vm715_vm1, %v3307_v52, %v3308_v11  ;;  %v3315_v51 = vsel %vm715_vm1, %v3313_v53, %v3314_v41  ;;  %v3333_v5 = vadd.f32 %v3303_v37, %v3259_v45 }
 0x2b1   : > { %v3347_v7 = vmul.f32 %v8404_v25, %v8333_v58  ;;  %v3321_v33 = vsel %vm715_vm1, %v3319_v42, %v3320_v30  ;;  %v3335_v20 = vadd.f32 %v3309_v48, %v3261_v0  ;;  %v3337_v61 = vadd.f32 %v3315_v51, %v3263_v36 }
 0x2b2   : > { %v3349_v9 = vmul.f32 %v8404_v25, %v8367_v2  ;;  %v3339_v8 = vadd.f32 %v3321_v33, %v3265_v10  ;;  %v3351_v44 = vmul.f32 %v8404_v25, %v8339_v32  ;;  %v3353_v28 = vmul.f32 %v8404_v25, %v8373_v46  ;;  %v6023_v32 = vld [vmem:[%s9739_s8 + $0x10] ss:$0 sm:$0xff] }
 0x2b3   : > { %v3355_v18 = vmul.f32 %v8404_v25, %v8347_v21  ;;  %v3357_v58 = vmul.f32 %v8404_v25, %v8384_v22  ;;  %v3375_v35 = vrot.slane %v3343_v14, 2  ;;  %v3376_v63 = vrot.slane %v3345_v13, 2 }
 0x2b4   : > { %v3381_v59 = vrot.slane %v3347_v7, 2  ;;  %v3382_v45 = vrot.slane %v3349_v9, 2  ;;  %v3387_v1 = vrot.slane %v3351_v44, 2  ;;  %v3388_v24 = vrot.slane %v3353_v28, 2 }
 0x2b5   : > { %v3393_v2 = vrot.slane %v3355_v18, 2  ;;  %v3377_v0 = vsel %vm790_vm2, %v3375_v35, %v3376_v63  ;;  %v3394_v46 = vrot.slane %v3357_v58, 2  ;;  %v3417_v21 = vmul.f32 %v8420_v60, %v8320_v29 }
 0x2b6   : > { %v3419_v22 = vmul.f32 %v8420_v60, %v8336_v39  ;;  %v3383_v25 = vsel %vm790_vm2, %v3381_v59, %v3382_v45  ;;  %v3389_v36 = vsel %vm790_vm2, %v3387_v1, %v3388_v24  ;;  %v3407_v47 = vadd.f32 %v3377_v0, %v3333_v5 }
 0x2b7   : > { %v3421_v55 = vmul.f32 %v8420_v60, %v8342_v54  ;;  %v3395_v10 = vsel %vm790_vm2, %v3393_v2, %v3394_v46  ;;  %v3409_v16 = vadd.f32 %v3383_v25, %v3335_v20  ;;  %v3411_v4 = vadd.f32 %v3389_v36, %v3337_v61  ;;  %v5492_v2 = vld [vmem:[%s9740_s9 + $0x80] sm:$0xf] }
 0x2b8   : > { %v3423_v34 = vmul.f32 %v8420_v60, %v8350_v17  ;;  %v3413_v43 = vadd.f32 %v3395_v10, %v3339_v8  ;;  %v3425_v27 = vadd.f32 %v3417_v21, %v3407_v47  ;;  %v3433_v23 = vperm.slane %v8330_v57, 7 }
 0x2b9   : > { %v3509_v52 = vmul.f32 %v6023_v32, %v8320_v29  ;;  %v3427_v11 = vadd.f32 %v3419_v22, %v3409_v16  ;;  %v3429_v53 = vadd.f32 %v3421_v55, %v3411_v4  ;;  %v3511_v41 = vmul.f32 %v6023_v32, %v8356_v19 }
 0x2ba   : > { %v3513_v42 = vmul.f32 %v6023_v32, %v8336_v39  ;;  %v3431_v37 = vadd.f32 %v3423_v34, %v3413_v43  ;;  %v3435_v30 = vmul.f32 %v3433_v23, %v8320_v29  ;;  %v3437_v14 = vmul.f32 %v3433_v23, %v8356_v19 }
 0x2bb   : > { %v3439_v13 = vmul.f32 %v3433_v23, %v8336_v39  ;;  %v3441_v60 = vmul.f32 %v3433_v23, %v8370_v26  ;;  %v3443_v48 = vmul.f32 %v3433_v23, %v8342_v54  ;;  %v3445_v57 = vmul.f32 %v3433_v23, %v8376_v12 }
 0x2bc   : > { %v3447_v51 = vmul.f32 %v3433_v23, %v8350_v17  ;;  %v3449_v5 = vmul.f32 %v3433_v23, %v8387_v3  ;;  %v3467_v7 = vrot.slane %v3435_v30, 1  ;;  %v3468_v33 = vrot.slane %v3437_v14, 1 }
 0x2bd   : > { %v3473_v20 = vrot.slane %v3439_v13, 1  ;;  %v3474_v61 = vrot.slane %v3441_v60, 1  ;;  %v3479_v9 = vrot.slane %v3443_v48, 1  ;;  %v3480_v29 = vrot.slane %v3445_v57, 1 }
 0x2be   : > { %v3485_v8 = vrot.slane %v3447_v51, 1  ;;  %v3469_v19 = vsel %vm715_vm1, %v3467_v7, %v3468_v33  ;;  %v3486_v39 = vrot.slane %v3449_v5, 1  ;;  %v3515_v44 = vmul.f32 %v6023_v32, %v8370_v26 }
 0x2bf   : > { %v3517_v28 = vmul.f32 %v6023_v32, %v8342_v54  ;;  %v3475_v18 = vsel %vm715_vm1, %v3473_v20, %v3474_v61  ;;  %v3481_v58 = vsel %vm715_vm1, %v3479_v9, %v3480_v29  ;;  %v3499_v35 = vadd.f32 %v3469_v19, %v3425_v27  ;;  %v5900_v54 = vld [vmem:[%s9740_s9 + $0x84] sm:$0xf0] }
 0x2c0   : > { %v3519_v63 = vmul.f32 %v6023_v32, %v8376_v12  ;;  %v3487_v59 = vsel %vm715_vm1, %v3485_v8, %v3486_v39  ;;  %v3501_v45 = vadd.f32 %v3475_v18, %v3427_v11  ;;  %v3503_v1 = vadd.f32 %v3481_v58, %v3429_v53  ;;  %v5899_v12 = vld [vmem:[%s9740_s9 + $0x84] sm:$0xf]  ;;  %v6099_v11 = vld [vmem:[%s6563_s27 + $0x8] sm:$0xff]  ;;  %v9851_v53 = vld [vmem:[#allocation21_spill] sm:$0xff] }
 0x2c1   : > { %v3521_v24 = vmul.f32 %v6023_v32, %v8350_v17  ;;  %v3505_v26 = vadd.f32 %v3487_v59, %v3431_v37  ;;  %v3523_v0 = vmul.f32 %v6023_v32, %v8387_v3  ;;  %v3541_v46 = vrot.slane %v3509_v52, 2  ;;  %v5494_v17 = vld [vmem:[%s9740_s9 + $0x88] sm:$0xf0] }
 0x2c2   : > { %v3542_v21 = vrot.slane %v3511_v41, 2  ;;  %v3547_v22 = vrot.slane %v3513_v42, 2  ;;  %v3548_v25 = vrot.slane %v3515_v44, 2  ;;  %v3553_v36 = vrot.slane %v3517_v28, 2 }
 0x2c3   : > { %v3554_v47 = vrot.slane %v3519_v63, 2  ;;  %v3559_v10 = vrot.slane %v3521_v24, 2  ;;  %v3560_v16 = vrot.slane %v3523_v0, 2  ;;  %v5493_v3 = vor.u32 %v5900_v54, %v5492_v2  ;;  %v6101_v24 = vld [vmem:[%s6563_s27 + $0x28] sm:$0xff] }
 0x2c4   : > { %v3543_v55 = vsel %vm790_vm2, %v3541_v46, %v3542_v21  ;;  %v3549_v32 = vsel %vm790_vm2, %v3547_v22, %v3548_v25  ;;  %v5497_v43 = vor.u32 %v5899_v12, %v5494_v17  ;;  %v8559_v41 = vmul.f32 %v6099_v11, %v9851_v53  ;;  %v6103_v46 = vld [vmem:[%s6563_s27 + $0x48] sm:$0xff]  ;;  %v6104_v12 = vld [vmem:[%s6563_s27 + $0x58] sm:$0xff] }
 0x2c5   : > { %v3555_v4 = vsel %vm790_vm2, %v3553_v36, %v3554_v47  ;;  %v3573_v34 = vadd.f32 %v3543_v55, %v3499_v35  ;;  %v3561_v27 = vsel %vm790_vm2, %v3559_v10, %v3560_v16  ;;  %v3575_v23 = vadd.f32 %v3549_v32, %v3501_v45  ;;  %3892 = vmatpush.bf16.msra.mxu1 %v5493_v3  ;;  %v6100_v45 = vld [vmem:[%s6563_s27 + $0x18] sm:$0xff]  ;;  %v6105_v25 = vld [vmem:[%s6563_s27 + $0x68] sm:$0xff] }
 0x2c6   : > { %v3577_v52 = vadd.f32 %v3555_v4, %v3503_v1  ;;  %v3579_v42 = vadd.f32 %v3561_v27, %v3505_v26  ;;  %3920 = vmatpush.bf16.msra.mxu3 %v5497_v43  ;;  %v2986_v1 = vmul.f32 %v6100_v45, %v8303_v62  ;;  %v2988_v2 = vmul.f32 %v6101_v24, %v8311_v15  ;;  %v6102_v26 = vld [vmem:[%s6563_s27 + $0x38] sm:$0xff]  ;;  %v8602_v43 = vld [vmem:[%s9739_s8 + $0x8] sm:$0xff] }
 0x2c7   : > { %v3589_v37 = vrot.slane %v3573_v34, 1  ;;  %v3605_v30 = vrot.slane %v3573_v34, 2  ;;  %v3621_v14 = vrot.slane %v3573_v34, 3  ;;  %v3591_v13 = vrot.slane %v3575_v23, 1  ;;  %v6106_v47 = vld [vmem:[%s6563_s27 + $0x78] sm:$0xff] }
 0x2c8   : > { %v3593_v60 = vrot.slane %v3577_v52, 1  ;;  %v3607_v48 = vrot.slane %v3575_v23, 2  ;;  %v3609_v57 = vrot.slane %v3577_v52, 2  ;;  %v3595_v51 = vrot.slane %v3579_v42, 1 }
 0x2c9   : > { %v3611_v5 = vrot.slane %v3579_v42, 2  ;;  %v3623_v7 = vrot.slane %v3575_v23, 3  ;;  %v3625_v33 = vrot.slane %v3577_v52, 3  ;;  %v3627_v20 = vrot.slane %v3579_v42, 3 }
 0x2ca   : > { %v3637_v61 = vsel %vm628_vm0, %v3573_v34, %v3589_v37  ;;  %v3639_v9 = vsel %vm628_vm0, %v3575_v23, %v3591_v13  ;;  %v3641_v29 = vsel %vm628_vm0, %v3577_v52, %v3593_v60  ;;  %v3643_v8 = vsel %vm628_vm0, %v3579_v42, %v3595_v51 }
 0x2cb   : > { %v3645_v19 = vsel %vm1227_vm3, %v3637_v61, %v3605_v30  ;;  %v3647_v39 = vsel %vm1227_vm3, %v3639_v9, %v3607_v48  ;;  %v3649_v44 = vsel %vm1227_vm3, %v3641_v29, %v3609_v57  ;;  %v3651_v28 = vsel %vm1227_vm3, %v3643_v8, %v3611_v5 }
 0x2cc   : > { %v3653_v18 = vsel %vm1236_vm4, %v3645_v19, %v3621_v14  ;;  %v3655_v58 = vsel %vm1236_vm4, %v3647_v39, %v3623_v7  ;;  %v3657_v35 = vsel %vm1236_vm4, %v3649_v44, %v3625_v33  ;;  %v3659_v63 = vsel %vm1236_vm4, %v3651_v28, %v3627_v20 }
 0x2cd   : > { %v3663_v59 = vrot.slane %v3655_v58, 4  ;;  %v3669_v54 = vrot.slane %v3659_v63, 4  ;;  %v2990_v0 = vmul.f32 %v6102_v26, %v8322_v50  ;;  %v2992_v21 = vmul.f32 %v6103_v46, %v8344_v56 }
 0x2ce   : > { %v2994_v17 = vmul.f32 %v6104_v12, %v8358_v40  ;;  %v2996_v36 = vmul.f32 %v6105_v25, %v8378_v49  ;;  %v2998_v62 = vmul.f32 %v6106_v47, %v8391_v38  ;;  %v3020_v15 = vrot.slane %v8559_v41, 7 }
 0x2cf   : > { %v3673_v22 = vsel %vm1257_vm5, %v3653_v18, %v3663_v59  ;;  %v3675_v55 = vsel %vm1257_vm5, %v3657_v35, %v3669_v54  ;;  %v3022_v10 = vrot.slane %v2986_v1, 7  ;;  %v3024_v50 = vrot.slane %v2988_v2, 7 }
 0x2d0   : > { %v3026_v16 = vrot.slane %v2990_v0, 7  ;;  %v3677_v3 = vpack.c.bf16 %v3675_v55, %v3673_v22  ;;  %v3028_v56 = vrot.slane %v2992_v21, 7  ;;  %v3030_v32 = vrot.slane %v2994_v17, 7 }
 0x2d1   : > { %v3032_v4 = vrot.slane %v2996_v36, 7  ;;  %v3034_v40 = vrot.slane %v2998_v62, 7  ;;  %v8591_v34 = vsel %vm628_vm0, 0.0, %v3020_v15  ;;  %v8594_v49 = vsel %vm628_vm0, 0.0, %v3022_v10 }
 0x2d2   : > { %v8597_v38 = vsel %vm628_vm0, 0.0, %v3024_v50  ;;  %3879 = vmatmul.bf16.vlgmr.msra.gmra.mxu0 %v3677_v3  ;;  %3907 = vmatmul.bf16.vlgmr.msra.gmra.mxu2 %v3677_v3  ;;  %v8605_v27 = vsel %vm628_vm0, 0.0, %v3026_v16  ;;  %v8608_v23 = vsel %vm628_vm0, 0.0, %v3028_v56  ;;  %v8611_v52 = vsel %vm628_vm0, 0.0, %v3030_v32 }
 0x2d3   : > { %v8614_v11 = vsel %vm628_vm0, 0.0, %v3032_v4  ;;  %v8617_v53 = vsel %vm628_vm0, 0.0, %v3034_v40  ;;  %v8620_v41 = vsel %vm628_vm0, %v3020_v15, 0.0  ;;  %v8623_v42 = vsel %vm628_vm0, %v3022_v10, 0.0 }
 0x2d4   : > { %v8626_v37 = vsel %vm628_vm0, %v3024_v50, 0.0  ;;  %v8629_v30 = vsel %vm628_vm0, %v3026_v16, 0.0  ;;  %v8632_v14 = vsel %vm628_vm0, %v3028_v56, 0.0  ;;  %v8635_v13 = vsel %vm628_vm0, %v3030_v32, 0.0 }
 0x2d5   : > { %v8638_v60 = vsel %vm628_vm0, %v3032_v4, 0.0  ;;  %v8641_v48 = vsel %vm628_vm0, %v3034_v40, 0.0  ;;  %v3084_v57 = vperm.slane %v8602_v43, 0  ;;  %v3102_v51 = vperm.slane %v8602_v43, 1 }
 0x2d6   : > { %v3176_v5 = vperm.slane %v8602_v43, 2  ;;  %v3250_v7 = vperm.slane %v8602_v43, 3  ;;  %v8648_v33 = vperm.slane %v8602_v43, 4  ;;  %v8651_v20 = vperm.slane %v8602_v43, 5 }
 0x2d7   : > { %v8654_v61 = vperm.slane %v8602_v43, 6  ;;  %v3086_v9 = vmul.f32 %v3084_v57, %v9841_v31  ;;  %v3088_v29 = vmul.f32 %v3084_v57, %v8594_v49  ;;  %v3090_v8 = vmul.f32 %v3084_v57, %v8605_v27 }
 0x2d8   : > { %v3092_v19 = vmul.f32 %v3084_v57, %v8611_v52  ;;  %v3104_v39 = vmul.f32 %v3102_v51, %v9841_v31  ;;  %v3106_v44 = vmul.f32 %v3102_v51, %v9844_v6  ;;  %v3108_v28 = vmul.f32 %v3102_v51, %v8594_v49 }
 0x2d9   : > { %v3110_v18 = vmul.f32 %v3102_v51, %v8623_v42  ;;  %v3112_v58 = vmul.f32 %v3102_v51, %v8605_v27  ;;  %v3114_v35 = vmul.f32 %v3102_v51, %v8629_v30  ;;  %v3116_v63 = vmul.f32 %v3102_v51, %v8611_v52 }
 0x2da   : > { %v3118_v59 = vmul.f32 %v3102_v51, %v8635_v13  ;;  %v3138_v45 = vrot.slane %v3104_v39, 1  ;;  %v3139_v1 = vrot.slane %v3106_v44, 1  ;;  %v3144_v24 = vrot.slane %v3108_v28, 1 }
 0x2db   : > { %v3145_v2 = vrot.slane %v3110_v18, 1  ;;  %v3150_v54 = vrot.slane %v3112_v58, 1  ;;  %v3151_v26 = vrot.slane %v3114_v35, 1  ;;  %v3156_v0 = vrot.slane %v3116_v63, 1 }
 0x2dc   : > { %v3157_v46 = vrot.slane %v3118_v59, 1  ;;  %v3140_v21 = vsel %vm715_vm1, %v3138_v45, %v3139_v1  ;;  %v3178_v17 = vmul.f32 %v3176_v5, %v9841_v31  ;;  %v3180_v22 = vmul.f32 %v3176_v5, %v9844_v6 }
 0x2dd   : > { %v3146_v12 = vsel %vm715_vm1, %v3144_v24, %v3145_v2  ;;  %v3152_v25 = vsel %vm715_vm1, %v3150_v54, %v3151_v26  ;;  %v3168_v47 = vadd.f32 %v3140_v21, %v3086_v9  ;;  %v3182_v10 = vmul.f32 %v3176_v5, %v8594_v49 }
 0x2de   : > { %v3158_v36 = vsel %vm715_vm1, %v3156_v0, %v3157_v46  ;;  %v3170_v62 = vadd.f32 %v3146_v12, %v3088_v29  ;;  %v3172_v15 = vadd.f32 %v3152_v25, %v3090_v8  ;;  %v3184_v50 = vmul.f32 %v3176_v5, %v8623_v42 }
 0x2df   : > { %v3174_v55 = vadd.f32 %v3158_v36, %v3092_v19  ;;  %v3186_v16 = vmul.f32 %v3176_v5, %v8605_v27  ;;  %v3188_v3 = vmul.f32 %v3176_v5, %v8629_v30  ;;  %v3190_v31 = vmul.f32 %v3176_v5, %v8611_v52 }
 0x2e0   : > { %v3192_v6 = vmul.f32 %v3176_v5, %v8635_v13  ;;  %v3212_v56 = vrot.slane %v3178_v17, 2  ;;  %v3213_v32 = vrot.slane %v3180_v22, 2  ;;  %v3218_v4 = vrot.slane %v3182_v10, 2 }
 0x2e1   : > { %v3219_v40 = vrot.slane %v3184_v50, 2  ;;  %v3224_v57 = vrot.slane %v3186_v16, 2  ;;  %v3225_v51 = vrot.slane %v3188_v3, 2  ;;  %v3230_v9 = vrot.slane %v3190_v31, 2 }
 0x2e2   : > { %v3231_v29 = vrot.slane %v3192_v6, 2  ;;  %v3214_v8 = vsel %vm790_vm2, %v3212_v56, %v3213_v32  ;;  %v3252_v39 = vmul.f32 %v3250_v7, %v8591_v34  ;;  %v3254_v44 = vmul.f32 %v3250_v7, %v8597_v38 }
 0x2e3   : > { %v3220_v19 = vsel %vm790_vm2, %v3218_v4, %v3219_v40  ;;  %v3226_v28 = vsel %vm790_vm2, %v3224_v57, %v3225_v51  ;;  %v3242_v18 = vadd.f32 %v3214_v8, %v3168_v47  ;;  %v3256_v59 = vmul.f32 %v3250_v7, %v8608_v23 }
 0x2e4   : > { %v3232_v5 = vsel %vm790_vm2, %v3230_v9, %v3231_v29  ;;  %v3244_v58 = vadd.f32 %v3220_v19, %v3170_v62  ;;  %v3246_v35 = vadd.f32 %v3226_v28, %v3172_v15  ;;  %v3258_v45 = vmul.f32 %v3250_v7, %v8614_v11 }
 0x2e5   : > { %v3248_v63 = vadd.f32 %v3232_v5, %v3174_v55  ;;  %v3260_v1 = vadd.f32 %v3252_v39, %v3242_v18  ;;  %v3270_v2 = vmul.f32 %v8648_v33, %v8591_v34  ;;  %v3272_v54 = vmul.f32 %v8648_v33, %v8620_v41 }
 0x2e6   : > { %v3262_v24 = vadd.f32 %v3254_v44, %v3244_v58  ;;  %v3264_v26 = vadd.f32 %v3256_v59, %v3246_v35  ;;  %v3274_v46 = vmul.f32 %v8648_v33, %v8597_v38  ;;  %v3276_v21 = vmul.f32 %v8648_v33, %v8626_v37 }
 0x2e7   : > { %v3266_v0 = vadd.f32 %v3258_v45, %v3248_v63  ;;  %v3278_v12 = vmul.f32 %v8648_v33, %v8608_v23  ;;  %v3280_v7 = vmul.f32 %v8648_v33, %v8632_v14  ;;  %v3282_v17 = vmul.f32 %v8648_v33, %v8614_v11 }
 0x2e8   : > { %v3284_v22 = vmul.f32 %v8648_v33, %v8638_v60  ;;  %v3304_v25 = vrot.slane %v3270_v2, 1  ;;  %v3305_v36 = vrot.slane %v3272_v54, 1  ;;  %v3310_v47 = vrot.slane %v3274_v46, 1 }
 0x2e9   : > { %v3311_v62 = vrot.slane %v3276_v21, 1  ;;  %v3316_v15 = vrot.slane %v3278_v12, 1  ;;  %v3317_v55 = vrot.slane %v3280_v7, 1  ;;  %v3322_v10 = vrot.slane %v3282_v17, 1 }
 0x2ea   : > { %v3323_v50 = vrot.slane %v3284_v22, 1  ;;  %v3306_v16 = vsel %vm715_vm1, %v3304_v25, %v3305_v36  ;;  %v3344_v31 = vmul.f32 %v8651_v20, %v8591_v34  ;;  %v3346_v6 = vmul.f32 %v8651_v20, %v8620_v41 }
 0x2eb   : > { %v3312_v3 = vsel %vm715_vm1, %v3310_v47, %v3311_v62  ;;  %v3318_v33 = vsel %vm715_vm1, %v3316_v15, %v3317_v55  ;;  %v3334_v32 = vadd.f32 %v3306_v16, %v3260_v1  ;;  %v3348_v51 = vmul.f32 %v8651_v20, %v8597_v38 }
 0x2ec   : > { %v3324_v56 = vsel %vm715_vm1, %v3322_v10, %v3323_v50  ;;  %v3336_v4 = vadd.f32 %v3312_v3, %v3262_v24  ;;  %v3338_v40 = vadd.f32 %v3318_v33, %v3264_v26  ;;  %v3350_v9 = vmul.f32 %v8651_v20, %v8626_v37 }
 0x2ed   : > { %v3340_v57 = vadd.f32 %v3324_v56, %v3266_v0  ;;  %v3352_v34 = vmul.f32 %v8651_v20, %v8608_v23  ;;  %v3354_v41 = vmul.f32 %v8651_v20, %v8632_v14  ;;  %v3356_v29 = vmul.f32 %v8651_v20, %v8614_v11  ;;  %v6024_v23 = vld [vmem:[%s9739_s8 + $0x18] ss:$0 sm:$0xff] }
 0x2ee   : > { %v3358_v8 = vmul.f32 %v8651_v20, %v8638_v60  ;;  %v3378_v19 = vrot.slane %v3344_v31, 2  ;;  %v3379_v39 = vrot.slane %v3346_v6, 2  ;;  %v3384_v44 = vrot.slane %v3348_v51, 2 }
 0x2ef   : > { %v3385_v28 = vrot.slane %v3350_v9, 2  ;;  %v3390_v38 = vrot.slane %v3352_v34, 2  ;;  %v3391_v5 = vrot.slane %v3354_v41, 2  ;;  %v3396_v18 = vrot.slane %v3356_v29, 2 }
 0x2f0   : > { %v3397_v37 = vrot.slane %v3358_v8, 2  ;;  %v3380_v14 = vsel %vm790_vm2, %v3378_v19, %v3379_v39  ;;  %v3418_v11 = vmul.f32 %v8654_v61, %v8594_v49  ;;  %v3420_v60 = vmul.f32 %v8654_v61, %v8605_v27 }
 0x2f1   : > { %v3386_v58 = vsel %vm790_vm2, %v3384_v44, %v3385_v28  ;;  %v3392_v20 = vsel %vm790_vm2, %v3390_v38, %v3391_v5  ;;  %v3408_v63 = vadd.f32 %v3380_v14, %v3334_v32  ;;  %v3422_v24 = vmul.f32 %v8654_v61, %v8611_v52 }
 0x2f2   : > { %v3398_v35 = vsel %vm790_vm2, %v3396_v18, %v3397_v37  ;;  %v3410_v59 = vadd.f32 %v3386_v58, %v3336_v4  ;;  %v3412_v45 = vadd.f32 %v3392_v20, %v3338_v40  ;;  %v3424_v2 = vmul.f32 %v8654_v61, %v8617_v53 }
 0x2f3   : > { %v3414_v1 = vadd.f32 %v3398_v35, %v3340_v57  ;;  %v3426_v54 = vadd.f32 %v3418_v11, %v3408_v63  ;;  %v3434_v0 = vperm.slane %v8602_v43, 7  ;;  %v3510_v46 = vmul.f32 %v6024_v23, %v8594_v49 }
 0x2f4   : > { %v3428_v26 = vadd.f32 %v3420_v60, %v3410_v59  ;;  %v3430_v21 = vadd.f32 %v3422_v24, %v3412_v45  ;;  %v3512_v7 = vmul.f32 %v6024_v23, %v8623_v42  ;;  %v3514_v17 = vmul.f32 %v6024_v23, %v8605_v27 }
 0x2f5   : > { %v3432_v12 = vadd.f32 %v3424_v2, %v3414_v1  ;;  %v3436_v22 = vmul.f32 %v3434_v0, %v8594_v49  ;;  %v3438_v25 = vmul.f32 %v3434_v0, %v8623_v42  ;;  %v3440_v36 = vmul.f32 %v3434_v0, %v8605_v27 }
 0x2f6   : > { %v3442_v61 = vmul.f32 %v3434_v0, %v8629_v30  ;;  %v3444_v47 = vmul.f32 %v3434_v0, %v8611_v52  ;;  %v3446_v43 = vmul.f32 %v3434_v0, %v8635_v13  ;;  %v3448_v62 = vmul.f32 %v3434_v0, %v8617_v53 }
 0x2f7   : > { %v3450_v15 = vmul.f32 %v3434_v0, %v8641_v48  ;;  %v3470_v55 = vrot.slane %v3436_v22, 1  ;;  %v3471_v10 = vrot.slane %v3438_v25, 1  ;;  %v3476_v50 = vrot.slane %v3440_v36, 1 }
 0x2f8   : > { %v3477_v16 = vrot.slane %v3442_v61, 1  ;;  %v3482_v3 = vrot.slane %v3444_v47, 1  ;;  %v3483_v49 = vrot.slane %v3446_v43, 1  ;;  %v3488_v31 = vrot.slane %v3448_v62, 1 }
 0x2f9   : > { %v3489_v42 = vrot.slane %v3450_v15, 1  ;;  %v3472_v27 = vsel %vm715_vm1, %v3470_v55, %v3471_v10  ;;  %v3516_v33 = vmul.f32 %v6024_v23, %v8629_v30  ;;  %v3518_v56 = vmul.f32 %v6024_v23, %v8611_v52 }
 0x2fa   : > { %v3478_v6 = vsel %vm715_vm1, %v3476_v50, %v3477_v16  ;;  %v3484_v32 = vsel %vm715_vm1, %v3482_v3, %v3483_v49  ;;  %v3500_v40 = vadd.f32 %v3472_v27, %v3426_v54  ;;  %v3520_v34 = vmul.f32 %v6024_v23, %v8635_v13  ;;  %v8781_v50 = vld [vmem:[%s9742_s11] sm:$0xff]  ;;  %v5945_v3 = vld [vmem:[%s9743_s12 + $0xec] sm:$0xf0]  ;;  %v5675_v27 = vld [vmem:[%s9743_s12 + $0xf0] sm:$0xf0] }
 0x2fb   : > { %v3490_v4 = vsel %vm715_vm1, %v3488_v31, %v3489_v42  ;;  %v3502_v57 = vadd.f32 %v3478_v6, %v3428_v26  ;;  %v3504_v51 = vadd.f32 %v3484_v32, %v3430_v21  ;;  %v3522_v41 = vmul.f32 %v6024_v23, %v8617_v53  ;;  %v5673_v16 = vld [vmem:[%s9743_s12 + $0xe0] sm:$0xf]  ;;  %v5943_v42 = vld [vmem:[%s9743_s12 + $0xe4] sm:$0xf] }
 0x2fc   : > { %v3506_v9 = vadd.f32 %v3490_v4, %v3432_v12  ;;  %v3524_v29 = vmul.f32 %v6024_v23, %v8641_v48  ;;  %v3544_v8 = vrot.slane %v3510_v46, 2  ;;  %v3545_v19 = vrot.slane %v3512_v7, 2  ;;  %v5657_v32 = vld [vmem:[%s9743_s12 + $0xc0] sm:$0xf]  ;;  %v5941_v4 = vld [vmem:[%s9743_s12 + $0xcc] sm:$0xf0] }
 0x2fd   : > { %v3550_v39 = vrot.slane %v3514_v17, 2  ;;  %v3551_v30 = vrot.slane %v3516_v33, 2  ;;  %v3556_v44 = vrot.slane %v3518_v56, 2  ;;  %v3557_v52 = vrot.slane %v3520_v34, 2  ;;  %v8806_v56 = vld [vmem:[%s9742_s11 + $0x8] sm:$0xff] }
 0x2fe   : > { %v3562_v28 = vrot.slane %v3522_v41, 2  ;;  %v3546_v38 = vsel %vm790_vm2, %v3544_v8, %v3545_v19  ;;  %v3563_v5 = vrot.slane %v3524_v29, 2  ;;  %v8790_v49 = vperm.slane %v8781_v50, 1  ;;  %v8801_v33 = vld [vmem:[%s9741_s10] ss:$2 sm:$0x3] }
 0x2ff   : > { %v3552_v18 = vsel %vm790_vm2, %v3550_v39, %v3551_v30  ;;  %v3558_v37 = vsel %vm790_vm2, %v3556_v44, %v3557_v52  ;;  %v3574_v14 = vadd.f32 %v3546_v38, %v3500_v40  ;;  %v5674_v31 = vor.u32 %v5945_v3, %v5673_v16  ;;  %9852 = vst [vmem:[#allocation16_spill] sm:$0xff] %v8806_v56  ;;  %v5939_v40 = vld [vmem:[%s9743_s12 + $0xc4] sm:$0xf]  ;;  %v5659_v41 = vld [vmem:[%s9743_s12 + $0xd0] sm:$0xf0] }
 0x300   : > { %v3564_v13 = vsel %vm790_vm2, %v3562_v28, %v3563_v5  ;;  %v3576_v53 = vadd.f32 %v3552_v18, %v3502_v57  ;;  %v3578_v58 = vadd.f32 %v3558_v37, %v3504_v51  ;;  %v5678_v6 = vor.u32 %v5943_v42, %v5675_v27  ;;  %v8820_v57 = vld [vmem:[%s9741_s10 + $0x1] ss:$2 sm:$0x3]  ;;  %v9853_v51 = vld [vmem:[#allocation13_spill] sm:$0xff]  ;;  %v5975_v39 = vld [vmem:[%s9743_s12 + $0x1e4] sm:$0xf] }
 0x301   : > { %v3580_v48 = vadd.f32 %v3564_v13, %v3506_v9  ;;  %v3590_v23 = vrot.slane %v3574_v14, 1  ;;  %v3606_v11 = vrot.slane %v3574_v14, 2  ;;  %v3622_v22 = vrot.slane %v3574_v14, 3  ;;  %4704 = vmatpush.bf16.msrb.mxu0 %v5674_v31  ;;  %v5801_v8 = vld [vmem:[%s9743_s12 + $0x1e0] sm:$0xf] }
 0x302   : > { %v3592_v60 = vrot.slane %v3576_v53, 1  ;;  %v3594_v20 = vrot.slane %v3578_v58, 1  ;;  %v3608_v35 = vrot.slane %v3576_v53, 2  ;;  %v3610_v63 = vrot.slane %v3578_v58, 2  ;;  %4732 = vmatpush.bf16.msrb.mxu2 %v5678_v6  ;;  %v5977_v19 = vld [vmem:[%s9743_s12 + $0x1ec] sm:$0xf0] }
 0x303   : > { %v3596_v59 = vrot.slane %v3580_v48, 1  ;;  %v3612_v45 = vrot.slane %v3580_v48, 2  ;;  %v3624_v1 = vrot.slane %v3576_v53, 3  ;;  %v3638_v24 = vsel %vm628_vm0, %v3574_v14, %v3590_v23  ;;  %v5803_v52 = vld [vmem:[%s9743_s12 + $0x1f0] sm:$0xf0] }
 0x304   : > { %v3640_v2 = vsel %vm628_vm0, %v3576_v53, %v3592_v60  ;;  %v3642_v54 = vsel %vm628_vm0, %v3578_v58, %v3594_v20  ;;  %v3628_v26 = vrot.slane %v3580_v48, 3  ;;  %v3646_v21 = vsel %vm1227_vm3, %v3638_v24, %v3606_v11  ;;  %v5641_v37 = vld [vmem:[%s9743_s12 + $0xa0] sm:$0xf]  ;;  %v5937_v14 = vld [vmem:[%s9743_s12 + $0xac] sm:$0xf0] }
 0x305   : > { %v3644_v0 = vsel %vm628_vm0, %v3580_v48, %v3596_v59  ;;  %v3648_v46 = vsel %vm1227_vm3, %v3640_v2, %v3608_v35  ;;  %v3650_v12 = vsel %vm1227_vm3, %v3642_v54, %v3610_v63  ;;  %v3626_v25 = vrot.slane %v3578_v58, 3  ;;  %v5935_v48 = vld [vmem:[%s9743_s12 + $0xa4] sm:$0xf]  ;;  %v5643_v23 = vld [vmem:[%s9743_s12 + $0xb0] sm:$0xf0] }
 0x306   : > { %v3652_v7 = vsel %vm1227_vm3, %v3644_v0, %v3612_v45  ;;  %v3656_v17 = vsel %vm1236_vm4, %v3648_v46, %v3624_v1  ;;  %v3654_v43 = vsel %vm1236_vm4, %v3646_v21, %v3622_v22  ;;  %v8824_v9 = vmul.f32 %v8790_v49, %v9853_v51  ;;  %v5785_v60 = vld [vmem:[%s9743_s12 + $0x1c0] sm:$0xf]  ;;  %v5973_v20 = vld [vmem:[%s9743_s12 + $0x1cc] sm:$0xf0]  ;;  %v5971_v35 = vld [vmem:[%s9743_s12 + $0x1c4] sm:$0xf] }
 0x307   : > { %v3660_v36 = vsel %vm1236_vm4, %v3652_v7, %v3628_v26  ;;  %v3664_v61 = vrot.slane %v3656_v17, 4  ;;  %v3658_v62 = vsel %vm1236_vm4, %v3650_v12, %v3626_v25  ;;  %v5658_v34 = vor.u32 %v5941_v4, %v5657_v32  ;;  %v5787_v2 = vld [vmem:[%s9743_s12 + $0x1d0] sm:$0xf0]  ;;  %v5625_v26 = vld [vmem:[%s9743_s12 + $0x80] sm:$0xf] }
 0x308   : > { %v3670_v47 = vrot.slane %v3660_v36, 4  ;;  %v5662_v29 = vor.u32 %v5939_v40, %v5659_v41  ;;  %v3929_v30 = vperm.slane %v8801_v33, 0  ;;  %v8840_v44 = vperm.slane %v8806_v56, 1  ;;  %v5933_v0 = vld [vmem:[%s9743_s12 + $0x8c] sm:$0xf0] }
 0x309   : > { %v3674_v15 = vsel %vm1257_vm5, %v3654_v43, %v3664_v61  ;;  %4705 = vmatpush.bf16.msrb.mxu0 %v5658_v34  ;;  %v3940_v28 = vperm.slane %v8820_v57, 0  ;;  %v8847_v38 = vperm.slane %v8781_v50, 0  ;;  %v5802_v5 = vor.u32 %v5977_v19, %v5801_v8  ;;  %v5931_v46 = vld [vmem:[%s9743_s12 + $0x84] sm:$0xf]  ;;  %v5627_v25 = vld [vmem:[%s9743_s12 + $0x90] sm:$0xf0] }
 0x30a   : > { %v3676_v55 = vsel %vm1257_vm5, %v3658_v62, %v3670_v47  ;;  %4733 = vmatpush.bf16.msrb.mxu2 %v5662_v29  ;;  %v5806_v18 = vor.u32 %v5975_v39, %v5803_v52  ;;  %v4032_v13 = vrot.slane %v8824_v9, 1  ;;  %v8857_v53 = vperm.slane %v8781_v50, 2  ;;  %v5769_v43 = vld [vmem:[%s9743_s12 + $0x1a0] sm:$0xf]  ;;  %v5969_v62 = vld [vmem:[%s9743_s12 + $0x1ac] sm:$0xf0] }
 0x30b   : > { %v3678_v10 = vpack.c.bf16 %v3676_v55, %v3674_v15  ;;  %v5642_v58 = vor.u32 %v5937_v14, %v5641_v37  ;;  %4718 = vmatpush.bf16.msrb.mxu1 %v5802_v5  ;;  %v5646_v11 = vor.u32 %v5935_v48, %v5643_v23  ;;  %v8875_v59 = vperm.slane %v8806_v56, 0  ;;  %v5967_v15 = vld [vmem:[%s9743_s12 + $0x1a4] sm:$0xf]  ;;  %v5771_v31 = vld [vmem:[%s9743_s12 + $0x1b0] sm:$0xf0] }
 0x30c   : > { %4746 = vmatpush.bf16.msrb.mxu3 %v5806_v18  ;;  %v4017_v45 = vmul.f32 %v8840_v44, %v9853_v51  ;;  %v8880_v1 = vperm.slane %v8806_v56, 2  ;;  %v5786_v24 = vor.u32 %v5973_v20, %v5785_v60  ;;  %v5790_v54 = vor.u32 %v5971_v35, %v5787_v2  ;;  %v5609_v6 = vld [vmem:[%s9743_s12 + $0x60] sm:$0xf]  ;;  %v5929_v32 = vld [vmem:[%s9743_s12 + $0x6c] sm:$0xf0] }
 0x30d   : > { %3893 = vmatmul.bf16.vlgmr.msra.gmra.mxu1 %v3678_v10  ;;  %3921 = vmatmul.bf16.vlgmr.msra.gmra.mxu3 %v3678_v10  ;;  %v8896_v12 = vmul.f32 %v8857_v53, %v9853_v51  ;;  %v8899_v7 = vperm.slane %v8781_v50, 3  ;;  %v8902_v17 = vperm.slane %v8781_v50, 4  ;;  %v5626_v22 = vor.u32 %v5933_v0, %v5625_v26  ;;  %v5927_v4 = vld [vmem:[%s9743_s12 + $0x64] sm:$0xf]  ;;  %v5611_v8 = vld [vmem:[%s9743_s12 + $0x70] sm:$0xf0] }
 0x30e   : > { %4706 = vmatpush.bf16.msrb.mxu0 %v5642_v58  ;;  %4734 = vmatpush.bf16.msrb.mxu2 %v5646_v11  ;;  %v3998_v61 = vmul.f32 %v8847_v38, %v9853_v51  ;;  %v5630_v47 = vor.u32 %v5931_v46, %v5627_v25  ;;  %v3999_v55 = vmul.f32 %v8875_v59, %v9853_v51  ;;  %v4033_v10 = vrot.slane %v4017_v45, 1  ;;  %v5753_v5 = vld [vmem:[%s9743_s12 + $0x180] sm:$0xf]  ;;  %v5965_v18 = vld [vmem:[%s9743_s12 + $0x18c] sm:$0xf0] }
 0x30f   : > { %4719 = vmatpush.bf16.msrb.mxu1 %v5786_v24  ;;  %v4059_v16 = vmul.f32 %v8880_v1, %v9853_v51  ;;  %v5770_v3 = vor.u32 %v5969_v62, %v5769_v43  ;;  %v5774_v27 = vor.u32 %v5967_v15, %v5771_v31  ;;  %v4074_v40 = vrot.slane %v8896_v12, 2  ;;  %v5963_v37 = vld [vmem:[%s9743_s12 + $0x184] sm:$0xf]  ;;  %v5755_v11 = vld [vmem:[%s9743_s12 + $0x190] sm:$0xf0] }
 0x310   : > { %4747 = vmatpush.bf16.msrb.mxu3 %v5790_v54  ;;  %v8938_v9 = vperm.slane %v8781_v50, 5  ;;  %v3930_v41 = vperm.slane %v8801_v33, 1  ;;  %v5610_v29 = vor.u32 %v5929_v32, %v5609_v6  ;;  %v4048_v39 = vadd.f32 %v4032_v13, %v3998_v61  ;;  %v5593_v45 = vld [vmem:[%s9743_s12 + $0x40] sm:$0xf]  ;;  %v5925_v24 = vld [vmem:[%s9743_s12 + $0x4c] sm:$0xf0] }
 0x311   : > { %v5614_v52 = vor.u32 %v5927_v4, %v5611_v8  ;;  %v3941_v58 = vperm.slane %v8820_v57, 1  ;;  %v4049_v48 = vadd.f32 %v4033_v10, %v3999_v55  ;;  %v4075_v13 = vrot.slane %v4059_v16, 2  ;;  %v5595_v12 = vld [vmem:[%s9743_s12 + $0x50] sm:$0xf0]  ;;  %v5961_v43 = vld [vmem:[%s9743_s12 + $0x16c] sm:$0xf0] }
 0x312   : > { %4707 = vmatpush.bf16.msrb.mxu0 %v5626_v22  ;;  %4735 = vmatpush.bf16.msrb.mxu2 %v5630_v47  ;;  %v5754_v23 = vor.u32 %v5965_v18, %v5753_v5  ;;  %v8960_v35 = vperm.slane %v8806_v56, 3  ;;  %v8969_v54 = vperm.slane %v8806_v56, 4  ;;  %v8972_v26 = vperm.slane %v8806_v56, 5  ;;  %v5737_v47 = vld [vmem:[%s9743_s12 + $0x160] sm:$0xf] }
 0x313   : > { %4720 = vmatpush.bf16.msrb.mxu1 %v5770_v3  ;;  %v5594_v46 = vor.u32 %v5925_v24, %v5593_v45  ;;  %v4090_v62 = vadd.f32 %v4074_v40, %v4048_v39  ;;  %v8988_v15 = vadd.f32 %v4075_v13, %v4049_v48  ;;  %v5738_v10 = vor.u32 %v5961_v43, %v5737_v47  ;;  %v5959_v16 = vld [vmem:[%s9743_s12 + $0x164] sm:$0xf]  ;;  %v5739_v3 = vld [vmem:[%s9743_s12 + $0x170] sm:$0xf0]  ;;  %v5577_v31 = vld [vmem:[%s9743_s12 + $0x20] sm:$0xf] }
 0x314   : > { %4748 = vmatpush.bf16.msrb.mxu3 %v5774_v27  ;;  %v5921_v4 = vld [vmem:[%s9743_s12 + $0x2c] sm:$0xf0]  ;;  %v9010_v8 = vperm.slane %v8781_v50, 6  ;;  %v5919_v5 = vld [vmem:[%s9743_s12 + $0x24] sm:$0xf] }
 0x315   : > { %v5579_v18 = vld [vmem:[%s9743_s12 + $0x30] sm:$0xf0]  ;;  %v5667_v57 = vld [vmem:[%s9743_s12 + $0xd8] sm:$0xf0] }
 0x316   : > { %4708 = vmatpush.bf16.msrb.mxu0 %v5610_v29  ;;  %4736 = vmatpush.bf16.msrb.mxu2 %v5614_v52  ;;  %v5578_v29 = vor.u32 %v5921_v4, %v5577_v31  ;;  %v5582_v47 = vor.u32 %v5919_v5, %v5579_v18 }
 0x317   : > { %4721 = vmatpush.bf16.msrb.mxu1 %v5754_v23 }
 0x31a   : > { %4709 = vmatpush.bf16.msrb.mxu0 %v5594_v46 }
 0x31b   : > { %4722 = vmatpush.bf16.msrb.mxu1 %v5738_v10 }
 0x31e   : > { %4710 = vmatpush.bf16.msrb.mxu0 %v5578_v29 }
 0x34f   : > { %v3880_v63 = vpop.f32.mrf.mxu0 }
 0x355   : > { %v3908_v34 = vpop.f32.mrf.mxu2 }
 0x357   : > { %v3882_v2 = vpop.f32.mrf.mxu0 }
 0x35d   : > { %v3910_v23 = vpop.f32.mrf.mxu2 }
 0x38a   : > { %v3894_v21 = vpop.f32.mrf.mxu1 }
 0x38b   : > { %v3895_v36 = vadd.f32 %v3894_v21, %v3880_v63  ;;  %v5758_v63 = vor.u32 %v5963_v37, %v5755_v11  ;;  %v5923_v21 = vld [vmem:[%s9743_s12 + $0x44] sm:$0xf] }
 0x38c   : > { %v5598_v55 = vor.u32 %v5923_v21, %v5595_v12  ;;  %v5978_v21 = vld [vmem:[%s9743_s12 + $0x1f4] sm:$0xf0] }
 0x38d   : > { %v3933_v42 = vmul.f32 %v3929_v30, %v3895_v36  ;;  %4749 = vmatpush.bf16.msrb.mxu3 %v5758_v63 }
 0x38e   : > { %4737 = vmatpush.bf16.msrb.mxu2 %v5598_v55 }
 0x38f   : > { %v3944_v19 = vadd.f32 %v3940_v28, %v3933_v42 }
 0x390   : > { %v3922_v14 = vpop.f32.mrf.mxu3 }
 0x391   : > { %v3948_v60 = vmax.f32 %v3944_v19, 0.0  ;;  %v3923_v20 = vadd.f32 %v3922_v14, %v3908_v34  ;;  %v5742_v34 = vor.u32 %v5959_v16, %v5739_v3 }
 0x392   : > { %v3896_v0 = vpop.f32.mrf.mxu1  ;;  %4738 = vmatpush.bf16.msrb.mxu2 %v5582_v47  ;;  %v5707_v47 = vld [vmem:[%s9743_s12 + $0x130] sm:$0xf0] }
 0x393   : > { %v3964_v22 = vrot.slane %v3948_v60, 7  ;;  %v5555_v25 = vrot.slane %v3948_v60, 11  ;;  %v3934_v36 = vmul.f32 %v3930_v41, %v3923_v20  ;;  %v3897_v61 = vadd.f32 %v3896_v0, %v3882_v2  ;;  %4750 = vmatpush.bf16.msrb.mxu3 %v5742_v34  ;;  %v5721_v60 = vld [vmem:[%s9743_s12 + $0x140] sm:$0xf]  ;;  %v5957_v20 = vld [vmem:[%s9743_s12 + $0x14c] sm:$0xf0] }
 0x394   : > { %v5723_v0 = vld [vmem:[%s9743_s12 + $0x150] sm:$0xf0]  ;;  %v5722_v10 = vor.u32 %v5957_v20, %v5721_v60 }
 0x395   : > { %v3980_v42 = vsel %vm628_vm0, 0.0, %v3964_v22  ;;  %v3982_v27 = vsel %vm628_vm0, 0.0, %v5555_v25  ;;  %v3945_v6 = vadd.f32 %v3941_v58, %v3934_v36  ;;  %v3935_v32 = vmul.f32 %v3929_v30, %v3897_v61 }
 0x396   : > { %v3988_v40 = vsel %vm1573_vm6, %v3980_v42, 0.0  ;;  %v9013_v19 = vsel %vm1573_vm6, %v3982_v27, 0.0  ;;  %4723 = vmatpush.bf16.msrb.mxu1 %v5722_v10 }
 0x397   : > { %v4018_v39 = vmul.f32 %v8790_v49, %v3988_v40  ;;  %v4060_v52 = vmul.f32 %v8857_v53, %v3988_v40  ;;  %v4100_v30 = vmul.f32 %v8899_v7, %v3988_v40  ;;  %v9025_v37 = vmul.f32 %v8902_v17, %v3988_v40 }
 0x398   : > { %v9028_v14 = vmul.f32 %v8938_v9, %v3988_v40  ;;  %v3949_v48 = vmax.f32 %v3945_v6, 0.0  ;;  %v3946_v13 = vadd.f32 %v3940_v28, %v3935_v32  ;;  %v3924_v11 = vpop.f32.mrf.mxu3  ;;  %v4000_v63 = vmul.f32 %v8847_v38, %v3988_v40  ;;  %v5955_v28 = vld [vmem:[%s9743_s12 + $0x144] sm:$0xf] }
 0x399   : > { %v4034_v45 = vrot.slane %v4018_v39, 1  ;;  %v4076_v24 = vrot.slane %v4060_v52, 2  ;;  %v3925_v2 = vadd.f32 %v3924_v11, %v3910_v23  ;;  %v9045_v46 = vadd.f32 %v4100_v30, %v4090_v62  ;;  %v5917_v39 = vld [vmem:[%s9743_s12 + $0xc] sm:$0xf0] }
 0x39a   : > { %v3965_v12 = vrot.slane %v3949_v48, 7  ;;  %v5556_v22 = vrot.slane %v3949_v48, 11  ;;  %v3950_v61 = vmax.f32 %v3946_v13, 0.0  ;;  %v5726_v16 = vor.u32 %v5955_v28, %v5723_v0  ;;  %v5915_v48 = vld [vmem:[%s9743_s12 + $0x4] sm:$0xf] }
 0x39b   : > { %v4050_v25 = vadd.f32 %v4034_v45, %v4000_v63  ;;  %v3936_v42 = vmul.f32 %v3930_v41, %v3925_v2  ;;  %v5561_v41 = vld [vmem:[%s9743_s12] sm:$0xf]  ;;  %v5563_v13 = vld [vmem:[%s9743_s12 + $0x10] sm:$0xf0]  ;;  %v5681_v63 = vld [vmem:[%s9743_s12 + $0xe8] sm:$0xf] }
 0x39c   : > { %v3981_v43 = vsel %vm628_vm0, 0.0, %v3965_v12  ;;  %v3983_v55 = vsel %vm628_vm0, 0.0, %v5556_v22  ;;  %v3968_v31 = vrot.slane %v3950_v61, 7  ;;  %v5557_v29 = vrot.slane %v3950_v61, 11  ;;  %4751 = vmatpush.bf16.msrb.mxu3 %v5726_v16  ;;  %v5946_v45 = vld [vmem:[%s9743_s12 + $0xf4] sm:$0xf0] }
 0x39d   : > { %v9051_v3 = vadd.f32 %v4076_v24, %v4050_v25  ;;  %v3989_v62 = vsel %vm1573_vm6, %v3981_v43, 0.0  ;;  %v9057_v27 = vsel %vm1573_vm6, %v3983_v55, 0.0  ;;  %v5944_v24 = vld [vmem:[%s9743_s12 + $0xec] sm:$0xf]  ;;  %v5705_v2 = vld [vmem:[%s9743_s12 + $0x120] sm:$0xf]  ;;  %v3947_v16 = vadd.f32 %v3941_v58, %v3936_v42 }
 0x39e   : > { %v4019_v6 = vmul.f32 %v8840_v44, %v3989_v62  ;;  %v4061_v32 = vmul.f32 %v8880_v1, %v3989_v62  ;;  %v4101_v4 = vmul.f32 %v8960_v35, %v3989_v62  ;;  %v9063_v40 = vmul.f32 %v8969_v54, %v3989_v62  ;;  %v5953_v28 = vld [vmem:[%s9743_s12 + $0x12c] sm:$0xf0]  ;;  %v5951_v61 = vld [vmem:[%s9743_s12 + $0x124] sm:$0xf] }
 0x39f   : > { %v9066_v34 = vmul.f32 %v8972_v26, %v3989_v62  ;;  %v3984_v33 = vsel %vm628_vm0, 0.0, %v3968_v31  ;;  %v4001_v52 = vmul.f32 %v8875_v59, %v3989_v62  ;;  %v3986_v20 = vsel %vm628_vm0, 0.0, %v5557_v29  ;;  %v9137_v62 = vld [vmem:[%s9743_s12 + $0xc8] sm:$0xf]  ;;  %v9142_v31 = vld [vmem:[%s9743_s12 + $0xd4] sm:$0xf0] }
 0x3a0   : > { %9854 = vst [vmem:[#allocation17_spill] sm:$0xff] %v9063_v40  ;;  %v4035_v30 = vrot.slane %v4019_v6, 1  ;;  %v4077_v5 = vrot.slane %v4061_v32, 2  ;;  %v9077_v18 = vsel %vm1573_vm6, %v3984_v33, 0.0  ;;  %v9086_v23 = vadd.f32 %v4101_v4, %v8988_v15  ;;  %v5683_v15 = vld [vmem:[%s9743_s12 + $0xf8] sm:$0xf0] }
 0x3a1   : > { %9855 = vst [vmem:[#allocation23_spill] sm:$0xff] %v9066_v34  ;;  %v9110_v12 = vsel %vm1573_vm6, %v3986_v20, 0.0  ;;  %v4022_v22 = vmul.f32 %v8790_v49, %v9077_v18  ;;  %v4064_v25 = vmul.f32 %v8857_v53, %v9077_v18  ;;  %v4004_v43 = vmul.f32 %v8847_v38, %v9077_v18  ;;  %v9147_v6 = vld [vmem:[%s9743_s12 + $0xcc] sm:$0xf]  ;;  %v9159_v29 = vld [vmem:[%s9743_s12 + $0x100] sm:$0xf] }
 0x3a2   : > { %9856 = vst [vmem:[#allocation22_spill] sm:$0xff] %v9086_v23  ;;  %v4051_v0 = vadd.f32 %v4035_v30, %v4001_v52  ;;  %v9126_v55 = vmul.f32 %v8902_v17, %v9110_v12  ;;  %v9130_v10 = vmul.f32 %v8938_v9, %v9110_v12  ;;  %v4106_v32 = vmul.f32 %v8899_v7, %v9110_v12  ;;  %v9164_v33 = vld [vmem:[%s9743_s12 + $0x10c] sm:$0xf0]  ;;  %v9169_v52 = vld [vmem:[%s9743_s12 + $0x104] sm:$0xf] }
 0x3a3   : > { %v4038_v42 = vrot.slane %v4022_v22, 1  ;;  %v5562_v4 = vor.u32 %v5917_v39, %v5561_v41  ;;  %v5691_v30 = vld [vmem:[%s9743_s12 + $0x110] sm:$0xf0]  ;;  %v4080_v41 = vrot.slane %v4064_v25, 2  ;;  %v5566_v20 = vor.u32 %v5915_v48, %v5563_v13  ;;  %v5976_v25 = vld [vmem:[%s9743_s12 + $0x1ec] sm:$0xf] }
 0x3a4   : > { %v9152_v58 = vadd.f32 %v4077_v5, %v4051_v0  ;;  %v3951_v5 = vmax.f32 %v3947_v16, 0.0  ;;  %v5809_v0 = vld [vmem:[%s9743_s12 + $0x1e8] sm:$0xf]  ;;  %v5682_v60 = vor.u32 %v5946_v45, %v5681_v63  ;;  %v5686_v11 = vor.u32 %v5944_v24, %v5683_v15  ;;  %v5811_v48 = vld [vmem:[%s9743_s12 + $0x1f8] sm:$0xf0] }
 0x3a5   : > { %v4054_v22 = vadd.f32 %v4038_v42, %v4004_v43  ;;  %4711 = vmatpush.bf16.msrb.mxu0 %v5562_v4  ;;  %v5706_v36 = vor.u32 %v5953_v28, %v5705_v2  ;;  %4739 = vmatpush.bf16.msrb.mxu2 %v5566_v20  ;;  %v5710_v63 = vor.u32 %v5951_v61, %v5707_v47  ;;  %v5649_v45 = vld [vmem:[%s9743_s12 + $0xa8] sm:$0xf]  ;;  %v5938_v28 = vld [vmem:[%s9743_s12 + $0xb4] sm:$0xf0]  ;;  %v5936_v61 = vld [vmem:[%s9743_s12 + $0xac] sm:$0xf] }
 0x3a6   : > { %9857 = vst [vmem:[#allocation24_spill] sm:$0xff] %v9152_v58  ;;  %v3969_v16 = vrot.slane %v3951_v5, 7  ;;  %v5558_v43 = vrot.slane %v3951_v5, 11  ;;  %v5666_v15 = vor.u32 %v9142_v31, %v9137_v62  ;;  %v5670_v2 = vor.u32 %v9147_v6, %v5667_v57  ;;  %v5651_v47 = vld [vmem:[%s9743_s12 + $0xb8] sm:$0xf0] }
 0x3a7   : > { %v4096_v24 = vadd.f32 %v4080_v41, %v4054_v22  ;;  %4724 = vmatpush.bf16.msrb.mxu1 %v5706_v36  ;;  %4752 = vmatpush.bf16.msrb.mxu3 %v5710_v63  ;;  %v5690_v62 = vor.u32 %v9164_v33, %v9159_v29  ;;  %v5694_v31 = vor.u32 %v9169_v52, %v5691_v30  ;;  %v5793_v6 = vld [vmem:[%s9743_s12 + $0x1c8] sm:$0xf]  ;;  %v5974_v57 = vld [vmem:[%s9743_s12 + $0x1d4] sm:$0xf0]  ;;  %v5972_v42 = vld [vmem:[%s9743_s12 + $0x1cc] sm:$0xf] }
 0x3a8   : > { %v5795_v36 = vld [vmem:[%s9743_s12 + $0x1d8] sm:$0xf0]  ;;  %v5810_v33 = vor.u32 %v5978_v21, %v5809_v0  ;;  %v5814_v52 = vor.u32 %v5976_v25, %v5811_v48  ;;  %v5633_v30 = vld [vmem:[%s9743_s12 + $0x88] sm:$0xf]  ;;  %v5934_v41 = vld [vmem:[%s9743_s12 + $0x94] sm:$0xf0] }
 0x3a9   : > { %4760 = vmatpush.bf16.msra.mxu0 %v5682_v60  ;;  %4788 = vmatpush.bf16.msra.mxu2 %v5686_v11  ;;  %v3985_v60 = vsel %vm628_vm0, 0.0, %v3969_v16  ;;  %v3987_v11 = vsel %vm628_vm0, 0.0, %v5558_v43  ;;  %v4114_v5 = vadd.f32 %v4106_v32, %v4096_v24  ;;  %v5932_v21 = vld [vmem:[%s9743_s12 + $0x8c] sm:$0xf]  ;;  %v5635_v0 = vld [vmem:[%s9743_s12 + $0x98] sm:$0xf0]  ;;  %v5650_v43 = vor.u32 %v5938_v28, %v5649_v45 }
 0x3aa   : > { %v9221_v4 = vsel %vm1573_vm6, %v3985_v60, 0.0  ;;  %v9224_v29 = vsel %vm1573_vm6, %v3987_v11, 0.0  ;;  %v5777_v32 = vld [vmem:[%s9743_s12 + $0x1a8] sm:$0xf]  ;;  %v5970_v63 = vld [vmem:[%s9743_s12 + $0x1b4] sm:$0xf0]  ;;  %v5654_v45 = vor.u32 %v5936_v61, %v5651_v47  ;;  %v5794_v28 = vor.u32 %v5974_v57, %v5793_v6 }
 0x3ab   : > { %v4005_v20 = vmul.f32 %v8875_v59, %v9221_v4  ;;  %v4023_v22 = vmul.f32 %v8840_v44, %v9221_v4  ;;  %v4065_v16 = vmul.f32 %v8880_v1, %v9221_v4  ;;  %v4107_v25 = vmul.f32 %v8960_v35, %v9224_v29  ;;  %v5968_v24 = vld [vmem:[%s9743_s12 + $0x1ac] sm:$0xf]  ;;  %v5779_v60 = vld [vmem:[%s9743_s12 + $0x1b8] sm:$0xf0]  ;;  %4725 = vmatpush.bf16.msrb.mxu1 %v5690_v62 }
 0x3ac   : > { %v9251_v48 = vmul.f32 %v8969_v54, %v9224_v29  ;;  %v9264_v13 = vmul.f32 %v8972_v26, %v9224_v29  ;;  %4753 = vmatpush.bf16.msrb.mxu3 %v5694_v31  ;;  %v5798_v39 = vor.u32 %v5972_v42, %v5795_v36  ;;  %v5634_v56 = vor.u32 %v5934_v41, %v5633_v30 }
 0x3ad   : > { %4761 = vmatpush.bf16.msra.mxu0 %v5666_v15  ;;  %4789 = vmatpush.bf16.msra.mxu2 %v5670_v2  ;;  %v4039_v11 = vrot.slane %v4023_v22, 1  ;;  %v4218_v15 = vperm.slane %v8781_v50, 7  ;;  %v4081_v2 = vrot.slane %v4065_v16, 2  ;;  %v5638_v40 = vor.u32 %v5932_v21, %v5635_v0 }
 0x3ae   : > { %v5778_v23 = vor.u32 %v5970_v63, %v5777_v32  ;;  %v5782_v58 = vor.u32 %v5968_v24, %v5779_v60  ;;  %v4141_v22 = vrot.slane %v9251_v48, 1  ;;  %v4002_v62 = vmul.f32 %v8847_v38, %v9013_v19  ;;  %v5617_v24 = vld [vmem:[%s9743_s12 + $0x68] sm:$0xf]  ;;  %v5930_v60 = vld [vmem:[%s9743_s12 + $0x74] sm:$0xf0] }
 0x3af   : > { %4774 = vmatpush.bf16.msra.mxu1 %v5810_v33  ;;  %v4055_v34 = vadd.f32 %v4039_v11, %v4005_v20  ;;  %v4020_v50 = vmul.f32 %v8790_v49, %v9013_v19  ;;  %v4062_v61 = vmul.f32 %v8857_v53, %v9013_v19  ;;  %v4102_v31 = vmul.f32 %v8899_v7, %v9013_v19 }
 0x3b0   : > { %4802 = vmatpush.bf16.msra.mxu3 %v5814_v52  ;;  %v4104_v6 = vmul.f32 %v8899_v7, %v9077_v18  ;;  %v4120_v57 = vmul.f32 %v8902_v17, %v9013_v19  ;;  %v4122_v49 = vmul.f32 %v8902_v17, %v9077_v18  ;;  %v9858_v53 = vrot.slane %v9025_v37, 1 }
 0x3b1   : > { %4762 = vmatpush.bf16.msra.mxu0 %v5650_v43  ;;  %4790 = vmatpush.bf16.msra.mxu2 %v5654_v45  ;;  %v4097_v47 = vadd.f32 %v4081_v2, %v4055_v34  ;;  %v4036_v42 = vrot.slane %v4020_v50, 1  ;;  %v4078_v38 = vrot.slane %v4062_v61, 2  ;;  %v4110_v33 = vadd.f32 %v4102_v31, %v9051_v3 }
 0x3b2   : > { %v4150_v34 = vadd.f32 %v9858_v53, %v9045_v46  ;;  %v4136_v52 = vrot.slane %v4120_v57, 1  ;;  %v9859_v7 = vrot.slane %v9126_v55, 1  ;;  %v4138_v41 = vrot.slane %v4122_v49, 1  ;;  %v5964_v49 = vld [vmem:[%s9743_s12 + $0x18c] sm:$0xf] }
 0x3b3   : > { %4775 = vmatpush.bf16.msra.mxu1 %v5794_v28  ;;  %v9285_v36 = vadd.f32 %v4107_v25, %v4097_v47  ;;  %v4162_v20 = vmul.f32 %v8938_v9, %v9013_v19  ;;  %v4164_v17 = vmul.f32 %v8938_v9, %v9077_v18  ;;  %v9860_v46 = vrot.slane %v9028_v14, 2  ;;  %v5928_v28 = vld [vmem:[%s9743_s12 + $0x6c] sm:$0xf]  ;;  %v5763_v53 = vld [vmem:[%s9743_s12 + $0x198] sm:$0xf0] }
 0x3b4   : > { %4803 = vmatpush.bf16.msra.mxu3 %v5798_v39  ;;  %v4156_v30 = vadd.f32 %v9859_v7, %v4114_v5  ;;  %v4052_v39 = vadd.f32 %v4036_v42, %v4002_v62  ;;  %v4152_v37 = vadd.f32 %v4136_v52, %v4110_v33  ;;  %v9861_v3 = vrot.slane %v9130_v10, 2  ;;  %v5619_v62 = vld [vmem:[%s9743_s12 + $0x78] sm:$0xf0] }
 0x3b5   : > { %4763 = vmatpush.bf16.msra.mxu0 %v5634_v56  ;;  %4791 = vmatpush.bf16.msra.mxu2 %v5638_v40  ;;  %v4192_v16 = vadd.f32 %v9860_v46, %v4150_v34  ;;  %v4202_v55 = vmul.f32 %v9010_v8, %v9013_v19  ;;  %v6025_v56 = vld [vmem:[%s9742_s11 + $0x10] ss:$0 sm:$0xff]  ;;  %v4178_v5 = vrot.slane %v4162_v20, 2  ;;  %v4180_v0 = vrot.slane %v4164_v17, 2  ;;  %v5924_v17 = vld [vmem:[%s9743_s12 + $0x4c] sm:$0xf] }
 0x3b6   : > { %v4198_v21 = vadd.f32 %v9861_v3, %v4156_v30  ;;  %v4094_v40 = vadd.f32 %v4078_v38, %v4052_v39  ;;  %v4204_v9 = vmul.f32 %v9010_v8, %v9077_v18  ;;  %v4206_v14 = vmul.f32 %v9010_v8, %v9110_v12  ;;  %v5601_v30 = vld [vmem:[%s9743_s12 + $0x48] sm:$0xf] }
 0x3b7   : > { %4776 = vmatpush.bf16.msra.mxu1 %v5778_v23  ;;  %v4208_v10 = vmul.f32 %v9010_v8, %v9853_v51  ;;  %v4210_v32 = vadd.f32 %v4202_v55, %v4192_v16  ;;  %v4220_v25 = vmul.f32 %v4218_v15, %v9013_v19  ;;  %v4194_v63 = vadd.f32 %v4178_v5, %v4152_v37  ;;  %v5603_v37 = vld [vmem:[%s9743_s12 + $0x58] sm:$0xf0] }
 0x3b8   : > { %4804 = vmatpush.bf16.msra.mxu3 %v5782_v58  ;;  %v4112_v43 = vadd.f32 %v4104_v6, %v4094_v40  ;;  %v4222_v23 = vmul.f32 %v4218_v15, %v9077_v18  ;;  %v4224_v58 = vmul.f32 %v4218_v15, %v9110_v12  ;;  %v4226_v8 = vmul.f32 %v4218_v15, %v9853_v51  ;;  %v5761_v6 = vld [vmem:[%s9743_s12 + $0x188] sm:$0xf] }
 0x3b9   : > { %v4216_v11 = vadd.f32 %v4208_v10, %v4198_v21  ;;  %v4236_v45 = vrot.slane %v4220_v25, 1  ;;  %v4262_v2 = vmul.f32 %v6025_v56, %v9013_v19  ;;  %v4212_v61 = vadd.f32 %v4204_v9, %v4194_v63  ;;  %v5966_v19 = vld [vmem:[%s9743_s12 + $0x194] sm:$0xf0] }
 0x3ba   : > { %v4154_v50 = vadd.f32 %v4138_v41, %v4112_v43  ;;  %v4238_v47 = vrot.slane %v4222_v23, 1  ;;  %v4240_v31 = vrot.slane %v4224_v58, 1  ;;  %v4242_v15 = vrot.slane %v4226_v8, 1 }
 0x3bb   : > { %v4252_v57 = vadd.f32 %v4236_v45, %v4210_v32  ;;  %v4264_v42 = vmul.f32 %v6025_v56, %v9077_v18  ;;  %v4266_v38 = vmul.f32 %v6025_v56, %v9110_v12  ;;  %v4268_v52 = vmul.f32 %v6025_v56, %v9853_v51  ;;  %v5926_v18 = vld [vmem:[%s9743_s12 + $0x54] sm:$0xf0] }
 0x3bc   : > { %v4196_v34 = vadd.f32 %v4180_v0, %v4154_v50  ;;  %v4254_v33 = vadd.f32 %v4238_v47, %v4212_v61  ;;  %v4278_v7 = vrot.slane %v4262_v2, 2  ;;  %v4258_v12 = vadd.f32 %v4242_v15, %v4216_v11  ;;  %v9864_v50 = vld [vmem:[#allocation17_spill] sm:$0xff] }
 0x3bd   : > { %v4280_v39 = vrot.slane %v4264_v42, 2  ;;  %v4282_v41 = vrot.slane %v4266_v38, 2  ;;  %v5618_v20 = vor.u32 %v5930_v60, %v5617_v24  ;;  %v4284_v16 = vrot.slane %v4268_v52, 2 }
 0x3be   : > { %v4214_v46 = vadd.f32 %v4206_v14, %v4196_v34  ;;  %v4294_v3 = vadd.f32 %v4278_v7, %v4252_v57  ;;  %v5622_v21 = vor.u32 %v5928_v28, %v5619_v62  ;;  %v5762_v56 = vor.u32 %v5966_v19, %v5761_v6  ;;  %v9863_v62 = vld [vmem:[#allocation22_spill] sm:$0xff]  ;;  %v6026_v7 = vld [vmem:[%s9742_s11 + $0x18] ss:$0 sm:$0xff] }
 0x3bf   : > { %v4296_v55 = vadd.f32 %v4280_v39, %v4254_v33  ;;  %4764 = vmatpush.bf16.msra.mxu0 %v5618_v20  ;;  %v5766_v40 = vor.u32 %v5964_v49, %v5763_v53  ;;  %v5602_v5 = vor.u32 %v5926_v18, %v5601_v30  ;;  %v4300_v9 = vadd.f32 %v4284_v16, %v4258_v12  ;;  %v9866_v53 = vld [vmem:[#allocation23_spill] sm:$0xff] }
 0x3c0   : > { %v4256_v0 = vadd.f32 %v4240_v31, %v4214_v46  ;;  %4792 = vmatpush.bf16.msra.mxu2 %v5622_v21  ;;  %v5606_v10 = vor.u32 %v5924_v17, %v5603_v37  ;;  %v4003_v32 = vmul.f32 %v8875_v59, %v9057_v27  ;;  %4777 = vmatpush.bf16.msra.mxu1 %v5762_v56  ;;  %v4183_v15 = vrot.slane %v9264_v13, 2  ;;  %v5745_v21 = vld [vmem:[%s9743_s12 + $0x168] sm:$0xf]  ;;  %v5960_v56 = vld [vmem:[%s9743_s12 + $0x16c] sm:$0xf] }
 0x3c1   : > { %v4304_v25 = vrot.slane %v4296_v55, 4  ;;  %4805 = vmatpush.bf16.msra.mxu3 %v5766_v40  ;;  %v4021_v14 = vmul.f32 %v8840_v44, %v9057_v27  ;;  %v4063_v43 = vmul.f32 %v8880_v1, %v9057_v27  ;;  %v4103_v63 = vmul.f32 %v8960_v35, %v9057_v27  ;;  %v9862_v44 = vld [vmem:[#allocation24_spill] sm:$0xff]  ;;  %v5962_v55 = vld [vmem:[%s9743_s12 + $0x174] sm:$0xf0] }
 0x3c2   : > { %v4298_v23 = vadd.f32 %v4282_v41, %v4256_v0  ;;  %v4310_v58 = vrot.slane %v4300_v9, 4  ;;  %v4105_v24 = vmul.f32 %v8960_v35, %v9221_v4  ;;  %v4121_v59 = vmul.f32 %v8969_v54, %v9057_v27 }
 0x3c3   : > { %v4314_v60 = vsel %vm1257_vm5, %v4294_v3, %v4304_v25  ;;  %4765 = vmatpush.bf16.msra.mxu0 %v5602_v5  ;;  %v4037_v11 = vrot.slane %v4021_v14, 1  ;;  %v4079_v8 = vrot.slane %v4063_v43, 2  ;;  %v4111_v45 = vadd.f32 %v4103_v63, %v9862_v44  ;;  %v5920_v25 = vld [vmem:[%s9743_s12 + $0x2c] sm:$0xf]  ;;  %v5587_v14 = vld [vmem:[%s9743_s12 + $0x38] sm:$0xf0] }
 0x3c4   : > { %v4316_v1 = vsel %vm1257_vm5, %v4298_v23, %v4310_v58  ;;  %4793 = vmatpush.bf16.msra.mxu2 %v5606_v10  ;;  %v4123_v2 = vmul.f32 %v8969_v54, %v9221_v4  ;;  %v4137_v28 = vrot.slane %v4121_v59, 1  ;;  %v9865_v35 = vrot.slane %v9864_v50, 1  ;;  %v5585_v10 = vld [vmem:[%s9743_s12 + $0x28] sm:$0xf]  ;;  %v5956_v44 = vld [vmem:[%s9743_s12 + $0x14c] sm:$0xf] }
 0x3c5   : > { %v9373_v47 = vpack.c.bf16 %v4316_v1, %v4314_v60  ;;  %v4053_v31 = vadd.f32 %v4037_v11, %v4003_v32  ;;  %v4157_v6 = vadd.f32 %v4141_v22, %v9285_v36  ;;  %v4163_v19 = vmul.f32 %v8972_v26, %v9057_v27  ;;  %v9868_v22 = vld [vmem:[#allocation16_spill] sm:$0xff]  ;;  %v5922_v32 = vld [vmem:[%s9743_s12 + $0x34] sm:$0xf0] }
 0x3c6   : > { %v4151_v61 = vadd.f32 %v9865_v35, %v9863_v62  ;;  %v4139_v57 = vrot.slane %v4123_v2, 1  ;;  %v4153_v42 = vadd.f32 %v4137_v28, %v4111_v45  ;;  %v4165_v54 = vmul.f32 %v8972_v26, %v9221_v4  ;;  %v5729_v58 = vld [vmem:[%s9743_s12 + $0x148] sm:$0xf] }
 0x3c7   : > { %4712 = vmatmul.bf16.vlgmr.msrb.gmra.mxu0 %v9373_v47  ;;  %4740 = vmatmul.bf16.vlgmr.msrb.gmra.mxu2 %v9373_v47  ;;  %v4095_v38 = vadd.f32 %v4079_v8, %v4053_v31  ;;  %v4179_v49 = vrot.slane %v4163_v19, 2  ;;  %v9867_v34 = vrot.slane %v9866_v53, 2  ;;  %v4201_v36 = vperm.slane %v9868_v22, 6  ;;  %v5569_v62 = vld [vmem:[%s9743_s12 + $0x8] sm:$0xf] }
 0x3c8   : > { %v4181_v33 = vrot.slane %v4165_v54, 2  ;;  %v4199_v52 = vadd.f32 %v4183_v15, %v4157_v6  ;;  %v4219_v13 = vperm.slane %v9868_v22, 7  ;;  %v4265_v17 = vmul.f32 %v6026_v7, %v9221_v4  ;;  %v5916_v6 = vld [vmem:[%s9743_s12 + $0xc] sm:$0xf]  ;;  %v5571_v19 = vld [vmem:[%s9743_s12 + $0x18] sm:$0xf0] }
 0x3c9   : > { %v4193_v48 = vadd.f32 %v9867_v34, %v4151_v61  ;;  %v4113_v26 = vadd.f32 %v4105_v24, %v4095_v38  ;;  %v4195_v30 = vadd.f32 %v4179_v49, %v4153_v42  ;;  %v4203_v18 = vmul.f32 %v4201_v36, %v9057_v27  ;;  %v5958_v24 = vld [vmem:[%s9743_s12 + $0x154] sm:$0xf0] }
 0x3ca   : > { %v4205_v12 = vmul.f32 %v4201_v36, %v9221_v4  ;;  %v4209_v39 = vmul.f32 %v4201_v36, %v9853_v51  ;;  %v4221_v41 = vmul.f32 %v4219_v13, %v9057_v27  ;;  %v4223_v20 = vmul.f32 %v4219_v13, %v9221_v4  ;;  %v5747_v4 = vld [vmem:[%s9743_s12 + $0x178] sm:$0xf0]  ;;  %v5954_v22 = vld [vmem:[%s9743_s12 + $0x134] sm:$0xf0] }
 0x3cb   : > { %v4155_v37 = vadd.f32 %v4139_v57, %v4113_v26  ;;  %v4211_v46 = vadd.f32 %v4203_v18, %v4193_v48  ;;  %v4225_v3 = vmul.f32 %v4219_v13, %v9224_v29  ;;  %v4227_v5 = vmul.f32 %v4219_v13, %v9853_v51  ;;  %v5713_v48 = vld [vmem:[%s9743_s12 + $0x128] sm:$0xf]  ;;  %v5952_v13 = vld [vmem:[%s9743_s12 + $0x12c] sm:$0xf] }
 0x3cc   : > { %v4213_v16 = vadd.f32 %v4205_v12, %v4195_v30  ;;  %v4217_v40 = vadd.f32 %v4209_v39, %v4199_v52  ;;  %v4239_v0 = vrot.slane %v4223_v20, 1  ;;  %v4263_v9 = vmul.f32 %v6026_v7, %v9057_v27 }
 0x3cd   : > { %v4197_v43 = vadd.f32 %v4181_v33, %v4155_v37  ;;  %v4207_v63 = vmul.f32 %v4201_v36, %v9224_v29  ;;  %v4237_v27 = vrot.slane %v4221_v41, 1  ;;  %v4269_v23 = vmul.f32 %v6026_v7, %v9853_v51  ;;  %v5731_v51 = vld [vmem:[%s9743_s12 + $0x158] sm:$0xf0] }
 0x3ce   : > { %v4241_v59 = vrot.slane %v4225_v3, 1  ;;  %v4243_v60 = vrot.slane %v4227_v5, 1  ;;  %v4255_v11 = vadd.f32 %v4239_v0, %v4213_v16  ;;  %v4267_v8 = vmul.f32 %v6026_v7, %v9224_v29  ;;  %v5918_v29 = vld [vmem:[%s9743_s12 + $0x14] sm:$0xf0]  ;;  %v5715_v7 = vld [vmem:[%s9743_s12 + $0x138] sm:$0xf0] }
 0x3cf   : > { %v4215_v45 = vadd.f32 %v4207_v63, %v4197_v43  ;;  %v4253_v1 = vadd.f32 %v4237_v27, %v4211_v46  ;;  %v4281_v2 = vrot.slane %v4265_v17, 2  ;;  %v4285_v28 = vrot.slane %v4269_v23, 2  ;;  %v5697_v17 = vld [vmem:[%s9743_s12 + $0x108] sm:$0xf]  ;;  %v5950_v46 = vld [vmem:[%s9743_s12 + $0x114] sm:$0xf0] }
 0x3d0   : > { %v4259_v50 = vadd.f32 %v4243_v60, %v4217_v40  ;;  %v4279_v35 = vrot.slane %v4263_v9, 2  ;;  %v5746_v61 = vor.u32 %v5962_v55, %v5745_v21  ;;  %v5750_v31 = vor.u32 %v5960_v56, %v5747_v4  ;;  %v5948_v16 = vld [vmem:[%s9743_s12 + $0x10c] sm:$0xf]  ;;  %v5699_v3 = vld [vmem:[%s9743_s12 + $0x118] sm:$0xf0]  ;;  %v4924_v4 = vld [vmem:[%s9745_s14 + $0x70] sm:$0xff] }
 0x3d1   : > { %v4257_v15 = vadd.f32 %v4241_v59, %v4215_v45  ;;  %v4297_v57 = vadd.f32 %v4281_v2, %v4255_v11  ;;  %v5586_v42 = vor.u32 %v5922_v32, %v5585_v10  ;;  %v5590_v54 = vor.u32 %v5920_v25, %v5587_v14  ;;  %v4925_v56 = vld [vmem:[%s9745_s14 + $0x78] sm:$0xff]  ;;  %v4923_v40 = vld [vmem:[%s9745_s14 + $0x68] sm:$0xff]  ;;  %v4940_v9 = vld [vmem:[%s9745_s14 + $0xf0] sm:$0xff] }
 0x3d2   : > { %v4283_v38 = vrot.slane %v4267_v8, 2  ;;  %v4301_v49 = vadd.f32 %v4285_v28, %v4259_v50  ;;  %4778 = vmatpush.bf16.msra.mxu1 %v5746_v61  ;;  %4806 = vmatpush.bf16.msra.mxu3 %v5750_v31  ;;  %v5730_v53 = vor.u32 %v5958_v24, %v5729_v58  ;;  %v5734_v34 = vor.u32 %v5956_v44, %v5731_v51  ;;  %v4941_v5 = vld [vmem:[%s9745_s14 + $0xf8] sm:$0xff]  ;;  %v4920_v10 = vld [vmem:[%s9745_s14 + $0x50] sm:$0xff]  ;;  %v4939_v32 = vld [vmem:[%s9745_s14 + $0xe8] sm:$0xff] }
 0x3d3   : > { %v4305_v36 = vrot.slane %v4297_v57, 4  ;;  %4766 = vmatpush.bf16.msra.mxu0 %v5586_v42  ;;  %4794 = vmatpush.bf16.msra.mxu2 %v5590_v54  ;;  %v5570_v33 = vor.u32 %v5918_v29, %v5569_v62  ;;  %v5574_v52 = vor.u32 %v5916_v6, %v5571_v19  ;;  %v4295_v26 = vadd.f32 %v4279_v35, %v4253_v1  ;;  %v4921_v0 = vld [vmem:[%s9745_s14 + $0x58] sm:$0xff]  ;;  %v4919_v14 = vld [vmem:[%s9745_s14 + $0x48] sm:$0xff]  ;;  %v4938_v43 = vld [vmem:[%s9745_s14 + $0xe0] sm:$0xff] }
 0x3d4   : > { %v4299_v30 = vadd.f32 %v4283_v38, %v4257_v15  ;;  %v4311_v18 = vrot.slane %v4301_v49, 4  ;;  %v5714_v12 = vor.u32 %v5954_v22, %v5713_v48  ;;  %v5718_v20 = vor.u32 %v5952_v13, %v5715_v7  ;;  %v4918_v63 = vld [vmem:[%s9745_s14 + $0x40] sm:$0xff]  ;;  %v4937_v27 = vld [vmem:[%s9745_s14 + $0xd8] sm:$0xff]  ;;  %v4936_v58 = vld [vmem:[%s9745_s14 + $0xd0] sm:$0xff] }
 0x3d5   : > { %v4315_v39 = vsel %vm1257_vm5, %v4295_v26, %v4305_v36  ;;  %v5698_v21 = vor.u32 %v5950_v46, %v5697_v17  ;;  %v5702_v55 = vor.u32 %v5948_v16, %v5699_v3  ;;  %v4917_v23 = vld [vmem:[%s9745_s14 + $0x38] sm:$0xff]  ;;  %v9531_v60 = vld [vmem:[%s9744_s13] ss:$2 sm:$0xf]  ;;  %v4956_v8 = vld [vmem:[%s9745_s14 + $0x170] sm:$0xff] }
 0x3d6   : > { %v4317_v41 = vsel %vm1257_vm5, %v4299_v30, %v4311_v18  ;;  %4779 = vmatpush.bf16.msra.mxu1 %v5730_v53  ;;  %4807 = vmatpush.bf16.msra.mxu3 %v5734_v34  ;;  %v4957_v24 = vld [vmem:[%s9745_s14 + $0x178] sm:$0xff]  ;;  %v4916_v44 = vld [vmem:[%s9745_s14 + $0x30] sm:$0xff]  ;;  %v4935_v51 = vld [vmem:[%s9745_s14 + $0xc8] sm:$0xff]  ;;  %v4818_v2 = vperm.slane %v9531_v60, 0  ;;  %v4819_v53 = vperm.slane %v9531_v60, 1 }
 0x3d7   : > { %v4319_v37 = vpack.c.bf16 %v4317_v41, %v4315_v39  ;;  %4767 = vmatpush.bf16.msra.mxu0 %v5570_v33  ;;  %4795 = vmatpush.bf16.msra.mxu2 %v5574_v52  ;;  %v4955_v45 = vld [vmem:[%s9745_s14 + $0x168] sm:$0xff]  ;;  %v4934_v62 = vld [vmem:[%s9745_s14 + $0xc0] sm:$0xff]  ;;  %v4933_v19 = vld [vmem:[%s9745_s14 + $0xb8] sm:$0xff] }
 0x3d8   : > { %v4915_v28 = vld [vmem:[%s9745_s14 + $0x28] sm:$0xff]  ;;  %v9555_v29 = vld [vmem:[%s9744_s13 + $0x1] ss:$2 sm:$0xf]  ;;  %v4973_v42 = vld [vmem:[%s9745_s14 + $0x1f8] sm:$0xff] }
 0x3d9   : > { %4726 = vmatmul.bf16.vlgmr.msrb.gmra.mxu1 %v4319_v37  ;;  %4754 = vmatmul.bf16.vlgmr.msrb.gmra.mxu3 %v4319_v37  ;;  %v4837_v31 = vperm.slane %v9555_v29, 0  ;;  %v4914_v6 = vld [vmem:[%s9745_s14 + $0x20] sm:$0xff]  ;;  %v4913_v54 = vld [vmem:[%s9745_s14 + $0x18] sm:$0xff]  ;;  %v4932_v38 = vld [vmem:[%s9745_s14 + $0xb0] sm:$0xff] }
 0x3da   : > { %4780 = vmatpush.bf16.msra.mxu1 %v5714_v12  ;;  %4808 = vmatpush.bf16.msra.mxu3 %v5718_v20  ;;  %v4954_v15 = vld [vmem:[%s9745_s14 + $0x160] sm:$0xff]  ;;  %v4953_v48 = vld [vmem:[%s9745_s14 + $0x158] sm:$0xff]  ;;  %v4972_v22 = vld [vmem:[%s9745_s14 + $0x1f0] sm:$0xff]  ;;  %v4838_v12 = vperm.slane %v9555_v29, 1 }
 0x3db   : > { %4768 = vmatmul.bf16.vlgmr.msra.gmra.mxu0 %v9373_v47  ;;  %4796 = vmatmul.bf16.vlgmr.msra.gmra.mxu2 %v9373_v47  ;;  %v4922_v47 = vld [vmem:[%s9745_s14 + $0x60] sm:$0xff]  ;;  %v4912_v36 = vld [vmem:[%s9745_s14 + $0x10] sm:$0xff]  ;;  %v4931_v52 = vld [vmem:[%s9745_s14 + $0xa8] sm:$0xff] }
 0x3dc   : > { %4975 = vmatpush.msrb.mxu0 %v4925_v56  ;;  %5015 = vmatpush.msrb.mxu2 %v4957_v24  ;;  %v4952_v13 = vld [vmem:[%s9745_s14 + $0x150] sm:$0xff]  ;;  %v4971_v7 = vld [vmem:[%s9745_s14 + $0x1e8] sm:$0xff]  ;;  %v4930_v20 = vld [vmem:[%s9745_s14 + $0xa0] sm:$0xff] }
 0x3dd   : > { %v4911_v41 = vld [vmem:[%s9745_s14 + $0x8] sm:$0xff]  ;;  %v4970_v16 = vld [vmem:[%s9745_s14 + $0x1e0] sm:$0xff] }
 0x3de   : > { %4781 = vmatpush.bf16.msra.mxu1 %v5698_v21  ;;  %4809 = vmatpush.bf16.msra.mxu3 %v5702_v55  ;;  %v4951_v17 = vld [vmem:[%s9745_s14 + $0x148] sm:$0xff]  ;;  %v4910_v3 = vld [vmem:[%s9745_s14] sm:$0xff]  ;;  %v4929_v21 = vld [vmem:[%s9745_s14 + $0x98] sm:$0xff] }
 0x3df   : > { %4976 = vmatpush.msrb.mxu0 %v4924_v4  ;;  %5016 = vmatpush.msrb.mxu2 %v4956_v8 }
 0x3e1   : > { %4977 = vmatpush.msrb.mxu0 %v4923_v40  ;;  %5017 = vmatpush.msrb.mxu2 %v4955_v45  ;;  %v4950_v40 = vld [vmem:[%s9745_s14 + $0x140] sm:$0xff] }
 0x3e2   : > { %4995 = vmatpush.msrb.mxu1 %v4941_v5  ;;  %5035 = vmatpush.msrb.mxu3 %v4973_v42  ;;  %v4928_v5 = vld [vmem:[%s9745_s14 + $0x90] sm:$0xff]  ;;  %v4945_v42 = vld [vmem:[%s9745_s14 + $0x118] sm:$0xff] }
 0x3e3   : > { %4978 = vmatpush.msrb.mxu0 %v4922_v47  ;;  %5018 = vmatpush.msrb.mxu2 %v4954_v15  ;;  %v4969_v47 = vld [vmem:[%s9745_s14 + $0x1d8] sm:$0xff]  ;;  %v4821_v15 = vperm.slane %v9531_v60, 3 }
 0x3e4   : > { %4996 = vmatpush.msrb.mxu1 %v4940_v9  ;;  %5036 = vmatpush.msrb.mxu3 %v4972_v22  ;;  %v4949_v9 = vld [vmem:[%s9745_s14 + $0x138] sm:$0xff]  ;;  %v4963_v22 = vld [vmem:[%s9745_s14 + $0x1a8] sm:$0xff] }
 0x3e5   : > { %4979 = vmatpush.msrb.mxu0 %v4921_v0  ;;  %5019 = vmatpush.msrb.mxu2 %v4953_v48 }
 0x3e6   : > { %4997 = vmatpush.msrb.mxu1 %v4939_v32  ;;  %5037 = vmatpush.msrb.mxu3 %v4971_v7  ;;  %v4943_v7 = vld [vmem:[%s9745_s14 + $0x108] sm:$0xff] }
 0x3e7   : > { %4980 = vmatpush.msrb.mxu0 %v4920_v10  ;;  %5020 = vmatpush.msrb.mxu2 %v4952_v13  ;;  %v4968_v10 = vld [vmem:[%s9745_s14 + $0x1d0] sm:$0xff]  ;;  %v4840_v13 = vperm.slane %v9555_v29, 3 }
 0x3e8   : > { %4998 = vmatpush.msrb.mxu1 %v4938_v43  ;;  %5038 = vmatpush.msrb.mxu3 %v4970_v16  ;;  %v4927_v43 = vld [vmem:[%s9745_s14 + $0x88] sm:$0xff] }
 0x3e9   : > { %4782 = vmatmul.bf16.vlgmr.msra.gmra.mxu1 %v4319_v37  ;;  %4810 = vmatmul.bf16.vlgmr.msra.gmra.mxu3 %v4319_v37 }
 0x3ea   : > { %4981 = vmatpush.msrb.mxu0 %v4919_v14  ;;  %4999 = vmatpush.msrb.mxu1 %v4937_v27  ;;  %v4820_v27 = vperm.slane %v9531_v60, 2  ;;  %v4944_v60 = vld [vmem:[%s9745_s14 + $0x110] sm:$0xff] }
 0x3eb   : > { %5021 = vmatpush.msrb.mxu2 %v4951_v17  ;;  %5039 = vmatpush.msrb.mxu3 %v4969_v47  ;;  %v4960_v47 = vld [vmem:[%s9745_s14 + $0x190] sm:$0xff] }
 0x3ec   : > { %4982 = vmatpush.msrb.mxu0 %v4918_v63  ;;  %5000 = vmatpush.msrb.mxu1 %v4936_v58  ;;  %v4967_v58 = vld [vmem:[%s9745_s14 + $0x1c8] sm:$0xff] }
 0x3ed   : > { %5022 = vmatpush.msrb.mxu2 %v4950_v40  ;;  %5040 = vmatpush.msrb.mxu3 %v4968_v10  ;;  %v4959_v10 = vld [vmem:[%s9745_s14 + $0x188] sm:$0xff] }
 0x3ee   : > { %4983 = vmatpush.msrb.mxu0 %v4917_v23  ;;  %5001 = vmatpush.msrb.mxu1 %v4935_v51  ;;  %v4948_v23 = vld [vmem:[%s9745_s14 + $0x130] sm:$0xff]  ;;  %v4966_v51 = vld [vmem:[%s9745_s14 + $0x1c0] sm:$0xff] }
 0x3ef   : > { %5023 = vmatpush.msrb.mxu2 %v4949_v9  ;;  %5041 = vmatpush.msrb.mxu3 %v4967_v58 }
 0x3f0   : > { %4984 = vmatpush.msrb.mxu0 %v4916_v44  ;;  %5002 = vmatpush.msrb.mxu1 %v4934_v62  ;;  %v4947_v44 = vld [vmem:[%s9745_s14 + $0x128] sm:$0xff]  ;;  %v4839_v62 = vperm.slane %v9555_v29, 2  ;;  %v4942_v29 = vld [vmem:[%s9745_s14 + $0x100] sm:$0xff] }
 0x3f1   : > { %5024 = vmatpush.msrb.mxu2 %v4948_v23  ;;  %5042 = vmatpush.msrb.mxu3 %v4966_v51 }
 0x3f2   : > { %4985 = vmatpush.msrb.mxu0 %v4915_v28  ;;  %5003 = vmatpush.msrb.mxu1 %v4933_v19 }
 0x3f3   : > { %5025 = vmatpush.msrb.mxu2 %v4947_v44 }
 0x3f4   : > { %4986 = vmatpush.msrb.mxu0 %v4914_v6  ;;  %5004 = vmatpush.msrb.mxu1 %v4932_v38 }
 0x3f6   : > { %4987 = vmatpush.msrb.mxu0 %v4913_v54  ;;  %5005 = vmatpush.msrb.mxu1 %v4931_v52  ;;  %v4964_v54 = vld [vmem:[%s9745_s14 + $0x1b0] sm:$0xff] }
 0x3f8   : > { %4988 = vmatpush.msrb.mxu0 %v4912_v36  ;;  %5006 = vmatpush.msrb.mxu1 %v4930_v20 }
 0x3fa   : > { %4989 = vmatpush.msrb.mxu0 %v4911_v41  ;;  %5007 = vmatpush.msrb.mxu1 %v4929_v21  ;;  %v4961_v21 = vld [vmem:[%s9745_s14 + $0x198] sm:$0xff] }
 0x3fc   : > { %4990 = vmatpush.msrb.mxu0 %v4910_v3  ;;  %5008 = vmatpush.msrb.mxu1 %v4928_v5 }
 0x3fe   : > { %5009 = vmatpush.msrb.mxu1 %v4927_v43 }
 0x444   : > { %v4713_v25 = vpop.f32.mrf.mxu0 }
 0x44a   : > { %v4741_v11 = vpop.f32.mrf.mxu2 }
 0x44c   : > { %v4715_v50 = vpop.f32.mrf.mxu0 }
 0x452   : > { %v4743_v33 = vpop.f32.mrf.mxu2 }
 0x456   : > { %v4727_v59 = vpop.f32.mrf.mxu1 }
 0x457   : > { %v4728_v1 = vadd.f32 %v4727_v59, %v4713_v25 }
 0x458   : > { %v4769_v37 = vpop.f32.mrf.mxu0 }
 0x459   : > { %v4826_v61 = vmul.f32 %v4818_v2, %v4728_v1 }
 0x45b   : > { %v4845_v26 = vadd.f32 %v4837_v31, %v4826_v61  ;;  %v4965_v61 = vld [vmem:[%s9745_s14 + $0x1b8] sm:$0xff] }
 0x45c   : > { %v4755_v35 = vpop.f32.mrf.mxu3  ;;  %5043 = vmatpush.msrb.mxu3 %v4965_v61 }
 0x45d   : > { %v4756_v49 = vadd.f32 %v4755_v35, %v4741_v11  ;;  %v4853_v55 = vmax.f32 %v4845_v26, 0.0  ;;  %v4926_v11 = vld [vmem:[%s9745_s14 + $0x80] sm:$0xff] }
 0x45e   : > { %v4729_v57 = vpop.f32.mrf.mxu1  ;;  %v4797_v8 = vpop.f32.mrf.mxu2  ;;  %5010 = vmatpush.msrb.mxu1 %v4926_v11  ;;  %v4946_v35 = vld [vmem:[%s9745_s14 + $0x120] sm:$0xff]  ;;  %5044 = vmatpush.msrb.mxu3 %v4964_v54 }
 0x45f   : > { %v4730_v34 = vadd.f32 %v4729_v57, %v4715_v50  ;;  %v4827_v18 = vmul.f32 %v4819_v53, %v4756_v49  ;;  %5026 = vmatpush.msrb.mxu2 %v4946_v35  ;;  %v4962_v26 = vld [vmem:[%s9745_s14 + $0x1a0] sm:$0xff] }
 0x460   : > { %v4771_v19 = vpop.f32.mrf.mxu0  ;;  %5045 = vmatpush.msrb.mxu3 %v4963_v22 }
 0x461   : > { %v4830_v30 = vmul.f32 %v4818_v2, %v4730_v34  ;;  %v4846_v32 = vadd.f32 %v4838_v12, %v4827_v18  ;;  %5027 = vmatpush.msrb.mxu2 %v4945_v42 }
 0x462   : > { %5046 = vmatpush.msrb.mxu3 %v4962_v26 }
 0x463   : > { %v4849_v39 = vadd.f32 %v4837_v31, %v4830_v30  ;;  %v4854_v45 = vmax.f32 %v4846_v32, 0.0  ;;  %5028 = vmatpush.msrb.mxu2 %v4944_v60 }
 0x464   : > { %v4757_v46 = vpop.f32.mrf.mxu3  ;;  %5047 = vmatpush.msrb.mxu3 %v4961_v21 }
 0x465   : > { %v4857_v56 = vmax.f32 %v4849_v39, 0.0  ;;  %v4758_v4 = vadd.f32 %v4757_v46, %v4743_v33  ;;  %5029 = vmatpush.msrb.mxu2 %v4943_v7 }
 0x466   : > { %v4783_v0 = vpop.f32.mrf.mxu1  ;;  %v4799_v20 = vpop.f32.mrf.mxu2  ;;  %5048 = vmatpush.msrb.mxu3 %v4960_v47 }
 0x467   : > { %v4861_v25 = vadd.f32 %v4857_v56, %v4853_v55  ;;  %v4831_v14 = vmul.f32 %v4819_v53, %v4758_v4  ;;  %v4784_v63 = vadd.f32 %v4783_v0, %v4769_v37  ;;  %5030 = vmatpush.msrb.mxu2 %v4942_v29 }
 0x468   : > { %5049 = vmatpush.msrb.mxu3 %v4959_v10 }
 0x469   : > { %v4862_v24 = vrot.slane %v4861_v25, 4  ;;  %v4850_v59 = vadd.f32 %v4838_v12, %v4831_v14  ;;  %v4828_v28 = vmul.f32 %v4820_v27, %v4784_v63  ;;  %v4958_v63 = vld [vmem:[%s9745_s14 + $0x180] sm:$0xff] }
 0x46a   : > { %5050 = vmatpush.msrb.mxu3 %v4958_v63 }
 0x46b   : > { %v4863_v1 = vadd.f32 %v4862_v24, %v4861_v25  ;;  %v4858_v2 = vmax.f32 %v4850_v59, 0.0  ;;  %v4847_v48 = vadd.f32 %v4839_v62, %v4828_v28  ;;  %v4905_v28 = vlaneseq }
 0x46c   : > { %v4811_v50 = vpop.f32.mrf.mxu3 }
 0x46d   : > { %v4864_v31 = vrot.slane %v4863_v1, 2  ;;  %v4868_v6 = vadd.f32 %v4858_v2, %v4854_v45  ;;  %v4812_v49 = vadd.f32 %v4811_v50, %v4797_v8  ;;  %v4855_v41 = vmax.f32 %v4847_v48, 0.0 }
 0x46e   : > { %v4785_v57 = vpop.f32.mrf.mxu1  ;;  %vm4907_vm8 = vcmp.lt.s32.totalorder %v4905_v28, 512 }
 0x46f   : > { %v4869_v38 = vrot.slane %v4868_v6, 4  ;;  %v4786_v53 = vadd.f32 %v4785_v57, %v4771_v19  ;;  %v4865_v34 = vadd.f32 %v4864_v31, %v4863_v1  ;;  %v4829_v18 = vmul.f32 %v4821_v15, %v4812_v49 }
 0x471   : > { %v4870_v36 = vadd.f32 %v4869_v38, %v4868_v6  ;;  %v4832_v33 = vmul.f32 %v4820_v27, %v4786_v53  ;;  %v4866_v52 = vrot.slane %v4865_v34, 1  ;;  %v4848_v55 = vadd.f32 %v4840_v13, %v4829_v18 }
 0x473   : > { %v4871_v30 = vrot.slane %v4870_v36, 2  ;;  %v4851_v12 = vadd.f32 %v4839_v62, %v4832_v33  ;;  %v4867_v39 = vadd.f32 %v4866_v52, %v4865_v34  ;;  %v4856_v32 = vmax.f32 %v4848_v55, 0.0 }
 0x474   : > { %v4813_v17 = vpop.f32.mrf.mxu3 }
 0x475   : > { %v4859_v37 = vmax.f32 %v4851_v12, 0.0  ;;  %v4814_v46 = vadd.f32 %v4813_v17, %v4799_v20  ;;  %v4889_v16 = vmul.f32 0.0625, %v4867_v39  ;;  %v4872_v3 = vadd.f32 %v4871_v30, %v4870_v36 }
 0x477   : > { %v4875_v56 = vadd.f32 %v4859_v37, %v4855_v41  ;;  %v4833_v4 = vmul.f32 %v4821_v15, %v4814_v46  ;;  %4991 = vmatmul.f32.vlgmr.msrb.gmra.mxu0 %v4889_v16  ;;  %v4873_v40 = vrot.slane %v4872_v3, 1  ;;  %v4974_v15 = vld [vmem:[%s9746_s15] sm:$0x1] }
 0x479   : > { %v4876_v5 = vrot.slane %v4875_v56, 4  ;;  %v4852_v0 = vadd.f32 %v4840_v13, %v4833_v4  ;;  %v4874_v9 = vadd.f32 %v4873_v40, %v4872_v3 }
 0x47b   : > { %v4877_v25 = vadd.f32 %v4876_v5, %v4875_v56  ;;  %v4860_v14 = vmax.f32 %v4852_v0, 0.0  ;;  %v4890_v43 = vmul.f32 0.0625, %v4874_v9 }
 0x47d   : > { %v4878_v27 = vrot.slane %v4877_v25, 2  ;;  %v4882_v23 = vadd.f32 %v4860_v14, %v4856_v32  ;;  %5011 = vmatmul.f32.vlgmr.msrb.gmra.mxu1 %v4890_v43  ;;  %v4897_v62 = vrot.slane %v4890_v43, 7 }
 0x47f   : > { %v4883_v58 = vrot.slane %v4882_v23, 4  ;;  %v4879_v24 = vadd.f32 %v4878_v27, %v4877_v25  ;;  %v4900_v31 = vsel %vm628_vm0, %v4889_v16, %v4897_v62 }
 0x481   : > { %v4884_v59 = vadd.f32 %v4883_v58, %v4882_v23  ;;  %v4880_v11 = vrot.slane %v4879_v24, 1 }
 0x483   : > { %v4885_v8 = vrot.slane %v4884_v59, 2  ;;  %v4881_v44 = vadd.f32 %v4880_v11, %v4879_v24 }
 0x485   : > { %v4891_v51 = vmul.f32 0.0625, %v4881_v44  ;;  %v4886_v45 = vadd.f32 %v4885_v8, %v4884_v59 }
 0x487   : > { %5031 = vmatmul.f32.vlgmr.msrb.gmra.mxu2 %v4891_v51  ;;  %v4887_v1 = vrot.slane %v4886_v45, 1  ;;  %v4898_v35 = vrot.slane %v4891_v51, 6 }
 0x489   : > { %v4888_v2 = vadd.f32 %v4887_v1, %v4886_v45 }
 0x48b   : > { %v4892_v50 = vmul.f32 0.0625, %v4888_v2 }
 0x48d   : > { %v4899_v61 = vrot.slane %v4892_v50, 5  ;;  %5051 = vmatmul.f32.vlgmr.msrb.gmra.mxu3 %v4892_v50 }
 0x48f   : > { %v4902_v6 = vsel %vm4901_vm7, %v4898_v35, %v4899_v61 }
 0x490   : > { %v4903_v19 = vsel %vm1227_vm3, %v4900_v31, %v4902_v6 }
 0x491   : > { %4909 = vst.msk [vmem:[%s556_s30] sm:$0xf] %vm4907_vm8, %v4903_v19 }
 0x4f4   : > { %v4992_v57 = vpop.f32.mrf.mxu0 }
 0x4f5   : > { %v4993_v54 = vadd.f32 %v4992_v57, %v4974_v15 }
 0x4fa   : > { %v5012_v42 = vpop.f32.mrf.mxu1 }
 0x4fb   : > { %v5013_v49 = vadd.f32 %v5012_v42, %v4993_v54 }
 0x50a   : > { %v5032_v38 = vpop.f32.mrf.mxu2 }
 0x50b   : > { %v5033_v53 = vadd.f32 %v5032_v38, %v5013_v49 }
 0x510   : > { %v5052_v34 = vpop.f32.mrf.mxu3 }
 0x511   : > { %v5053_v48 = vadd.f32 %v5052_v34, %v5033_v53 }
 0x513   : > { %5056 = vst.msk [vmem:[%s541_s18] sm:$0x1] %vm5055_vm9, %v5053_v48 }
 0x514   : > { %6134 = shalt.err (!%p6131_p3)
}
 0x515   : > { %5979 = dma.vmem_to_hbm [thread:$0]  (%p6300_p5), %s5073_s2, 16, %s5075_s21, %s5058_s3  }
 0x516 PF: > { %s9869_s26 = sld [smem:[#allocation7_spill]] }
 0x517   : > { %s9870_s20 = sld [smem:[#allocation5_spill]] }
 0x51c   : > { %p5985_p4 = scmp.ge.s32.totalorder %s9869_s26, 2 }
 0x51d   : > { %s5089_s18 = sand.u32 1, %s9870_s20  }
 0x51e   : > { %p5982_p7 = pnand %p5985_p4, %p6304_p6  ;;  %s5090_s28 = scalar_lea.sflag [#allocation3], %s5089_s18 }
 0x520   : > { %p5983_p8 = pneg %p5982_p7 }
 0x522   : > { %6152 = dma.done.wait (%p5983_p8), %s5090_s28, 16  }
 0x523   : > { %6154 = vsyncadd (%p5983_p8), %s5090_s28, 4294967280  ;;  %s9872_s27 = sld [smem:[#allocation8_spill]]  ;;  %s9875_s24 = smov %s6161_s25 }
 0x524   : > { %s9873_s22 = sld [smem:[#allocation6_spill]] }
 0x525   : > { %s9874_s26 = sld [smem:[#allocation9_spill]] }
 0x529   : > { %p28_p9 = scmp.ge.s32.totalorder %s9872_s27, 4  }
 0x52a   : > { %s9876_s25 = smov %s9873_s22 }
 0x52b   :  { %30 = sbr.rel (!%p28_p9) target bundleno = 8 (0x8), region = 136 }
 0x530   :  { %5102 = vsyncpa [#allocation3], 1 }
 0x531   :  { %5104 = vsyncpa [#allocation3 + $0x1], 1 }

</bundles_post_ra>
